<compile_context>
chip_gen: v5e
topology: v5e:2x2
jax: 0.10.0
libtpu: 0.0.40
codegen_flags: <defaults>
</compile_context>

<pallas_src>
import functools

import jax
import jax.numpy as jnp
from jax.experimental import pallas as pl
from jax.experimental.pallas import tpu as pltpu

NODE_PAD = 256   # node-count padding granularity (keeps tm/tk divisors simple)
FEAT_PAD = 128   # feature padding (lane-dense outputs)


# ---------------------------------------------------------------------------
# helpers
# ---------------------------------------------------------------------------
def _round_up(x, m):
    return (x + m - 1) // m * m


def _pick_tm(n_pad):
    # Largest row tile that still leaves >= 2 row tiles (megacore-friendly).
    for c in (512, 256, 128):
        if n_pad % c == 0 and n_pad // c >= 2:
            return c
    for c in (512, 256, 128):
        if n_pad % c == 0:
            return c
    return n_pad


def _pick_tk(n_pad):
    for c in (2048, 1024, 512, 256, 128):
        if n_pad % c == 0:
            return c
    return n_pad


def _vmem_cap_bytes():
    cap = 40 << 20  # safe default: v7x has 64 MiB physical VMEM per TensorCore
    try:
        cap = int(pltpu.get_tpu_info().vmem_capacity_bytes) * 5 // 8
    except Exception:  # pragma: no cover - info query not available
        pass
    return cap


def _vmem_limit_bytes(n_pad, tm, tk, f_in, f_out, out_itemsize):
    # Actual buffer-count-aware footprint (+25% headroom), never below the 32 MiB
    # default scoped limit, capped to the per-generation budget.
    footprint = (
        2 * tm * tk * 1                   # int8 A tiles (double-buffered)
        + 2 * n_pad * f_in * 2            # resident bf16 X (2 bufs allocated)
        + 2 * tm * 1 * 4                  # inv_deg tiles
        + 2 * 2 * f_in * f_out * 2        # W_l + W_r (bf16, resident)
        + 2 * 1 * f_out * 4               # bias
        + tm * f_in * 4                   # f32 accumulator scratch
        + 2 * tm * f_out * out_itemsize   # output tiles
    )
    return int(min(_vmem_cap_bytes(), max(32 << 20, footprint + footprint // 4)))


# ---------------------------------------------------------------------------
# kernel
# ---------------------------------------------------------------------------
def _sage_fused_kernel(a_ref, x_ref, invdeg_ref, wl_ref, wr_ref, b_ref,
                       o_ref, acc_ref):
    """ReLU( inv_deg * (A @ X) @ W_l + X_self @ W_r + b ) for one (row, K) tile."""
    i = pl.program_id(0)
    k = pl.program_id(1)
    tm, tk = a_ref.shape

    @pl.when(k == 0)
    def _():
        acc_ref[...] = jnp.zeros_like(acc_ref)

    # int8 edge counts -> bf16 (exact for small counts); bf16 MXU matmul, f32 acc.
    a_tile = a_ref[...].astype(jnp.float32).astype(jnp.bfloat16)
    k_off = pl.multiple_of(k * tk, tk)
    x_nb = x_ref[pl.ds(k_off, tk), :]              # neighbor rows from resident X
    acc_ref[...] += jnp.dot(a_tile, x_nb, preferred_element_type=jnp.float32)

    @pl.when(k == pl.num_programs(1) - 1)
    def _():
        # f32 per-row mean scale (1/deg) applied here, not baked into A.
        agg = (acc_ref[...] * invdeg_ref[...]).astype(jnp.bfloat16)
        i_off = pl.multiple_of(i * tm, tm)
        x_self = x_ref[pl.ds(i_off, tm), :]        # self rows from resident X
        out = (
            jnp.dot(agg, wl_ref[...], preferred_element_type=jnp.float32)
            + jnp.dot(x_self, wr_ref[...], preferred_element_type=jnp.float32)
            + b_ref[...]
        )
        o_ref[...] = jnp.maximum(out, 0.0).astype(o_ref.dtype)


# ---------------------------------------------------------------------------
# pallas_call wrapper
# ---------------------------------------------------------------------------
def _sage_fused(a_counts, x, inv_deg, w_l, w_r, b, *, m_rows, out_dtype, tm, tk):
    n_pad = a_counts.shape[0]
    f_in = x.shape[1]
    f_out = w_l.shape[1]
    grid = (m_rows // tm, n_pad // tk)
    out_itemsize = jnp.dtype(out_dtype).itemsize

    cost = pl.CostEstimate(
        flops=2 * m_rows * n_pad * f_in + 2 * 2 * m_rows * f_in * f_out,
        transcendentals=0,
        bytes_accessed=(m_rows * n_pad                 # int8 A
                        + n_pad * f_in * 2             # resident X (fetched once)
                        + 2 * f_in * f_out * 2         # W_l + W_r
                        + m_rows * 4 + f_out * 4       # inv_deg + bias
                        + m_rows * f_out * out_itemsize),
    )

    return pl.pallas_call(
        _sage_fused_kernel,
        out_shape=jax.ShapeDtypeStruct((m_rows, f_out), out_dtype),
        grid_spec=pltpu.PrefetchScalarGridSpec(
            num_scalar_prefetch=0,
            grid=grid,
            in_specs=[
                pl.BlockSpec((tm, tk), lambda i, k: (i, k)),       # A (int8 counts)
                pl.BlockSpec((n_pad, f_in), lambda i, k: (0, 0)),  # X, VMEM-resident
                pl.BlockSpec((tm, 1), lambda i, k: (i, 0)),        # 1/deg (f32)
                pl.BlockSpec((f_in, f_out), lambda i, k: (0, 0)),  # W_l (bf16)
                pl.BlockSpec((f_in, f_out), lambda i, k: (0, 0)),  # W_r (bf16)
                pl.BlockSpec((1, f_out), lambda i, k: (0, 0)),     # bias (f32)
            ],
            out_specs=pl.BlockSpec((tm, f_out), lambda i, k: (i, 0)),
            scratch_shapes=[pltpu.VMEM((tm, f_in), jnp.float32)],
        ),
        compiler_params=pltpu.CompilerParams(
            dimension_semantics=("parallel", "arbitrary"),
            vmem_limit_bytes=_vmem_limit_bytes(n_pad, tm, tk, f_in, f_out,
                                               out_itemsize),
        ),
        cost_estimate=cost,
    )(a_counts, x, inv_deg, w_l, w_r, b)


def sage_layer(a_counts, inv_deg, x, w_l, w_r, b, *, out_rows, out_dtype):
    """One SAGEConv layer + ReLU on the MXU."""
    n_pad = a_counts.shape[0]
    f_in = x.shape[1]
    full_rows = out_rows >= n_pad
    if full_rows:
        tm = _pick_tm(n_pad)
        m_rows = n_pad
    else:
        # framework=False last layer: only ceil(batch/tm) row tiles; tm=128 keeps
        # >= 2 row tiles (v7x megacore) whenever batch_size > 128.
        tm = 128
        m_rows = _round_up(min(out_rows, n_pad), tm)
    tk = _pick_tk(n_pad)

    # Resident-X gate: the whole X matrix must fit the per-generation VMEM budget.
    if 2 * n_pad * f_in * 2 > (_vmem_cap_bytes() * 3) // 4:
        # TODO(synk): stream X per K tile / sparse neighbor gather for huge graphs.
        raise NotImplementedError("graph too large for VMEM-resident X")

    return _sage_fused(a_counts, x, inv_deg, w_l, w_r, b,
                       m_rows=m_rows, out_dtype=out_dtype, tm=tm, tk=tk)


# ---------------------------------------------------------------------------
# glue (plain JAX): adjacency build, padding, parameter init, forward, reference
# ---------------------------------------------------------------------------
def build_adjacency(edge_index, n_pad):
    """int8 edge-count matrix A[dst, src] and f32 per-row 1/deg (PyG mean agg).

    Duplicate edges are counted (matching PyG scatter-mean); int8 would overflow
    only past 127 duplicates of a single edge.  No f32 N^2 array is materialized.
    """
    src, dst = edge_index[0], edge_index[1]
    ones8 = jnp.ones(src.shape, jnp.int8)
    a = jnp.zeros((n_pad, n_pad), jnp.int8).at[dst, src].add(ones8)
    deg = jnp.zeros((n_pad,), jnp.float32).at[dst].add(1.0)
    inv_deg = 1.0 / jnp.maximum(deg, 1.0)
    return a, inv_deg.reshape(n_pad, 1)


def _pad2d(arr, rows, cols):
    r, c = arr.shape
    return jnp.pad(arr, ((0, rows - r), (0, cols - c)))


def init_params(key, input_channels, hidden_channels, output_channels, layers):
    dims = [input_channels] + [hidden_channels] * (layers - 1) + [output_channels]
    params = []
    for i in range(layers):
        f_in, f_out = dims[i], dims[i + 1]
        key, k1, k2, k3 = jax.random.split(key, 4)
        scale = 1.0 / jnp.sqrt(jnp.float32(f_in))
        w_l = jax.random.normal(k1, (f_in, f_out), jnp.float32) * scale
        w_r = jax.random.normal(k2, (f_in, f_out), jnp.float32) * scale
        b = 0.1 * jax.random.normal(k3, (f_out,), jnp.float32)
        params.append((w_l, w_r, b))
    return params


def pad_params(raw_params):
    padded, dims = [], []
    for (w_l, w_r, b) in raw_params:
        f_in, f_out = w_l.shape
        fi, fo = _round_up(f_in, FEAT_PAD), _round_up(f_out, FEAT_PAD)
        padded.append((
            _pad2d(w_l, fi, fo).astype(jnp.bfloat16),
            _pad2d(w_r, fi, fo).astype(jnp.bfloat16),
            jnp.pad(b, (0, fo - f_out)).reshape(1, fo).astype(jnp.float32),
        ))
        dims.append((f_in, f_out))
    return tuple(padded), tuple(dims)


@functools.partial(jax.jit, static_argnums=(4, 5, 6, 7))
def encoder_forward(x, a_counts, inv_deg, params, layer_dims, num_nodes,
                    batch_size, framework):
    n_layers = len(params)
    n_pad = a_counts.shape[0]
    h = x
    for li, (w_l, w_r, b) in enumerate(params):
        is_last = li == n_layers - 1
        out_rows = batch_size if (is_last and not framework) else n_pad
        out_dtype = jnp.float32 if is_last else jnp.bfloat16
        h = sage_layer(a_counts, inv_deg, h, w_l, w_r, b,
                       out_rows=out_rows, out_dtype=out_dtype)
    rows = num_nodes if framework else batch_size
    return h[:rows, :layer_dims[-1][1]]


def reference_forward(x, counts, inv_deg, raw_params, batch_size, framework):
    """Pure-JAX reference mirroring the kernel's cast points (bf16 MXU, f32 acc)."""
    h = x.astype(jnp.bfloat16)
    a_bf = counts.astype(jnp.float32).astype(jnp.bfloat16)
    n_layers = len(raw_params)
    for li, (w_l, w_r, b) in enumerate(raw_params):
        agg = jnp.dot(a_bf, h, preferred_element_type=jnp.float32) * inv_deg
        agg = agg.astype(jnp.bfloat16)
        out = (jnp.dot(agg, w_l.astype(jnp.bfloat16),
                       preferred_element_type=jnp.float32)
               + jnp.dot(h, w_r.astype(jnp.bfloat16),
                         preferred_element_type=jnp.float32)
               + b)
        out = jnp.maximum(out, 0.0)
        is_last = li == n_layers - 1
        h = out.astype(jnp.float32) if is_last else out.astype(jnp.bfloat16)
    return h if framework else h[:batch_size]


# ---------------------------------------------------------------------------
if __name__ == "__main__":
    # Small synthetic problem; 384 nodes pad to 512 -> row/K grid (2, 1).
    num_nodes = 384
    input_channels = 8
    hidden_channels = 32
    output_channels = 16
    n_layers = 3
    batch_size = 64
    framework = False

    key = jax.random.PRNGKey(0)
    key, kx, ke1, ke2 = jax.random.split(key, 4)

    x = jax.random.normal(kx, (num_nodes, input_channels), jnp.float32)

    num_edges = 2048
    src = jax.random.randint(ke1, (num_edges,), 0, num_nodes)
    dst = jax.random.randint(ke2, (num_edges,), 0, num_nodes)
    edge_index = jnp.stack([src, dst], axis=0)  # [2, E]

    n_pad = _round_up(num_nodes, NODE_PAD)            # 384 -> 512
    f_in_pad = _round_up(input_channels, FEAT_PAD)    # 8   -> 128
    a_counts, inv_deg = build_adjacency(edge_index, n_pad)
    x_pad = _pad2d(x, n_pad, f_in_pad).astype(jnp.bfloat16)

    raw_params = init_params(key, input_channels, hidden_channels,
                             output_channels, n_layers)
    params, layer_dims = pad_params(raw_params)

    out = encoder_forward(x_pad, a_counts, inv_deg, params, layer_dims,
                          num_nodes, batch_size, framework)
    out = jax.block_until_ready(out)
    assert out.shape == (batch_size, output_channels), out.shape
    assert bool(jnp.all(jnp.isfinite(out)))

    ref = reference_forward(x, a_counts[:num_nodes, :num_nodes],
                            inv_deg[:num_nodes], raw_params,
                            batch_size, framework)
    diff = float(jnp.max(jnp.abs(out - ref)))
    tol = 1e-2 + 1e-2 * float(jnp.max(jnp.abs(ref)))
    assert diff <= tol, (diff, tol)

    # Also exercise the framework=True (full-graph output) path.
    out_full = encoder_forward(x_pad, a_counts, inv_deg, params, layer_dims,
                               num_nodes, batch_size, True)
    out_full = jax.block_until_ready(out_full)
    ref_full = reference_forward(x, a_counts[:num_nodes, :num_nodes],
                                 inv_deg[:num_nodes], raw_params,
                                 batch_size, True)
    assert out_full.shape == (num_nodes, output_channels), out_full.shape
    diff_full = float(jnp.max(jnp.abs(out_full - ref_full)))
    tol_full = 1e-2 + 1e-2 * float(jnp.max(jnp.abs(ref_full)))
    assert diff_full <= tol_full, (diff_full, tol_full)

    print("KERNEL_OK")
</pallas_src>

<mosaic_0001>
module attributes {stable_mosaic.version = 11 : i64} {
  func.func @_sage_fused_kernel(%arg0: i32, %arg1: i32, %arg2: memref<256x512xi8, #tpu.memory_space<vmem>>, %arg3: memref<512x128xbf16, #tpu.memory_space<vmem>>, %arg4: memref<256x1xf32, #tpu.memory_space<vmem>>, %arg5: memref<128x128xbf16, #tpu.memory_space<vmem>>, %arg6: memref<128x128xbf16, #tpu.memory_space<vmem>>, %arg7: memref<1x128xf32, #tpu.memory_space<vmem>>, %arg8: memref<256x128xbf16, #tpu.memory_space<vmem>>, %arg9: memref<256x128xf32, #tpu.memory_space<vmem>>) attributes {dimension_semantics = [#tpu.dimension_semantics<parallel>, #tpu.dimension_semantics<arbitrary>], iteration_bounds = array<i64: 2, 1>, scalar_prefetch = 0 : i64, scratch_operands = 1 : i64, tpu.core_type = #tpu.core_type<tc>, window_params = [{transform_indices = @transform_0, window_bounds = array<i64: 256, 512>}, {pipeline_mode = #tpu.pipeline_mode<synchronous>, transform_indices = @transform_1, window_bounds = array<i64: 512, 128>}, {transform_indices = @transform_2, window_bounds = array<i64: 256, 1>}, {pipeline_mode = #tpu.pipeline_mode<synchronous>, transform_indices = @transform_3, window_bounds = array<i64: 128, 128>}, {pipeline_mode = #tpu.pipeline_mode<synchronous>, transform_indices = @transform_4, window_bounds = array<i64: 128, 128>}, {pipeline_mode = #tpu.pipeline_mode<synchronous>, transform_indices = @transform_5, window_bounds = array<i64: 1, 128>}, {transform_indices = @transform_6, window_bounds = array<i64: 256, 128>}]} {
    %c0_i32 = arith.constant 0 : i32
    %0 = arith.cmpi eq, %arg1, %c0_i32 : i32
    %1 = arith.extui %0 : i1 to i32
    %c0_i32_0 = arith.constant 0 : i32
    %2 = arith.cmpi ne, %1, %c0_i32_0 : i32
    scf.if %2 {
      %cst_9 = arith.constant 0.000000e+00 : f32
      %17 = vector.broadcast %cst_9 : f32 to vector<256x128xf32>
      %c0_10 = arith.constant 0 : index
      %c0_11 = arith.constant 0 : index
      %18 = vector.load %arg9[%c0_10, %c0_11] : memref<256x128xf32, #tpu.memory_space<vmem>>, vector<256x128xf32>
      tpu.vector_store %arg9[%c0_10, %c0_11], %17 {strides = array<i32>} : memref<256x128xf32, #tpu.memory_space<vmem>>, vector<256x128xf32>,
    } else {
    }
    %c0 = arith.constant 0 : index
    %c0_1 = arith.constant 0 : index
    %3 = vector.load %arg2[%c0, %c0_1] : memref<256x512xi8, #tpu.memory_space<vmem>>, vector<256x512xi8>
    %4 = arith.sitofp %3 : vector<256x512xi8> to vector<256x512xf32>
    %5 = arith.truncf %4 : vector<256x512xf32> to vector<256x512xbf16>
    %c512_i32 = arith.constant 512 : i32
    %6 = arith.muli %arg1, %c512_i32 : i32
    %7 = tpu.assume_multiple %6, 512 : i32
    %8 = arith.index_cast %7 : i32 to index
    %c0_2 = arith.constant 0 : index
    %9 = vector.load %arg3[%8, %c0_2] : memref<512x128xbf16, #tpu.memory_space<vmem>>, vector<512x128xbf16>
    %c0_3 = arith.constant 0 : index
    %c0_4 = arith.constant 0 : index
    %10 = vector.load %arg9[%c0_3, %c0_4] : memref<256x128xf32, #tpu.memory_space<vmem>>, vector<256x128xf32>
    %cst = arith.constant dense<0.000000e+00> : vector<256x128xf32>
    %11 = tpu.matmul %5, %9, %cst {dimension_numbers = #tpu.dot_dimension_numbers<[1], [0], [0], [1], [0, 0, 1, 1], [], []>} : vector<256x512xbf16>, vector<512x128xbf16>, vector<256x128xf32> -> vector<256x128xf32>
    %12 = arith.addf %10, %11 : vector<256x128xf32>
    %c0_5 = arith.constant 0 : index
    %c0_6 = arith.constant 0 : index
    %13 = vector.load %arg9[%c0_5, %c0_6] : memref<256x128xf32, #tpu.memory_space<vmem>>, vector<256x128xf32>
    tpu.vector_store %arg9[%c0_5, %c0_6], %12 {strides = array<i32>} : memref<256x128xf32, #tpu.memory_space<vmem>>, vector<256x128xf32>,
    %c0_i32_7 = arith.constant 0 : i32
    %14 = arith.cmpi eq, %arg1, %c0_i32_7 : i32
    %15 = arith.extui %14 : i1 to i32
    %c0_i32_8 = arith.constant 0 : i32
    %16 = arith.cmpi ne, %15, %c0_i32_8 : i32
    scf.if %16 {
      %c0_9 = arith.constant 0 : index
      %c0_10 = arith.constant 0 : index
      %17 = vector.load %arg9[%c0_9, %c0_10] : memref<256x128xf32, #tpu.memory_space<vmem>>, vector<256x128xf32>
      %c0_11 = arith.constant 0 : index
      %c0_12 = arith.constant 0 : index
      %18 = vector.load %arg4[%c0_11, %c0_12] : memref<256x1xf32, #tpu.memory_space<vmem>>, vector<256x1xf32>
      %19 = vector.broadcast %18 : vector<256x1xf32> to vector<256x128xf32>
      %20 = arith.mulf %17, %19 : vector<256x128xf32>
      %21 = arith.truncf %20 : vector<256x128xf32> to vector<256x128xbf16>
      %c256_i32 = arith.constant 256 : i32
      %22 = arith.muli %arg0, %c256_i32 : i32
      %23 = tpu.assume_multiple %22, 256 : i32
      %24 = arith.index_cast %23 : i32 to index
      %c0_13 = arith.constant 0 : index
      %25 = vector.load %arg3[%24, %c0_13] : memref<512x128xbf16, #tpu.memory_space<vmem>>, vector<256x128xbf16>
      %c0_14 = arith.constant 0 : index
      %c0_15 = arith.constant 0 : index
      %26 = vector.load %arg5[%c0_14, %c0_15] : memref<128x128xbf16, #tpu.memory_space<vmem>>, vector<128x128xbf16>
      %cst_16 = arith.constant dense<0.000000e+00> : vector<256x128xf32>
      %27 = tpu.matmul %21, %26, %cst_16 {dimension_numbers = #tpu.dot_dimension_numbers<[1], [0], [0], [1], [0, 0, 1, 1], [], []>} : vector<256x128xbf16>, vector<128x128xbf16>, vector<256x128xf32> -> vector<256x128xf32>
      %c0_17 = arith.constant 0 : index
      %c0_18 = arith.constant 0 : index
      %28 = vector.load %arg6[%c0_17, %c0_18] : memref<128x128xbf16, #tpu.memory_space<vmem>>, vector<128x128xbf16>
      %cst_19 = arith.constant dense<0.000000e+00> : vector<256x128xf32>
      %29 = tpu.matmul %25, %28, %cst_19 {dimension_numbers = #tpu.dot_dimension_numbers<[1], [0], [0], [1], [0, 0, 1, 1], [], []>} : vector<256x128xbf16>, vector<128x128xbf16>, vector<256x128xf32> -> vector<256x128xf32>
      %30 = arith.addf %27, %29 : vector<256x128xf32>
      %c0_20 = arith.constant 0 : index
      %c0_21 = arith.constant 0 : index
      %31 = vector.load %arg7[%c0_20, %c0_21] : memref<1x128xf32, #tpu.memory_space<vmem>>, vector<1x128xf32>
      %32 = vector.broadcast %31 : vector<1x128xf32> to vector<256x128xf32>
      %33 = arith.addf %30, %32 : vector<256x128xf32>
      %cst_22 = arith.constant 0.000000e+00 : f32
      %34 = vector.broadcast %cst_22 : f32 to vector<256x128xf32>
      %35 = arith.maximumf %33, %34 : vector<256x128xf32>
      %36 = arith.truncf %35 : vector<256x128xf32> to vector<256x128xbf16>
      %c0_23 = arith.constant 0 : index
      %c0_24 = arith.constant 0 : index
      %37 = vector.load %arg8[%c0_23, %c0_24] : memref<256x128xbf16, #tpu.memory_space<vmem>>, vector<256x128xbf16>
      tpu.vector_store %arg8[%c0_23, %c0_24], %36 {strides = array<i32>} : memref<256x128xbf16, #tpu.memory_space<vmem>>, vector<256x128xbf16>,
    } else {
    }
    return
  }
  func.func @transform_0(%arg0: i32, %arg1: i32) -> (i32, i32) {
    %c0_i32 = arith.constant 0 : i32
    return %arg0, %arg1 : i32, i32
  }
  func.func @transform_1(%arg0: i32, %arg1: i32) -> (i32, i32) {
    %c0_i32 = arith.constant 0 : i32
    %c0_i32_0 = arith.constant 0 : i32
    %c0_i32_1 = arith.constant 0 : i32
    return %c0_i32, %c0_i32_0 : i32, i32
  }
  func.func @transform_2(%arg0: i32, %arg1: i32) -> (i32, i32) {
    %c0_i32 = arith.constant 0 : i32
    %c0_i32_0 = arith.constant 0 : i32
    return %arg0, %c0_i32 : i32, i32
  }
  func.func @transform_3(%arg0: i32, %arg1: i32) -> (i32, i32) {
    %c0_i32 = arith.constant 0 : i32
    %c0_i32_0 = arith.constant 0 : i32
    %c0_i32_1 = arith.constant 0 : i32
    return %c0_i32, %c0_i32_0 : i32, i32
  }
  func.func @transform_4(%arg0: i32, %arg1: i32) -> (i32, i32) {
    %c0_i32 = arith.constant 0 : i32
    %c0_i32_0 = arith.constant 0 : i32
    %c0_i32_1 = arith.constant 0 : i32
    return %c0_i32, %c0_i32_0 : i32, i32
  }
  func.func @transform_5(%arg0: i32, %arg1: i32) -> (i32, i32) {
    %c0_i32 = arith.constant 0 : i32
    %c0_i32_0 = arith.constant 0 : i32
    %c0_i32_1 = arith.constant 0 : i32
    return %c0_i32, %c0_i32_0 : i32, i32
  }
  func.func @transform_6(%arg0: i32, %arg1: i32) -> (i32, i32) {
    %c0_i32 = arith.constant 0 : i32
    %c0_i32_0 = arith.constant 0 : i32
    return %arg0, %c0_i32 : i32, i32
  }
}

module attributes {stable_mosaic.version = 11 : i64} {
  func.func @_sage_fused_kernel(%arg0: i32, %arg1: i32, %arg2: memref<128x512xi8, #tpu.memory_space<vmem>>, %arg3: memref<512x128xbf16, #tpu.memory_space<vmem>>, %arg4: memref<128x1xf32, #tpu.memory_space<vmem>>, %arg5: memref<128x128xbf16, #tpu.memory_space<vmem>>, %arg6: memref<128x128xbf16, #tpu.memory_space<vmem>>, %arg7: memref<1x128xf32, #tpu.memory_space<vmem>>, %arg8: memref<128x128xf32, #tpu.memory_space<vmem>>, %arg9: memref<128x128xf32, #tpu.memory_space<vmem>>) attributes {dimension_semantics = [#tpu.dimension_semantics<parallel>, #tpu.dimension_semantics<arbitrary>], iteration_bounds = array<i64: 1, 1>, scalar_prefetch = 0 : i64, scratch_operands = 1 : i64, tpu.core_type = #tpu.core_type<tc>, window_params = [{transform_indices = @transform_0, window_bounds = array<i64: 128, 512>}, {pipeline_mode = #tpu.pipeline_mode<synchronous>, transform_indices = @transform_1, window_bounds = array<i64: 512, 128>}, {transform_indices = @transform_2, window_bounds = array<i64: 128, 1>}, {pipeline_mode = #tpu.pipeline_mode<synchronous>, transform_indices = @transform_3, window_bounds = array<i64: 128, 128>}, {pipeline_mode = #tpu.pipeline_mode<synchronous>, transform_indices = @transform_4, window_bounds = array<i64: 128, 128>}, {pipeline_mode = #tpu.pipeline_mode<synchronous>, transform_indices = @transform_5, window_bounds = array<i64: 1, 128>}, {transform_indices = @transform_6, window_bounds = array<i64: 128, 128>}]} {
    %c0_i32 = arith.constant 0 : i32
    %0 = arith.cmpi eq, %arg1, %c0_i32 : i32
    %1 = arith.extui %0 : i1 to i32
    %c0_i32_0 = arith.constant 0 : i32
    %2 = arith.cmpi ne, %1, %c0_i32_0 : i32
    scf.if %2 {
      %cst_9 = arith.constant 0.000000e+00 : f32
      %17 = vector.broadcast %cst_9 : f32 to vector<128x128xf32>
      %c0_10 = arith.constant 0 : index
      %c0_11 = arith.constant 0 : index
      %18 = vector.load %arg9[%c0_10, %c0_11] : memref<128x128xf32, #tpu.memory_space<vmem>>, vector<128x128xf32>
      tpu.vector_store %arg9[%c0_10, %c0_11], %17 {strides = array<i32>} : memref<128x128xf32, #tpu.memory_space<vmem>>, vector<128x128xf32>,
    } else {
    }
    %c0 = arith.constant 0 : index
    %c0_1 = arith.constant 0 : index
    %3 = vector.load %arg2[%c0, %c0_1] : memref<128x512xi8, #tpu.memory_space<vmem>>, vector<128x512xi8>
    %4 = arith.sitofp %3 : vector<128x512xi8> to vector<128x512xf32>
    %5 = arith.truncf %4 : vector<128x512xf32> to vector<128x512xbf16>
    %c512_i32 = arith.constant 512 : i32
    %6 = arith.muli %arg1, %c512_i32 : i32
    %7 = tpu.assume_multiple %6, 512 : i32
    %8 = arith.index_cast %7 : i32 to index
    %c0_2 = arith.constant 0 : index
    %9 = vector.load %arg3[%8, %c0_2] : memref<512x128xbf16, #tpu.memory_space<vmem>>, vector<512x128xbf16>
    %c0_3 = arith.constant 0 : index
    %c0_4 = arith.constant 0 : index
    %10 = vector.load %arg9[%c0_3, %c0_4] : memref<128x128xf32, #tpu.memory_space<vmem>>, vector<128x128xf32>
    %cst = arith.constant dense<0.000000e+00> : vector<128x128xf32>
    %11 = tpu.matmul %5, %9, %cst {dimension_numbers = #tpu.dot_dimension_numbers<[1], [0], [0], [1], [0, 0, 1, 1], [], []>} : vector<128x512xbf16>, vector<512x128xbf16>, vector<128x128xf32> -> vector<128x128xf32>
    %12 = arith.addf %10, %11 : vector<128x128xf32>
    %c0_5 = arith.constant 0 : index
    %c0_6 = arith.constant 0 : index
    %13 = vector.load %arg9[%c0_5, %c0_6] : memref<128x128xf32, #tpu.memory_space<vmem>>, vector<128x128xf32>
    tpu.vector_store %arg9[%c0_5, %c0_6], %12 {strides = array<i32>} : memref<128x128xf32, #tpu.memory_space<vmem>>, vector<128x128xf32>,
    %c0_i32_7 = arith.constant 0 : i32
    %14 = arith.cmpi eq, %arg1, %c0_i32_7 : i32
    %15 = arith.extui %14 : i1 to i32
    %c0_i32_8 = arith.constant 0 : i32
    %16 = arith.cmpi ne, %15, %c0_i32_8 : i32
    scf.if %16 {
      %c0_9 = arith.constant 0 : index
      %c0_10 = arith.constant 0 : index
      %17 = vector.load %arg9[%c0_9, %c0_10] : memref<128x128xf32, #tpu.memory_space<vmem>>, vector<128x128xf32>
      %c0_11 = arith.constant 0 : index
      %c0_12 = arith.constant 0 : index
      %18 = vector.load %arg4[%c0_11, %c0_12] : memref<128x1xf32, #tpu.memory_space<vmem>>, vector<128x1xf32>
      %19 = vector.broadcast %18 : vector<128x1xf32> to vector<128x128xf32>
      %20 = arith.mulf %17, %19 : vector<128x128xf32>
      %21 = arith.truncf %20 : vector<128x128xf32> to vector<128x128xbf16>
      %c128_i32 = arith.constant 128 : i32
      %22 = arith.muli %arg0, %c128_i32 : i32
      %23 = tpu.assume_multiple %22, 128 : i32
      %24 = arith.index_cast %23 : i32 to index
      %c0_13 = arith.constant 0 : index
      %25 = vector.load %arg3[%24, %c0_13] : memref<512x128xbf16, #tpu.memory_space<vmem>>, vector<128x128xbf16>
      %c0_14 = arith.constant 0 : index
      %c0_15 = arith.constant 0 : index
      %26 = vector.load %arg5[%c0_14, %c0_15] : memref<128x128xbf16, #tpu.memory_space<vmem>>, vector<128x128xbf16>
      %cst_16 = arith.constant dense<0.000000e+00> : vector<128x128xf32>
      %27 = tpu.matmul %21, %26, %cst_16 {dimension_numbers = #tpu.dot_dimension_numbers<[1], [0], [0], [1], [0, 0, 1, 1], [], []>} : vector<128x128xbf16>, vector<128x128xbf16>, vector<128x128xf32> -> vector<128x128xf32>
      %c0_17 = arith.constant 0 : index
      %c0_18 = arith.constant 0 : index
      %28 = vector.load %arg6[%c0_17, %c0_18] : memref<128x128xbf16, #tpu.memory_space<vmem>>, vector<128x128xbf16>
      %cst_19 = arith.constant dense<0.000000e+00> : vector<128x128xf32>
      %29 = tpu.matmul %25, %28, %cst_19 {dimension_numbers = #tpu.dot_dimension_numbers<[1], [0], [0], [1], [0, 0, 1, 1], [], []>} : vector<128x128xbf16>, vector<128x128xbf16>, vector<128x128xf32> -> vector<128x128xf32>
      %30 = arith.addf %27, %29 : vector<128x128xf32>
      %c0_20 = arith.constant 0 : index
      %c0_21 = arith.constant 0 : index
      %31 = vector.load %arg7[%c0_20, %c0_21] : memref<1x128xf32, #tpu.memory_space<vmem>>, vector<1x128xf32>
      %32 = vector.broadcast %31 : vector<1x128xf32> to vector<128x128xf32>
      %33 = arith.addf %30, %32 : vector<128x128xf32>
      %cst_22 = arith.constant 0.000000e+00 : f32
      %34 = vector.broadcast %cst_22 : f32 to vector<128x128xf32>
      %35 = arith.maximumf %33, %34 : vector<128x128xf32>
      %c0_23 = arith.constant 0 : index
      %c0_24 = arith.constant 0 : index
      %36 = vector.load %arg8[%c0_23, %c0_24] : memref<128x128xf32, #tpu.memory_space<vmem>>, vector<128x128xf32>
      tpu.vector_store %arg8[%c0_23, %c0_24], %35 {strides = array<i32>} : memref<128x128xf32, #tpu.memory_space<vmem>>, vector<128x128xf32>,
    } else {
    }
    return
  }
  func.func @transform_0(%arg0: i32, %arg1: i32) -> (i32, i32) {
    %c0_i32 = arith.constant 0 : i32
    return %arg0, %arg1 : i32, i32
  }
  func.func @transform_1(%arg0: i32, %arg1: i32) -> (i32, i32) {
    %c0_i32 = arith.constant 0 : i32
    %c0_i32_0 = arith.constant 0 : i32
    %c0_i32_1 = arith.constant 0 : i32
    return %c0_i32, %c0_i32_0 : i32, i32
  }
  func.func @transform_2(%arg0: i32, %arg1: i32) -> (i32, i32) {
    %c0_i32 = arith.constant 0 : i32
    %c0_i32_0 = arith.constant 0 : i32
    return %arg0, %c0_i32 : i32, i32
  }
  func.func @transform_3(%arg0: i32, %arg1: i32) -> (i32, i32) {
    %c0_i32 = arith.constant 0 : i32
    %c0_i32_0 = arith.constant 0 : i32
    %c0_i32_1 = arith.constant 0 : i32
    return %c0_i32, %c0_i32_0 : i32, i32
  }
  func.func @transform_4(%arg0: i32, %arg1: i32) -> (i32, i32) {
    %c0_i32 = arith.constant 0 : i32
    %c0_i32_0 = arith.constant 0 : i32
    %c0_i32_1 = arith.constant 0 : i32
    return %c0_i32, %c0_i32_0 : i32, i32
  }
  func.func @transform_5(%arg0: i32, %arg1: i32) -> (i32, i32) {
    %c0_i32 = arith.constant 0 : i32
    %c0_i32_0 = arith.constant 0 : i32
    %c0_i32_1 = arith.constant 0 : i32
    return %c0_i32, %c0_i32_0 : i32, i32
  }
  func.func @transform_6(%arg0: i32, %arg1: i32) -> (i32, i32) {
    %c0_i32 = arith.constant 0 : i32
    %c0_i32_0 = arith.constant 0 : i32
    return %arg0, %c0_i32 : i32, i32
  }
}

module attributes {stable_mosaic.version = 11 : i64} {
  func.func @_sage_fused_kernel(%arg0: i32, %arg1: i32, %arg2: memref<256x512xi8, #tpu.memory_space<vmem>>, %arg3: memref<512x128xbf16, #tpu.memory_space<vmem>>, %arg4: memref<256x1xf32, #tpu.memory_space<vmem>>, %arg5: memref<128x128xbf16, #tpu.memory_space<vmem>>, %arg6: memref<128x128xbf16, #tpu.memory_space<vmem>>, %arg7: memref<1x128xf32, #tpu.memory_space<vmem>>, %arg8: memref<256x128xbf16, #tpu.memory_space<vmem>>, %arg9: memref<256x128xf32, #tpu.memory_space<vmem>>) attributes {dimension_semantics = [#tpu.dimension_semantics<parallel>, #tpu.dimension_semantics<arbitrary>], iteration_bounds = array<i64: 2, 1>, scalar_prefetch = 0 : i64, scratch_operands = 1 : i64, tpu.core_type = #tpu.core_type<tc>, window_params = [{transform_indices = @transform_0, window_bounds = array<i64: 256, 512>}, {pipeline_mode = #tpu.pipeline_mode<synchronous>, transform_indices = @transform_1, window_bounds = array<i64: 512, 128>}, {transform_indices = @transform_2, window_bounds = array<i64: 256, 1>}, {pipeline_mode = #tpu.pipeline_mode<synchronous>, transform_indices = @transform_3, window_bounds = array<i64: 128, 128>}, {pipeline_mode = #tpu.pipeline_mode<synchronous>, transform_indices = @transform_4, window_bounds = array<i64: 128, 128>}, {pipeline_mode = #tpu.pipeline_mode<synchronous>, transform_indices = @transform_5, window_bounds = array<i64: 1, 128>}, {transform_indices = @transform_6, window_bounds = array<i64: 256, 128>}]} {
    %c0_i32 = arith.constant 0 : i32
    %0 = arith.cmpi eq, %arg1, %c0_i32 : i32
    %1 = arith.extui %0 : i1 to i32
    %c0_i32_0 = arith.constant 0 : i32
    %2 = arith.cmpi ne, %1, %c0_i32_0 : i32
    scf.if %2 {
      %cst_9 = arith.constant 0.000000e+00 : f32
      %17 = vector.broadcast %cst_9 : f32 to vector<256x128xf32>
      %c0_10 = arith.constant 0 : index
      %c0_11 = arith.constant 0 : index
      %18 = vector.load %arg9[%c0_10, %c0_11] : memref<256x128xf32, #tpu.memory_space<vmem>>, vector<256x128xf32>
      tpu.vector_store %arg9[%c0_10, %c0_11], %17 {strides = array<i32>} : memref<256x128xf32, #tpu.memory_space<vmem>>, vector<256x128xf32>,
    } else {
    }
    %c0 = arith.constant 0 : index
    %c0_1 = arith.constant 0 : index
    %3 = vector.load %arg2[%c0, %c0_1] : memref<256x512xi8, #tpu.memory_space<vmem>>, vector<256x512xi8>
    %4 = arith.sitofp %3 : vector<256x512xi8> to vector<256x512xf32>
    %5 = arith.truncf %4 : vector<256x512xf32> to vector<256x512xbf16>
    %c512_i32 = arith.constant 512 : i32
    %6 = arith.muli %arg1, %c512_i32 : i32
    %7 = tpu.assume_multiple %6, 512 : i32
    %8 = arith.index_cast %7 : i32 to index
    %c0_2 = arith.constant 0 : index
    %9 = vector.load %arg3[%8, %c0_2] : memref<512x128xbf16, #tpu.memory_space<vmem>>, vector<512x128xbf16>
    %c0_3 = arith.constant 0 : index
    %c0_4 = arith.constant 0 : index
    %10 = vector.load %arg9[%c0_3, %c0_4] : memref<256x128xf32, #tpu.memory_space<vmem>>, vector<256x128xf32>
    %cst = arith.constant dense<0.000000e+00> : vector<256x128xf32>
    %11 = tpu.matmul %5, %9, %cst {dimension_numbers = #tpu.dot_dimension_numbers<[1], [0], [0], [1], [0, 0, 1, 1], [], []>} : vector<256x512xbf16>, vector<512x128xbf16>, vector<256x128xf32> -> vector<256x128xf32>
    %12 = arith.addf %10, %11 : vector<256x128xf32>
    %c0_5 = arith.constant 0 : index
    %c0_6 = arith.constant 0 : index
    %13 = vector.load %arg9[%c0_5, %c0_6] : memref<256x128xf32, #tpu.memory_space<vmem>>, vector<256x128xf32>
    tpu.vector_store %arg9[%c0_5, %c0_6], %12 {strides = array<i32>} : memref<256x128xf32, #tpu.memory_space<vmem>>, vector<256x128xf32>,
    %c0_i32_7 = arith.constant 0 : i32
    %14 = arith.cmpi eq, %arg1, %c0_i32_7 : i32
    %15 = arith.extui %14 : i1 to i32
    %c0_i32_8 = arith.constant 0 : i32
    %16 = arith.cmpi ne, %15, %c0_i32_8 : i32
    scf.if %16 {
      %c0_9 = arith.constant 0 : index
      %c0_10 = arith.constant 0 : index
      %17 = vector.load %arg9[%c0_9, %c0_10] : memref<256x128xf32, #tpu.memory_space<vmem>>, vector<256x128xf32>
      %c0_11 = arith.constant 0 : index
      %c0_12 = arith.constant 0 : index
      %18 = vector.load %arg4[%c0_11, %c0_12] : memref<256x1xf32, #tpu.memory_space<vmem>>, vector<256x1xf32>
      %19 = vector.broadcast %18 : vector<256x1xf32> to vector<256x128xf32>
      %20 = arith.mulf %17, %19 : vector<256x128xf32>
      %21 = arith.truncf %20 : vector<256x128xf32> to vector<256x128xbf16>
      %c256_i32 = arith.constant 256 : i32
      %22 = arith.muli %arg0, %c256_i32 : i32
      %23 = tpu.assume_multiple %22, 256 : i32
      %24 = arith.index_cast %23 : i32 to index
      %c0_13 = arith.constant 0 : index
      %25 = vector.load %arg3[%24, %c0_13] : memref<512x128xbf16, #tpu.memory_space<vmem>>, vector<256x128xbf16>
      %c0_14 = arith.constant 0 : index
      %c0_15 = arith.constant 0 : index
      %26 = vector.load %arg5[%c0_14, %c0_15] : memref<128x128xbf16, #tpu.memory_space<vmem>>, vector<128x128xbf16>
      %cst_16 = arith.constant dense<0.000000e+00> : vector<256x128xf32>
      %27 = tpu.matmul %21, %26, %cst_16 {dimension_numbers = #tpu.dot_dimension_numbers<[1], [0], [0], [1], [0, 0, 1, 1], [], []>} : vector<256x128xbf16>, vector<128x128xbf16>, vector<256x128xf32> -> vector<256x128xf32>
      %c0_17 = arith.constant 0 : index
      %c0_18 = arith.constant 0 : index
      %28 = vector.load %arg6[%c0_17, %c0_18] : memref<128x128xbf16, #tpu.memory_space<vmem>>, vector<128x128xbf16>
      %cst_19 = arith.constant dense<0.000000e+00> : vector<256x128xf32>
      %29 = tpu.matmul %25, %28, %cst_19 {dimension_numbers = #tpu.dot_dimension_numbers<[1], [0], [0], [1], [0, 0, 1, 1], [], []>} : vector<256x128xbf16>, vector<128x128xbf16>, vector<256x128xf32> -> vector<256x128xf32>
      %30 = arith.addf %27, %29 : vector<256x128xf32>
      %c0_20 = arith.constant 0 : index
      %c0_21 = arith.constant 0 : index
      %31 = vector.load %arg7[%c0_20, %c0_21] : memref<1x128xf32, #tpu.memory_space<vmem>>, vector<1x128xf32>
      %32 = vector.broadcast %31 : vector<1x128xf32> to vector<256x128xf32>
      %33 = arith.addf %30, %32 : vector<256x128xf32>
      %cst_22 = arith.constant 0.000000e+00 : f32
      %34 = vector.broadcast %cst_22 : f32 to vector<256x128xf32>
      %35 = arith.maximumf %33, %34 : vector<256x128xf32>
      %36 = arith.truncf %35 : vector<256x128xf32> to vector<256x128xbf16>
      %c0_23 = arith.constant 0 : index
      %c0_24 = arith.constant 0 : index
      %37 = vector.load %arg8[%c0_23, %c0_24] : memref<256x128xbf16, #tpu.memory_space<vmem>>, vector<256x128xbf16>
      tpu.vector_store %arg8[%c0_23, %c0_24], %36 {strides = array<i32>} : memref<256x128xbf16, #tpu.memory_space<vmem>>, vector<256x128xbf16>,
    } else {
    }
    return
  }
  func.func @transform_0(%arg0: i32, %arg1: i32) -> (i32, i32) {
    %c0_i32 = arith.constant 0 : i32
    return %arg0, %arg1 : i32, i32
  }
  func.func @transform_1(%arg0: i32, %arg1: i32) -> (i32, i32) {
    %c0_i32 = arith.constant 0 : i32
    %c0_i32_0 = arith.constant 0 : i32
    %c0_i32_1 = arith.constant 0 : i32
    return %c0_i32, %c0_i32_0 : i32, i32
  }
  func.func @transform_2(%arg0: i32, %arg1: i32) -> (i32, i32) {
    %c0_i32 = arith.constant 0 : i32
    %c0_i32_0 = arith.constant 0 : i32
    return %arg0, %c0_i32 : i32, i32
  }
  func.func @transform_3(%arg0: i32, %arg1: i32) -> (i32, i32) {
    %c0_i32 = arith.constant 0 : i32
    %c0_i32_0 = arith.constant 0 : i32
    %c0_i32_1 = arith.constant 0 : i32
    return %c0_i32, %c0_i32_0 : i32, i32
  }
  func.func @transform_4(%arg0: i32, %arg1: i32) -> (i32, i32) {
    %c0_i32 = arith.constant 0 : i32
    %c0_i32_0 = arith.constant 0 : i32
    %c0_i32_1 = arith.constant 0 : i32
    return %c0_i32, %c0_i32_0 : i32, i32
  }
  func.func @transform_5(%arg0: i32, %arg1: i32) -> (i32, i32) {
    %c0_i32 = arith.constant 0 : i32
    %c0_i32_0 = arith.constant 0 : i32
    %c0_i32_1 = arith.constant 0 : i32
    return %c0_i32, %c0_i32_0 : i32, i32
  }
  func.func @transform_6(%arg0: i32, %arg1: i32) -> (i32, i32) {
    %c0_i32 = arith.constant 0 : i32
    %c0_i32_0 = arith.constant 0 : i32
    return %arg0, %c0_i32 : i32, i32
  }
}

</mosaic_0001>

<bundles_post_ra>
// kernel: encoder_forward.5
= control target key start
LH: loop header
LB: loop body
LE: loop exit
PB: predicated region body
PF: predicated region fallthrough
CT: control target
= control target key end

     0   :  { %v1519_v32 = vmov 0   ;;  %s1924_s1 = inlined_call_operand.vmem [shape: bf16[512,128], index: 1, kind: input, shape index: {}]   ;;  %s1925_s0 = inlined_call_operand.vmem [shape: s8[512,512], index: 0, kind: input, shape index: {}]   ;;  %s1926_s2 = inlined_call_operand.vmem [shape: f32[512,1], index: 2, kind: input, shape index: {}]   ;;  %s1927_s4 = inlined_call_operand.vmem [shape: bf16[128,128], index: 4, kind: input, shape index: {}]   ;;  %s1928_s3 = inlined_call_operand.vmem [shape: bf16[128,128], index: 3, kind: input, shape index: {}]   ;;  %s1929_s5 = inlined_call_operand.vmem [shape: f32[1,128], index: 5, kind: input, shape index: {}]   ;;  %s1930_s6 = inlined_call_operand.vmem [shape: f32[128,128], index: 6, kind: output, shape index: {}]  }
   0x1   :  { %v1449_v0 = vld [vmem:[%s1924_s1 + $0x38] sm:$0xff]  ;;  %v1448_v2 = vld [vmem:[%s1924_s1 + $0x30] sm:$0xff]  ;;  %v1447_v4 = vld [vmem:[%s1924_s1 + $0x28] sm:$0xff]  ;;  %1515 = vset.pattern.permute.xlu0 %v1519_v32  ;;  %1516 = vset.pattern.permute.xlu1 %v1519_v32 }
   0x2   :  { %v1457_v1 = vld [vmem:[%s1924_s1 + $0x78] sm:$0xff]  ;;  %1498 = vmatpush.bf16.msra.mxu2 %v1449_v0  ;;  %v1456_v3 = vld [vmem:[%s1924_s1 + $0x70] sm:$0xff]  ;;  %496 = vmatpush.bf16.msra.mxu0 %v1449_v0  ;;  %v1455_v5 = vld [vmem:[%s1924_s1 + $0x68] sm:$0xff] }
   0x3   :  { %1506 = vmatpush.bf16.msra.mxu3 %v1457_v1  ;;  %545 = vmatpush.bf16.msra.mxu1 %v1457_v1  ;;  %v1446_v6 = vld [vmem:[%s1924_s1 + $0x20] sm:$0xff]  ;;  %v1445_v8 = vld [vmem:[%s1924_s1 + $0x18] sm:$0xff]  ;;  %v1444_v10 = vld [vmem:[%s1924_s1 + $0x10] sm:$0xff] }
   0x4   :  { %v1454_v7 = vld [vmem:[%s1924_s1 + $0x60] sm:$0xff]  ;;  %v1453_v9 = vld [vmem:[%s1924_s1 + $0x58] sm:$0xff]  ;;  %v1452_v11 = vld [vmem:[%s1924_s1 + $0x50] sm:$0xff]  ;;  %1517 = vset.pattern.permute.xlu2 %v1519_v32 }
   0x5   :  { %v51_v12 = vld [vmem:[%s1925_s0 + $0x40] sm:$0xff]  ;;  %v52_v13 = vld [vmem:[%s1925_s0 + $0x48] sm:$0xff]  ;;  %v1465_v26 = vld [vmem:[%s1924_s1 + $0xb8] sm:$0xff] }
   0x6   :  { %1499 = vmatpush.bf16.msra.mxu2 %v1448_v2  ;;  %497 = vmatpush.bf16.msra.mxu0 %v1448_v2  ;;  %v91_v14 = vunpack.c.0.s8 %v51_v12  ;;  %v95_v15 = vunpack.c.1.s8 %v51_v12  ;;  %v92_v16 = vunpack.c.0.s8 %v52_v13  ;;  %v96_v17 = vunpack.c.1.s8 %v52_v13  ;;  %v1443_v18 = vld [vmem:[%s1924_s1 + $0x8] sm:$0xff]  ;;  %v1442_v24 = vld [vmem:[%s1924_s1] sm:$0xff]  ;;  %v1473_v27 = vld [vmem:[%s1924_s1 + $0xf8] sm:$0xff] }
   0x7   :  { %1507 = vmatpush.bf16.msra.mxu3 %v1456_v3  ;;  %546 = vmatpush.bf16.msra.mxu1 %v1456_v3  ;;  %v1451_v19 = vld [vmem:[%s1924_s1 + $0x48] sm:$0xff]  ;;  %v1450_v25 = vld [vmem:[%s1924_s1 + $0x40] sm:$0xff]  ;;  %v1464_v30 = vld [vmem:[%s1924_s1 + $0xb0] sm:$0xff]  ;;  %v99_v36 = vunpack.c.2.s8 %v51_v12  ;;  %v103_v37 = vunpack.c.3.s8 %v51_v12  ;;  %v100_v38 = vunpack.c.2.s8 %v52_v13  ;;  %v104_v39 = vunpack.c.3.s8 %v52_v13 }
   0x8   :  { %v155_v20 = vcvt.s32.f32 %v91_v14  ;;  %v159_v21 = vcvt.s32.f32 %v95_v15  ;;  %v156_v22 = vcvt.s32.f32 %v92_v16  ;;  %v160_v23 = vcvt.s32.f32 %v96_v17  ;;  %v1472_v31 = vld [vmem:[%s1924_s1 + $0xf0] sm:$0xff]  ;;  %v743_v33 = vld [vmem:[%s1926_s2] sm:$0xff]  ;;  %v1463_v34 = vld [vmem:[%s1924_s1 + $0xa8] sm:$0xff] }
   0x9   :  { %v1471_v35 = vld [vmem:[%s1924_s1 + $0xe8] sm:$0xff]  ;;  %761 = vperm.xlu0 %1515, %v743_v33   ;;  %v1462_v40 = vld [vmem:[%s1924_s1 + $0xa0] sm:$0xff]  ;;  %v163_v42 = vcvt.s32.f32 %v99_v36  ;;  %v167_v43 = vcvt.s32.f32 %v103_v37  ;;  %v164_v44 = vcvt.s32.f32 %v100_v38  ;;  %v168_v45 = vcvt.s32.f32 %v104_v39  ;;  %v1461_v46 = vld [vmem:[%s1924_s1 + $0x98] sm:$0xff] }
   0xa   :  { %1500 = vmatpush.bf16.msra.mxu2 %v1447_v4  ;;  %498 = vmatpush.bf16.msra.mxu0 %v1447_v4  ;;  %v203_v28 = vpack.c.bf16 %v159_v21, %v155_v20  ;;  %v204_v29 = vpack.c.bf16 %v160_v23, %v156_v22  ;;  %v1470_v41 = vld [vmem:[%s1924_s1 + $0xe0] sm:$0xff]  ;;  %v1469_v47 = vld [vmem:[%s1924_s1 + $0xd8] sm:$0xff]  ;;  %v1460_v50 = vld [vmem:[%s1924_s1 + $0x90] sm:$0xff] }
   0xb   :  { %1508 = vmatpush.bf16.msra.mxu3 %v1455_v5  ;;  %547 = vmatpush.bf16.msra.mxu1 %v1455_v5  ;;  %v207_v48 = vpack.c.bf16 %v167_v43, %v163_v42  ;;  %v208_v49 = vpack.c.bf16 %v168_v45, %v164_v44  ;;  %v1468_v51 = vld [vmem:[%s1924_s1 + $0xd0] sm:$0xff]  ;;  %v1651_v52 = vld [vmem:[%s1925_s0 + $0x60] sm:$0xff]  ;;  %v744_v53 = vld [vmem:[%s1926_s2 + $0x8] sm:$0xff] }
   0xc   :  { %v1659_v54 = vld [vmem:[%s1925_s0 + $0x68] sm:$0xff]  ;;  %v43_v55 = vld [vmem:[%s1925_s0] sm:$0xff]  ;;  %v107_v61 = vunpack.c.0.s8 %v1651_v52  ;;  %v111_v62 = vunpack.c.1.s8 %v1651_v52  ;;  %v45_v42 = vld [vmem:[%s1925_s0 + $0x10] sm:$0xff] }
   0xd   :  { %v1459_v56 = vld [vmem:[%s1924_s1 + $0x88] sm:$0xff]  ;;  %v59_v58 = vunpack.c.0.s8 %v43_v55  ;;  %v63_v59 = vunpack.c.1.s8 %v43_v55  ;;  %v108_v1 = vunpack.c.0.s8 %v1659_v54  ;;  %v112_v2 = vunpack.c.1.s8 %v1659_v54  ;;  %v750_v43 = vld [vmem:[%s1926_s2 + $0x38] sm:$0xff]  ;;  %v47_v45 = vld [vmem:[%s1925_s0 + $0x20] sm:$0xff] }
   0xe   :  { %1501 = vmatpush.bf16.msra.mxu2 %v1446_v6  ;;  %499 = vmatpush.bf16.msra.mxu0 %v1446_v6  ;;  %v1467_v57 = vld [vmem:[%s1924_s1 + $0xc8] sm:$0xff]  ;;  %v171_v12 = vcvt.s32.f32 %v107_v61  ;;  %v175_v13 = vcvt.s32.f32 %v111_v62  ;;  %v67_v20 = vunpack.c.2.s8 %v43_v55  ;;  %v71_v21 = vunpack.c.3.s8 %v43_v55  ;;  %v758_v44 = vld [vmem:[%s1926_s2 + $0x78] sm:$0xff]  ;;  %v753_v62 = vld [vmem:[%s1926_s2 + $0x50] sm:$0xff] }
   0xf   :  { %1509 = vmatpush.bf16.msra.mxu3 %v1454_v7  ;;  %548 = vmatpush.bf16.msra.mxu1 %v1454_v7  ;;  %v44_v60 = vld [vmem:[%s1925_s0 + $0x8] sm:$0xff]  ;;  %v123_v3 = vcvt.s32.f32 %v59_v58  ;;  %v127_v4 = vcvt.s32.f32 %v63_v59  ;;  %v1458_v7 = vld [vmem:[%s1924_s1 + $0x80] sm:$0xff]  ;;  %v172_v14 = vcvt.s32.f32 %v108_v1  ;;  %v176_v15 = vcvt.s32.f32 %v112_v2 }
  0x10   :  { %v60_v63 = vunpack.c.0.s8 %v44_v60  ;;  %v64_v0 = vunpack.c.1.s8 %v44_v60  ;;  %v211_v16 = vpack.c.bf16 %v175_v13, %v171_v12  ;;  %v68_v22 = vunpack.c.2.s8 %v44_v60 }
  0x11   :  { %766 = vperm.xlu0 %1515, %v744_v53   ;;  %v212_v17 = vpack.c.bf16 %v176_v15, %v172_v14  ;;  %v72_v23 = vunpack.c.3.s8 %v44_v60  ;;  %v65_v53 = vunpack.c.1.s8 %v45_v42  ;;  %v69_v15 = vunpack.c.2.s8 %v45_v42 }
  0x12   :  { %1502 = vmatpush.bf16.msra.mxu2 %v1445_v8  ;;  %500 = vmatpush.bf16.msra.mxu0 %v1445_v8  ;;  %v124_v5 = vcvt.s32.f32 %v60_v63  ;;  %v128_v6 = vcvt.s32.f32 %v64_v0  ;;  %v1466_v8 = vld [vmem:[%s1924_s1 + $0xc0] sm:$0xff] }
  0x13   :  { %1510 = vmatpush.bf16.msra.mxu3 %v1453_v9  ;;  %549 = vmatpush.bf16.msra.mxu1 %v1453_v9  ;;  %v187_v9 = vpack.c.bf16 %v127_v4, %v123_v3  ;;  %v129_v0 = vcvt.s32.f32 %v65_v53  ;;  %v53_v53 = vld [vmem:[%s1925_s0 + $0x50] sm:$0xff] }
  0x16   :  { %1503 = vmatpush.bf16.msra.mxu2 %v1444_v10  ;;  %501 = vmatpush.bf16.msra.mxu0 %v1444_v10  ;;  %v749_v10 = vld [vmem:[%s1926_s2 + $0x30] sm:$0xff] }
  0x17   :  { %1511 = vmatpush.bf16.msra.mxu3 %v1452_v11  ;;  %550 = vmatpush.bf16.msra.mxu1 %v1452_v11  ;;  %v188_v11 = vpack.c.bf16 %v128_v6, %v124_v5  ;;  %v756_v5 = vld [vmem:[%s1926_s2 + $0x68] sm:$0xff]  ;;  %v83_v6 = vunpack.c.2.s8 %v47_v45 }
  0x19   :  { %791 = vperm.xlu0 %1515, %v749_v10   ;;  %v747_v10 = vld [vmem:[%s1926_s2 + $0x20] sm:$0xff] }
  0x1a   :  { %1504 = vmatpush.bf16.msra.mxu2 %v1443_v18  ;;  %502 = vmatpush.bf16.msra.mxu0 %v1443_v18  ;;  %v745_v18 = vld [vmem:[%s1926_s2 + $0x10] sm:$0xff] }
  0x1b   :  { %1512 = vmatpush.bf16.msra.mxu3 %v1451_v19  ;;  %551 = vmatpush.bf16.msra.mxu1 %v1451_v19  ;;  %v752_v19 = vld [vmem:[%s1926_s2 + $0x48] sm:$0xff] }
  0x1c   :  { %771 = vperm.xlu1 %1516, %v745_v18   ;;  %781 = vperm.xlu2 %1517, %v747_v10  }
  0x1e   :  { %1505 = vmatpush.bf16.msra.mxu2 %v1442_v24  ;;  %503 = vmatpush.bf16.msra.mxu0 %v1442_v24  ;;  %v131_v24 = vcvt.s32.f32 %v67_v20 }
  0x1f   :  { %1513 = vmatpush.bf16.msra.mxu3 %v1450_v25  ;;  %552 = vmatpush.bf16.msra.mxu1 %v1450_v25  ;;  %v135_v25 = vcvt.s32.f32 %v71_v21  ;;  %v133_v21 = vcvt.s32.f32 %v69_v15 }
  0x21   :  { %524 = vmatmul.bf16.vlgmr.msra.gmra.mxu2 %v203_v28  ;;  %504 = vmatmul.bf16.vlgmr.msra.gmra.mxu0 %v187_v9  ;;  %v115_v28 = vunpack.c.2.s8 %v1651_v52  ;;  %v191_v32 = vpack.c.bf16 %v135_v25, %v131_v24 }
  0x22   :  { %594 = vmatpush.bf16.msrb.mxu2 %v1465_v26  ;;  %573 = vmatmul.bf16.vlgmr.msra.gmra.mxu3 %v204_v29  ;;  %v132_v26 = vcvt.s32.f32 %v68_v22  ;;  %v119_v29 = vunpack.c.3.s8 %v1651_v52  ;;  %v61_v52 = vunpack.c.0.s8 %v45_v42 }
  0x23   :  { %643 = vmatpush.bf16.msrb.mxu3 %v1473_v27  ;;  %553 = vmatmul.bf16.vlgmr.msra.gmra.mxu1 %v188_v11  ;;  %v136_v27 = vcvt.s32.f32 %v72_v23  ;;  %v179_v36 = vcvt.s32.f32 %v115_v28  ;;  %v147_v11 = vcvt.s32.f32 %v83_v6  ;;  %v49_v28 = vld [vmem:[%s1925_s0 + $0x30] sm:$0xff] }
  0x24   :  { %806 = vperm.xlu0 %1515, %v752_v19   ;;  %v183_v37 = vcvt.s32.f32 %v119_v29  ;;  %v125_v63 = vcvt.s32.f32 %v61_v52  ;;  %v50_v29 = vld [vmem:[%s1925_s0 + $0x38] sm:$0xff]  ;;  %v757_v52 = vld [vmem:[%s1926_s2 + $0x70] sm:$0xff] }
  0x25   :  { %v192_v33 = vpack.c.bf16 %v136_v27, %v132_v26  ;;  %v748_v27 = vld [vmem:[%s1926_s2 + $0x28] sm:$0xff] }
  0x26   :  { %595 = vmatpush.bf16.msrb.mxu2 %v1464_v30  ;;  %v116_v30 = vunpack.c.2.s8 %v1659_v54  ;;  %v189_v3 = vpack.c.bf16 %v129_v0, %v125_v63  ;;  %786 = vperm.xlu2 %1517, %v748_v27  }
  0x27   :  { %644 = vmatpush.bf16.msrb.mxu3 %v1472_v31  ;;  %v120_v31 = vunpack.c.3.s8 %v1659_v54 }
  0x28   :  { %v180_v38 = vcvt.s32.f32 %v116_v30  ;;  %v77_v30 = vunpack.c.0.s8 %v49_v28 }
  0x29   :  { %v184_v39 = vcvt.s32.f32 %v120_v31  ;;  %v81_v31 = vunpack.c.1.s8 %v49_v28 }
  0x2a   :  { %596 = vmatpush.bf16.msrb.mxu2 %v1463_v34  ;;  %v746_v34 = vld [vmem:[%s1926_s2 + $0x18] sm:$0xff] }
  0x2b   :  { %645 = vmatpush.bf16.msrb.mxu3 %v1471_v35  ;;  %v755_v35 = vld [vmem:[%s1926_s2 + $0x60] sm:$0xff]  ;;  %776 = vperm.xlu1 %1516, %v746_v34  }
  0x2c   :  { %821 = vperm.xlu0 %1515, %v755_v35   ;;  %v751_v34 = vld [vmem:[%s1926_s2 + $0x40] sm:$0xff]  ;;  %v141_v35 = vcvt.s32.f32 %v77_v30 }
  0x2e   :  { %597 = vmatpush.bf16.msrb.mxu2 %v1462_v40  ;;  %v215_v40 = vpack.c.bf16 %v183_v37, %v179_v36  ;;  %v145_v36 = vcvt.s32.f32 %v81_v31  ;;  %801 = vperm.xlu2 %1517, %v751_v34   ;;  %v1493_v34 = vld [vmem:[%s1927_s4 + $0x18] sm:$0xff] }
  0x2f   :  { %646 = vmatpush.bf16.msrb.mxu3 %v1470_v41  ;;  %v216_v41 = vpack.c.bf16 %v184_v39, %v180_v38 }
  0x30   :  { %v197_v39 = vpack.c.bf16 %v145_v36, %v141_v35  ;;  %v1485_v35 = vld [vmem:[%s1928_s3 + $0x18] sm:$0xff] }
  0x31   :  { %529 = vmatmul.bf16.gmra.mxu2 %v207_v48  ;;  %509 = vmatmul.bf16.gmra.mxu0 %v191_v32  ;;  %v79_v48 = vunpack.c.1.s8 %v47_v45  ;;  %v78_v32 = vunpack.c.0.s8 %v50_v29 }
  0x32   :  { %598 = vmatpush.bf16.msrb.mxu2 %v1461_v46  ;;  %578 = vmatmul.bf16.gmra.mxu3 %v208_v49  ;;  %v46_v46 = vld [vmem:[%s1925_s0 + $0x18] sm:$0xff]  ;;  %v48_v49 = vld [vmem:[%s1925_s0 + $0x28] sm:$0xff] }
  0x33   :  { %647 = vmatpush.bf16.msrb.mxu3 %v1469_v47  ;;  %558 = vmatmul.bf16.gmra.mxu1 %v192_v33  ;;  %v75_v47 = vunpack.c.0.s8 %v47_v45  ;;  %v143_v55 = vcvt.s32.f32 %v79_v48  ;;  %v88_v9 = vunpack.c.3.s8 %v48_v49  ;;  %v74_v18 = vunpack.c.3.s8 %v46_v46 }
  0x34   :  { %796 = vperm.xlu1 %1516, %v750_v43   ;;  %836 = vperm.xlu0 %1515, %v758_v44   ;;  %v82_v33 = vunpack.c.1.s8 %v50_v29  ;;  %v142_v37 = vcvt.s32.f32 %v78_v32  ;;  %v86_v43 = vunpack.c.2.s8 %v50_v29  ;;  %v90_v44 = vunpack.c.3.s8 %v50_v29 }
  0x35   :  { %v139_v54 = vcvt.s32.f32 %v75_v47  ;;  %v152_v14 = vcvt.s32.f32 %v88_v9  ;;  %v138_v24 = vcvt.s32.f32 %v74_v18  ;;  %v105_v9 = vunpack.c.3.s8 %v53_v53 }
  0x36   :  { %599 = vmatpush.bf16.msrb.mxu2 %v1460_v50  ;;  %v76_v50 = vunpack.c.0.s8 %v48_v49  ;;  %v146_v38 = vcvt.s32.f32 %v82_v33  ;;  %v150_v48 = vcvt.s32.f32 %v86_v43 }
  0x37   :  { %648 = vmatpush.bf16.msrb.mxu3 %v1468_v51  ;;  %v80_v51 = vunpack.c.1.s8 %v48_v49  ;;  %v195_v60 = vpack.c.bf16 %v143_v55, %v139_v54  ;;  %v54_v54 = vld [vmem:[%s1925_s0 + $0x58] sm:$0xff]  ;;  %v93_v55 = vunpack.c.0.s8 %v53_v53  ;;  %v169_v15 = vcvt.s32.f32 %v105_v9 }
  0x38   :  { %v140_v58 = vcvt.s32.f32 %v76_v50  ;;  %v102_v10 = vunpack.c.2.s8 %v54_v54 }
  0x39   :  { %v144_v59 = vcvt.s32.f32 %v80_v51 }
  0x3a   :  { %600 = vmatpush.bf16.msrb.mxu2 %v1459_v56  ;;  %v62_v56 = vunpack.c.0.s8 %v46_v46 }
  0x3b   :  { %649 = vmatpush.bf16.msrb.mxu3 %v1467_v57  ;;  %v66_v57 = vunpack.c.1.s8 %v46_v46  ;;  %v196_v61 = vpack.c.bf16 %v144_v59, %v140_v58  ;;  %v98_v58 = vunpack.c.1.s8 %v54_v54  ;;  %v1497_v59 = vld [vmem:[%s1927_s4 + $0x38] sm:$0xff] }
  0x3c   :  { %v126_v1 = vcvt.s32.f32 %v62_v56  ;;  %811 = vperm.xlu1 %1516, %v753_v62   ;;  %v97_v56 = vunpack.c.1.s8 %v53_v53  ;;  %1012 = vmatpush.bf16.msrb.mxu0 %v1497_v59 }
  0x3d   :  { %v130_v2 = vcvt.s32.f32 %v66_v57  ;;  %v94_v57 = vunpack.c.0.s8 %v54_v54  ;;  %v162_v0 = vcvt.s32.f32 %v98_v58 }
  0x3e   :  { %601 = vmatpush.bf16.msrb.mxu2 %v1458_v7  ;;  %v87_v7 = vunpack.c.3.s8 %v47_v45  ;;  %v754_v45 = vld [vmem:[%s1926_s2 + $0x58] sm:$0xff]  ;;  %v161_v62 = vcvt.s32.f32 %v97_v56 }
  0x3f   :  { %650 = vmatpush.bf16.msrb.mxu3 %v1466_v8  ;;  %v190_v4 = vpack.c.bf16 %v130_v2, %v126_v1  ;;  %v84_v8 = vunpack.c.2.s8 %v48_v49  ;;  %816 = vperm.xlu2 %1517, %v754_v45   ;;  %v154_v49 = vcvt.s32.f32 %v90_v44  ;;  %v158_v63 = vcvt.s32.f32 %v94_v57  ;;  %v1492_v45 = vld [vmem:[%s1927_s4 + $0x10] sm:$0xff] }
  0x40   :  { %v151_v12 = vcvt.s32.f32 %v87_v7  ;;  %v101_v7 = vunpack.c.2.s8 %v53_v53 }
  0x41   :  { %534 = vmatmul.bf16.gmra.mxu2 %v211_v16  ;;  %514 = vmatmul.bf16.gmra.mxu0 %v195_v60  ;;  %v148_v13 = vcvt.s32.f32 %v84_v8  ;;  %v73_v16 = vunpack.c.3.s8 %v45_v42  ;;  %v89_v42 = vunpack.c.3.s8 %v49_v28  ;;  %v202_v51 = vpack.c.bf16 %v154_v49, %v150_v48  ;;  %v1489_v60 = vld [vmem:[%s1928_s3 + $0x38] sm:$0xff] }
  0x42   :  { %583 = vmatmul.bf16.gmra.mxu3 %v212_v17  ;;  %v70_v17 = vunpack.c.2.s8 %v46_v46  ;;  %v199_v19 = vpack.c.bf16 %v151_v12, %v147_v11  ;;  %1109 = vmatpush.bf16.msrb.mxu1 %v1489_v60  ;;  %v206_v2 = vpack.c.bf16 %v162_v0, %v158_v63  ;;  %v106_v11 = vunpack.c.3.s8 %v54_v54  ;;  %v1495_v12 = vld [vmem:[%s1927_s4 + $0x28] sm:$0xff] }
  0x43   :  { %563 = vmatmul.bf16.gmra.mxu1 %v196_v61  ;;  %v200_v20 = vpack.c.bf16 %v152_v14, %v148_v13  ;;  %v137_v22 = vcvt.s32.f32 %v73_v16  ;;  %v153_v47 = vcvt.s32.f32 %v89_v42  ;;  %v157_v61 = vcvt.s32.f32 %v93_v55  ;;  %v1487_v13 = vld [vmem:[%s1928_s3 + $0x28] sm:$0xff]  ;;  %v1490_v55 = vld [vmem:[%s1927_s4] sm:$0xff] }
  0x44   :  { %826 = vperm.xlu1 %1516, %v756_v5   ;;  %v134_v23 = vcvt.s32.f32 %v70_v17  ;;  %v165_v14 = vcvt.s32.f32 %v101_v7  ;;  %v166_v16 = vcvt.s32.f32 %v102_v10  ;;  %v170_v17 = vcvt.s32.f32 %v106_v11  ;;  %v1483_v60 = vld [vmem:[%s1928_s3 + $0x8] sm:$0xff] }
  0x45   :  { %v193_v25 = vpack.c.bf16 %v137_v22, %v133_v21  ;;  %v205_v1 = vpack.c.bf16 %v161_v62, %v157_v61  ;;  %v1474_v61 = vld [vmem:[%s1924_s1] sm:$0xff] }
  0x46   :  { %v194_v26 = vpack.c.bf16 %v138_v24, %v134_v23  ;;  %v209_v21 = vpack.c.bf16 %v169_v15, %v165_v14  ;;  %v210_v22 = vpack.c.bf16 %v170_v17, %v166_v16  ;;  %v1494_v23 = vld [vmem:[%s1927_s4 + $0x20] sm:$0xff] }
  0x47   :  { %831 = vperm.xlu2 %1517, %v757_v52   ;;  %v1486_v24 = vld [vmem:[%s1928_s3 + $0x20] sm:$0xff] }
  0x51   :  { %539 = vmatmul.bf16.gmra.mxu2 %v215_v40  ;;  %519 = vmatmul.bf16.gmra.mxu0 %v199_v19  ;;  %v198_v40 = vpack.c.bf16 %v146_v38, %v142_v37 }
  0x52   :  { %588 = vmatmul.bf16.gmra.mxu3 %v216_v41  ;;  %v85_v41 = vunpack.c.2.s8 %v49_v28 }
  0x53   :  { %568 = vmatmul.bf16.gmra.mxu1 %v200_v20 }
  0x54   :  { %v149_v46 = vcvt.s32.f32 %v85_v41 }
  0x56   :  { %v201_v50 = vpack.c.bf16 %v153_v47, %v149_v46  ;;  %v1484_v46 = vld [vmem:[%s1928_s3 + $0x10] sm:$0xff] }
  0x61   :  { %602 = vmatmul.bf16.vlgmr.msrb.gmra.mxu2 %v189_v3  ;;  %v1496_v3 = vld [vmem:[%s1927_s4 + $0x30] sm:$0xff] }
  0x62   :  { %651 = vmatmul.bf16.vlgmr.msrb.gmra.mxu3 %v190_v4  ;;  %v1488_v4 = vld [vmem:[%s1928_s3 + $0x30] sm:$0xff]  ;;  %1013 = vmatpush.bf16.msrb.mxu0 %v1496_v3  ;;  %v1482_v3 = vld [vmem:[%s1928_s3] sm:$0xff] }
  0x63   :  { %1110 = vmatpush.bf16.msrb.mxu1 %v1488_v4 }
  0x66   :  { %1014 = vmatpush.bf16.msrb.mxu0 %v1495_v12  ;;  %v1475_v12 = vld [vmem:[%s1924_s1 + $0x8] sm:$0xff] }
  0x67   :  { %1111 = vmatpush.bf16.msrb.mxu1 %v1487_v13 }
  0x6a   :  { %1015 = vmatpush.bf16.msrb.mxu0 %v1494_v23 }
  0x6b   :  { %1112 = vmatpush.bf16.msrb.mxu1 %v1486_v24 }
  0x6e   :  { %1016 = vmatpush.bf16.msrb.mxu0 %v1493_v34 }
  0x6f   :  { %1113 = vmatpush.bf16.msrb.mxu1 %v1485_v35 }
  0x71   :  { %607 = vmatmul.bf16.gmra.mxu2 %v193_v25  ;;  %v57_v25 = vld [vmem:[%s1925_s0 + $0x70] sm:$0xff] }
  0x72   :  { %656 = vmatmul.bf16.gmra.mxu3 %v194_v26  ;;  %v58_v26 = vld [vmem:[%s1925_s0 + $0x78] sm:$0xff]  ;;  %v109_v29 = vunpack.c.0.s8 %v57_v25  ;;  %v113_v31 = vunpack.c.1.s8 %v57_v25  ;;  %1017 = vmatpush.bf16.msrb.mxu0 %v1492_v45  ;;  %v117_v49 = vunpack.c.2.s8 %v57_v25  ;;  %v121_v52 = vunpack.c.3.s8 %v57_v25  ;;  %v1476_v25 = vld [vmem:[%s1924_s1 + $0x10] sm:$0xff] }
  0x73   :  { %v110_v32 = vunpack.c.0.s8 %v58_v26  ;;  %v114_v33 = vunpack.c.1.s8 %v58_v26  ;;  %1114 = vmatpush.bf16.msrb.mxu1 %v1484_v46  ;;  %v118_v53 = vunpack.c.2.s8 %v58_v26  ;;  %v122_v54 = vunpack.c.3.s8 %v58_v26 }
  0x74   :  { %v173_v36 = vcvt.s32.f32 %v109_v29  ;;  %v177_v37 = vcvt.s32.f32 %v113_v31  ;;  %v181_v56 = vcvt.s32.f32 %v117_v49  ;;  %v185_v57 = vcvt.s32.f32 %v121_v52 }
  0x75   :  { %v174_v38 = vcvt.s32.f32 %v110_v32  ;;  %v182_v58 = vcvt.s32.f32 %v118_v53  ;;  %v186_v59 = vcvt.s32.f32 %v122_v54 }
  0x76   :  { %v213_v43 = vpack.c.bf16 %v177_v37, %v173_v36 }
  0x77   :  { %1115 = vmatpush.bf16.msrb.mxu1 %v1483_v60 }
  0x7b   :  { %1116 = vmatpush.bf16.msrb.mxu1 %v1482_v3  ;;  %v1478_v3 = vld [vmem:[%s1924_s1 + $0x20] sm:$0xff] }
  0x81   :  { %612 = vmatmul.bf16.gmra.mxu2 %v197_v39  ;;  %v178_v39 = vcvt.s32.f32 %v114_v33 }
  0x82   :  { %661 = vmatmul.bf16.gmra.mxu3 %v198_v40 }
  0x83   :  { %v214_v44 = vpack.c.bf16 %v178_v39, %v174_v38 }
  0x91   :  { %617 = vmatmul.bf16.gmra.mxu2 %v201_v50  ;;  %v1491_v50 = vld [vmem:[%s1927_s4 + $0x8] sm:$0xff] }
  0x92   :  { %666 = vmatmul.bf16.gmra.mxu3 %v202_v51  ;;  %1018 = vmatpush.bf16.msrb.mxu0 %v1491_v50 }
  0x96   :  { %1019 = vmatpush.bf16.msrb.mxu0 %v1490_v55 }
  0x99   :  { %1020 = vmatmul.bf16.vlgmr.msrb.gmra.mxu0 %v1474_v61 }
  0x9e   :  { %v505_v4 = vpop.f32.mrf.mxu0 }
  0xa1   :  { %622 = vmatmul.bf16.gmra.mxu2 %v205_v1  ;;  %v217_v1 = vpack.c.bf16 %v185_v57, %v181_v56 }
  0xa2   :  { %671 = vmatmul.bf16.gmra.mxu3 %v206_v2  ;;  %v218_v2 = vpack.c.bf16 %v186_v59, %v182_v58 }
  0xa4   :  { %v525_v5 = vpop.f32.mrf.mxu2 }
  0xa5   :  { %v574_v6 = vpop.f32.mrf.mxu3 }
  0xa6   :  { %v1765_v8 = vadd.f32 %v574_v6, %v525_v5  ;;  %v554_v5 = vpop.f32.mrf.mxu1  ;;  %v507_v10 = vpop.f32.mrf.mxu0 }
  0xa9   :  { %1025 = vmatmul.bf16.gmra.mxu0 %v1475_v12 }
  0xac   :  { %v527_v18 = vpop.f32.mrf.mxu2 }
  0xad   :  { %v576_v19 = vpop.f32.mrf.mxu3 }
  0xae   :  { %v1773_v20 = vadd.f32 %v576_v19, %v527_v18  ;;  %v556_v11 = vpop.f32.mrf.mxu1  ;;  %v555_v18 = vadd.f32 %v554_v5, %v505_v4  ;;  %v510_v19 = vpop.f32.mrf.mxu0 }
  0xaf   :  { %v557_v24 = vadd.f32 %v556_v11, %v507_v10 }
  0xb1   :  { %627 = vmatmul.bf16.gmra.mxu2 %v209_v21 }
  0xb2   :  { %676 = vmatmul.bf16.gmra.mxu3 %v210_v22  ;;  %v762_v22 = vpop.permute.xlu0 %761 }
  0xb4   :  { %v530_v27 = vpop.f32.mrf.mxu2 }
  0xb5   :  { %v579_v28 = vpop.f32.mrf.mxu3 }
  0xb6   :  { %v1787_v30 = vadd.f32 %v579_v28, %v530_v27  ;;  %v559_v21 = vpop.f32.mrf.mxu1  ;;  %v512_v32 = vpop.f32.mrf.mxu0 }
  0xb9   :  { %1030 = vmatmul.bf16.gmra.mxu0 %v1476_v25 }
  0xba   :  { %v767_v34 = vpop.permute.xlu0 %766 }
  0xbc   :  { %v532_v40 = vpop.f32.mrf.mxu2 }
  0xbd   :  { %v581_v41 = vpop.f32.mrf.mxu3 }
  0xbe   :  { %v1795_v42 = vadd.f32 %v581_v41, %v532_v40  ;;  %v561_v33 = vpop.f32.mrf.mxu1  ;;  %v560_v40 = vadd.f32 %v559_v21, %v510_v19  ;;  %v772_v41 = vpop.permute.xlu1 %771 }
  0xbf   :  { %v562_v46 = vadd.f32 %v561_v33, %v512_v32 }
  0xc1   :  { %632 = vmatmul.bf16.gmra.mxu2 %v213_v43 }
  0xc2   :  { %681 = vmatmul.bf16.gmra.mxu3 %v214_v44  ;;  %v515_v44 = vpop.f32.mrf.mxu0  ;;  %v792_v33 = vpop.permute.xlu0 %791 }
  0xc4   :  { %v535_v47 = vpop.f32.mrf.mxu2 }
  0xc5   :  { %v584_v48 = vpop.f32.mrf.mxu3 }
  0xc6   :  { %v1806_v51 = vadd.f32 %v584_v48, %v535_v47  ;;  %v564_v45 = vpop.f32.mrf.mxu1  ;;  %v1477_v47 = vld [vmem:[%s1924_s1 + $0x18] sm:$0xff]  ;;  %v777_v54 = vpop.permute.xlu1 %776 }
  0xc9   :  { %1035 = vmatmul.bf16.gmra.mxu0 %v1477_v47 }
  0xca   :  { %v517_v57 = vpop.f32.mrf.mxu0 }
  0xcc   :  { %v537_v62 = vpop.f32.mrf.mxu2 }
  0xcd   :  { %v586_v63 = vpop.f32.mrf.mxu3 }
  0xce   :  { %v1817_v0 = vadd.f32 %v586_v63, %v537_v62  ;;  %v566_v58 = vpop.f32.mrf.mxu1  ;;  %v565_v62 = vadd.f32 %v564_v45, %v515_v44  ;;  %v782_v63 = vpop.permute.xlu2 %781 }
  0xd1   :  { %637 = vmatmul.bf16.gmra.mxu2 %v217_v1 }
  0xd2   :  { %686 = vmatmul.bf16.gmra.mxu3 %v218_v2  ;;  %v567_v2 = vadd.f32 %v566_v58, %v517_v57  ;;  %v520_v10 = vpop.f32.mrf.mxu0 }
  0xd4   :  { %v540_v6 = vpop.f32.mrf.mxu2 }
  0xd5   :  { %v589_v7 = vpop.f32.mrf.mxu3 }
  0xd6   :  { %v1822_v9 = vadd.f32 %v589_v7, %v540_v6  ;;  %v569_v11 = vpop.f32.mrf.mxu1 }
  0xd7   :  { %v570_v21 = vadd.f32 %v569_v11, %v520_v10 }
  0xd9   :  { %1040 = vmatmul.bf16.gmra.mxu0 %v1478_v3 }
  0xdc   :  { %v542_v13 = vpop.f32.mrf.mxu2 }
  0xdd   :  { %v591_v14 = vpop.f32.mrf.mxu3 }
  0xde   :  { %v1827_v15 = vadd.f32 %v591_v14, %v542_v13  ;;  %v787_v13 = vpop.permute.xlu2 %786 }
  0xe4   :  { %v603_v16 = vpop.f32.mrf.mxu2 }
  0xe5   :  { %v652_v17 = vpop.f32.mrf.mxu3  ;;  %v604_v23 = vadd.f32 %v603_v16, %v555_v18 }
  0xe7   :  { %v653_v28 = vadd.f32 %v652_v17, %v604_v23  ;;  %v571_v23 = vpop.f32.mrf.mxu1 }
  0xe9   :  { %v839_v35 = vmul.f32 %v762_v22, %v653_v28  ;;  %v522_v22 = vpop.f32.mrf.mxu0 }
  0xea   :  { %v572_v25 = vadd.f32 %v571_v23, %v522_v22 }
  0xec   :  { %v605_v26 = vpop.f32.mrf.mxu2 }
  0xed   :  { %v654_v27 = vpop.f32.mrf.mxu3  ;;  %v606_v29 = vadd.f32 %v605_v26, %v557_v24  ;;  %v1479_v26 = vld [vmem:[%s1924_s1 + $0x28] sm:$0xff] }
  0xee   :  { %1045 = vmatmul.bf16.gmra.mxu0 %v1479_v26 }
  0xef   :  { %v655_v31 = vadd.f32 %v654_v27, %v606_v29 }
  0xf1   :  { %v840_v36 = vmul.f32 %v767_v34, %v655_v31  ;;  %v797_v34 = vpop.permute.xlu1 %796 }
  0xf3   :  { %v855_v37 = vpack.c.bf16 %v840_v36, %v839_v35 }
  0xf4   :  { %v608_v38 = vpop.f32.mrf.mxu2 }
  0xf5   :  { %v657_v39 = vpop.f32.mrf.mxu3  ;;  %1117 = vmatmul.bf16.vlgmr.msrb.gmra.mxu1 %v855_v37  ;;  %v609_v43 = vadd.f32 %v608_v38, %v560_v40 }
  0xf7   :  { %v658_v50 = vadd.f32 %v657_v39, %v609_v43 }
  0xf9   :  { %v841_v55 = vmul.f32 %v772_v41, %v658_v50  ;;  %v1480_v41 = vld [vmem:[%s1924_s1 + $0x30] sm:$0xff] }
  0xfc   :  { %v610_v48 = vpop.f32.mrf.mxu2 }
  0xfd   :  { %v659_v49 = vpop.f32.mrf.mxu3  ;;  %v611_v52 = vadd.f32 %v610_v48, %v562_v46  ;;  %v807_v48 = vpop.permute.xlu0 %806 }
  0xfe   :  { %1050 = vmatmul.bf16.gmra.mxu0 %v1480_v41 }
  0xff   :  { %v660_v53 = vadd.f32 %v659_v49, %v611_v52  ;;  %v802_v49 = vpop.permute.xlu2 %801 }
 0x101   :  { %v842_v56 = vmul.f32 %v777_v54, %v660_v53 }
 0x103   :  { %v856_v59 = vpack.c.bf16 %v842_v56, %v841_v55  ;;  %v1481_v56 = vld [vmem:[%s1924_s1 + $0x38] sm:$0xff] }
 0x104   :  { %v613_v60 = vpop.f32.mrf.mxu2 }
 0x105   :  { %v662_v61 = vpop.f32.mrf.mxu3  ;;  %1122 = vmatmul.bf16.gmra.mxu1 %v856_v59  ;;  %v614_v1 = vadd.f32 %v613_v60, %v565_v62 }
 0x107   :  { %v663_v6 = vadd.f32 %v662_v61, %v614_v1  ;;  %v812_v61 = vpop.permute.xlu1 %811  ;;  %v817_v62 = vpop.permute.xlu2 %816 }
 0x109   :  { %v843_v14 = vmul.f32 %v782_v63, %v663_v6 }
 0x10c   :  { %v615_v4 = vpop.f32.mrf.mxu2 }
 0x10d   :  { %v664_v5 = vpop.f32.mrf.mxu3  ;;  %v616_v7 = vadd.f32 %v615_v4, %v567_v2 }
 0x10e   :  { %1055 = vmatmul.bf16.gmra.mxu0 %v1481_v56 }
 0x10f   :  { %v665_v12 = vadd.f32 %v664_v5, %v616_v7 }
 0x111   :  { %v844_v16 = vmul.f32 %v787_v13, %v665_v12  ;;  %v822_v12 = vpop.permute.xlu0 %821 }
 0x113   :  { %v857_v17 = vpack.c.bf16 %v844_v16, %v843_v14 }
 0x114   :  { %v618_v18 = vpop.f32.mrf.mxu2 }
 0x115   :  { %v667_v19 = vpop.f32.mrf.mxu3  ;;  %1127 = vmatmul.bf16.gmra.mxu1 %v857_v17  ;;  %v619_v24 = vadd.f32 %v618_v18, %v570_v21 }
 0x116   :  { %v1021_v17 = vpop.f32.mrf.mxu0 }
 0x117   :  { %v668_v29 = vadd.f32 %v667_v19, %v619_v24 }
 0x119   :  { %v845_v35 = vmul.f32 %v792_v33, %v668_v29  ;;  %v1858_v33 = vld [vmem:[%s1929_s5] ss:$0 sm:$0xff] }
 0x11c   :  { %v620_v27 = vpop.f32.mrf.mxu2 }
 0x11d   :  { %v669_v28 = vpop.f32.mrf.mxu3  ;;  %v621_v31 = vadd.f32 %v620_v27, %v572_v25  ;;  %v832_v27 = vpop.permute.xlu2 %831 }
 0x11e   :  { %v1023_v25 = vpop.f32.mrf.mxu0 }
 0x11f   :  { %v670_v32 = vadd.f32 %v669_v28, %v621_v31 }
 0x121   :  { %v846_v36 = vmul.f32 %v797_v34, %v670_v32 }
 0x123   :  { %v858_v37 = vpack.c.bf16 %v846_v36, %v845_v35 }
 0x124   :  { %v623_v38 = vpop.f32.mrf.mxu2 }
 0x125   :  { %v672_v39 = vpop.f32.mrf.mxu3  ;;  %1132 = vmatmul.bf16.gmra.mxu1 %v858_v37  ;;  %v624_v40 = vadd.f32 %v623_v38, %v1765_v8 }
 0x126   :  { %v1026_v32 = vpop.f32.mrf.mxu0 }
 0x127   :  { %v673_v45 = vadd.f32 %v672_v39, %v624_v40 }
 0x129   :  { %v847_v50 = vmul.f32 %v802_v49, %v673_v45 }
 0x12c   :  { %v625_v43 = vpop.f32.mrf.mxu2 }
 0x12d   :  { %v674_v44 = vpop.f32.mrf.mxu3  ;;  %v626_v46 = vadd.f32 %v625_v43, %v1773_v20 }
 0x12e   :  { %v1028_v34 = vpop.f32.mrf.mxu0 }
 0x12f   :  { %v675_v47 = vadd.f32 %v674_v44, %v626_v46 }
 0x131   :  { %v848_v52 = vmul.f32 %v807_v48, %v675_v47 }
 0x133   :  { %v859_v53 = vpack.c.bf16 %v848_v52, %v847_v50 }
 0x134   :  { %v628_v54 = vpop.f32.mrf.mxu2 }
 0x135   :  { %v677_v55 = vpop.f32.mrf.mxu3  ;;  %1137 = vmatmul.bf16.gmra.mxu1 %v859_v53  ;;  %v629_v8 = vadd.f32 %v628_v54, %v1787_v30 }
 0x136   :  { %v1031_v39 = vpop.f32.mrf.mxu0 }
 0x137   :  { %v678_v59 = vadd.f32 %v677_v55, %v629_v8 }
 0x139   :  { %v849_v63 = vmul.f32 %v812_v61, %v678_v59 }
 0x13c   :  { %v630_v57 = vpop.f32.mrf.mxu2 }
 0x13d   :  { %v679_v58 = vpop.f32.mrf.mxu3  ;;  %v631_v20 = vadd.f32 %v630_v57, %v1795_v42  ;;  %v827_v42 = vpop.permute.xlu1 %826 }
 0x13e   :  { %v1033_v46 = vpop.f32.mrf.mxu0 }
 0x13f   :  { %v680_v60 = vadd.f32 %v679_v58, %v631_v20 }
 0x141   :  { %v850_v1 = vmul.f32 %v817_v62, %v680_v60 }
 0x143   :  { %v860_v2 = vpack.c.bf16 %v850_v1, %v849_v63 }
 0x144   :  { %v633_v3 = vpop.f32.mrf.mxu2 }
 0x145   :  { %v682_v4 = vpop.f32.mrf.mxu3  ;;  %1142 = vmatmul.bf16.gmra.mxu1 %v860_v2  ;;  %v634_v30 = vadd.f32 %v633_v3, %v1806_v51 }
 0x146   :  { %v1036_v53 = vpop.f32.mrf.mxu0 }
 0x147   :  { %v683_v7 = vadd.f32 %v682_v4, %v634_v30 }
 0x149   :  { %v851_v13 = vmul.f32 %v822_v12, %v683_v7 }
 0x14c   :  { %v635_v5 = vpop.f32.mrf.mxu2 }
 0x14d   :  { %v684_v6 = vpop.f32.mrf.mxu3  ;;  %v636_v10 = vadd.f32 %v635_v5, %v1817_v0  ;;  %v837_v0 = vpop.permute.xlu0 %836 }
 0x14e   :  { %v1038_v58 = vpop.f32.mrf.mxu0 }
 0x14f   :  { %v685_v11 = vadd.f32 %v684_v6, %v636_v10 }
 0x151   :  { %v852_v14 = vmul.f32 %v827_v42, %v685_v11 }
 0x153   :  { %v861_v16 = vpack.c.bf16 %v852_v14, %v851_v13 }
 0x154   :  { %v638_v18 = vpop.f32.mrf.mxu2 }
 0x155   :  { %v687_v19 = vpop.f32.mrf.mxu3  ;;  %1147 = vmatmul.bf16.gmra.mxu1 %v861_v16  ;;  %v639_v21 = vadd.f32 %v638_v18, %v1822_v9 }
 0x156   :  { %v1041_v63 = vpop.f32.mrf.mxu0 }
 0x157   :  { %v688_v23 = vadd.f32 %v687_v19, %v639_v21 }
 0x159   :  { %v853_v28 = vmul.f32 %v832_v27, %v688_v23 }
 0x15c   :  { %v640_v22 = vpop.f32.mrf.mxu2 }
 0x15d   :  { %v641_v51 = vadd.f32 %v640_v22, %v1827_v15  ;;  %v689_v24 = vpop.f32.mrf.mxu3 }
 0x15e   :  { %v1043_v5 = vpop.f32.mrf.mxu0 }
 0x15f   :  { %v690_v26 = vadd.f32 %v689_v24, %v641_v51 }
 0x161   :  { %v854_v29 = vmul.f32 %v837_v0, %v690_v26 }
 0x163   :  { %v862_v31 = vpack.c.bf16 %v854_v29, %v853_v28 }
 0x165   :  { %1152 = vmatmul.bf16.gmra.mxu1 %v862_v31 }
 0x16b   :  { %v1046_v42 = vpop.f32.mrf.mxu0 }
 0x172   :  { %v1118_v9 = vpop.f32.mrf.mxu1 }
 0x173   :  { %v1119_v35 = vadd.f32 %v1118_v9, %v1021_v17  ;;  %v1048_v18 = vpop.f32.mrf.mxu0 }
 0x175   :  { %v1162_v15 = vadd.f32 %v1858_v33, %v1119_v35 }
 0x177   :  { %v1178_v36 = vmax.f32 %v1162_v15, 0.0 }
 0x179   :  { %1194 = vst [vmem:[%s1930_s6] sm:$0xff] %v1178_v36 }
 0x17a   :  { %v1120_v37 = vpop.f32.mrf.mxu1 }
 0x17b   :  { %v1121_v38 = vadd.f32 %v1120_v37, %v1023_v25  ;;  %v1051_v25 = vpop.f32.mrf.mxu0 }
 0x17d   :  { %v1163_v40 = vadd.f32 %v1858_v33, %v1121_v38 }
 0x17f   :  { %v1179_v41 = vmax.f32 %v1163_v40, 0.0 }
 0x181   :  { %1195 = vst [vmem:[%s1930_s6 + $0x8] sm:$0xff] %v1179_v41 }
 0x182   :  { %v1123_v43 = vpop.f32.mrf.mxu1 }
 0x183   :  { %v1124_v44 = vadd.f32 %v1123_v43, %v1026_v32  ;;  %v1053_v31 = vpop.f32.mrf.mxu0 }
 0x185   :  { %v1164_v45 = vadd.f32 %v1858_v33, %v1124_v44 }
 0x187   :  { %v1180_v47 = vmax.f32 %v1164_v45, 0.0 }
 0x189   :  { %1196 = vst [vmem:[%s1930_s6 + $0x10] sm:$0xff] %v1180_v47 }
 0x18a   :  { %v1125_v48 = vpop.f32.mrf.mxu1 }
 0x18b   :  { %v1126_v49 = vadd.f32 %v1125_v48, %v1028_v34  ;;  %v1056_v36 = vpop.f32.mrf.mxu0 }
 0x18d   :  { %v1165_v50 = vadd.f32 %v1858_v33, %v1126_v49 }
 0x18f   :  { %v1181_v52 = vmax.f32 %v1165_v50, 0.0 }
 0x191   :  { %1197 = vst [vmem:[%s1930_s6 + $0x18] sm:$0xff] %v1181_v52 }
 0x192   :  { %v1128_v54 = vpop.f32.mrf.mxu1 }
 0x193   :  { %v1129_v55 = vadd.f32 %v1128_v54, %v1031_v39  ;;  %v1058_v41 = vpop.f32.mrf.mxu0 }
 0x195   :  { %v1166_v8 = vadd.f32 %v1858_v33, %v1129_v55 }
 0x197   :  { %v1182_v56 = vmax.f32 %v1166_v8, 0.0 }
 0x199   :  { %1198 = vst [vmem:[%s1930_s6 + $0x20] sm:$0xff] %v1182_v56 }
 0x19a   :  { %v1130_v57 = vpop.f32.mrf.mxu1 }
 0x19b   :  { %v1131_v59 = vadd.f32 %v1130_v57, %v1033_v46 }
 0x19d   :  { %v1167_v20 = vadd.f32 %v1858_v33, %v1131_v59 }
 0x19f   :  { %v1183_v60 = vmax.f32 %v1167_v20, 0.0 }
 0x1a1   :  { %1199 = vst [vmem:[%s1930_s6 + $0x28] sm:$0xff] %v1183_v60 }
 0x1a2   :  { %v1133_v61 = vpop.f32.mrf.mxu1 }
 0x1a3   :  { %v1134_v62 = vadd.f32 %v1133_v61, %v1036_v53 }
 0x1a5   :  { %v1168_v1 = vadd.f32 %v1858_v33, %v1134_v62 }
 0x1a7   :  { %v1184_v2 = vmax.f32 %v1168_v1, 0.0 }
 0x1a9   :  { %1200 = vst [vmem:[%s1930_s6 + $0x30] sm:$0xff] %v1184_v2 }
 0x1aa   :  { %v1135_v3 = vpop.f32.mrf.mxu1 }
 0x1ab   :  { %v1136_v4 = vadd.f32 %v1135_v3, %v1038_v58 }
 0x1ad   :  { %v1169_v30 = vadd.f32 %v1858_v33, %v1136_v4 }
 0x1af   :  { %v1185_v6 = vmax.f32 %v1169_v30, 0.0 }
 0x1b1   :  { %1201 = vst [vmem:[%s1930_s6 + $0x38] sm:$0xff] %v1185_v6 }
 0x1b2   :  { %v1138_v7 = vpop.f32.mrf.mxu1 }
 0x1b3   :  { %v1139_v10 = vadd.f32 %v1138_v7, %v1041_v63 }
 0x1b5   :  { %v1170_v11 = vadd.f32 %v1858_v33, %v1139_v10 }
 0x1b7   :  { %v1186_v12 = vmax.f32 %v1170_v11, 0.0 }
 0x1b9   :  { %1202 = vst [vmem:[%s1930_s6 + $0x40] sm:$0xff] %v1186_v12 }
 0x1ba   :  { %v1140_v13 = vpop.f32.mrf.mxu1 }
 0x1bb   :  { %v1141_v14 = vadd.f32 %v1140_v13, %v1043_v5 }
 0x1bd   :  { %v1171_v16 = vadd.f32 %v1858_v33, %v1141_v14 }
 0x1bf   :  { %v1187_v17 = vmax.f32 %v1171_v16, 0.0 }
 0x1c1   :  { %1203 = vst [vmem:[%s1930_s6 + $0x48] sm:$0xff] %v1187_v17 }
 0x1c2   :  { %v1143_v19 = vpop.f32.mrf.mxu1 }
 0x1c3   :  { %v1144_v21 = vadd.f32 %v1143_v19, %v1046_v42 }
 0x1c5   :  { %v1172_v22 = vadd.f32 %v1858_v33, %v1144_v21 }
 0x1c7   :  { %v1188_v23 = vmax.f32 %v1172_v22, 0.0 }
 0x1c9   :  { %1204 = vst [vmem:[%s1930_s6 + $0x50] sm:$0xff] %v1188_v23 }
 0x1ca   :  { %v1145_v51 = vpop.f32.mrf.mxu1 }
 0x1cb   :  { %v1146_v24 = vadd.f32 %v1145_v51, %v1048_v18 }
 0x1cd   :  { %v1173_v26 = vadd.f32 %v1858_v33, %v1146_v24 }
 0x1cf   :  { %v1189_v0 = vmax.f32 %v1173_v26, 0.0 }
 0x1d1   :  { %1205 = vst [vmem:[%s1930_s6 + $0x58] sm:$0xff] %v1189_v0 }
 0x1d2   :  { %v1148_v27 = vpop.f32.mrf.mxu1 }
 0x1d3   :  { %v1149_v28 = vadd.f32 %v1148_v27, %v1051_v25 }
 0x1d5   :  { %v1174_v29 = vadd.f32 %v1858_v33, %v1149_v28 }
 0x1d7   :  { %v1190_v32 = vmax.f32 %v1174_v29, 0.0 }
 0x1d9   :  { %1206 = vst [vmem:[%s1930_s6 + $0x60] sm:$0xff] %v1190_v32 }
 0x1da   :  { %v1150_v9 = vpop.f32.mrf.mxu1 }
 0x1db   :  { %v1151_v34 = vadd.f32 %v1150_v9, %v1053_v31 }
 0x1dd   :  { %v1175_v35 = vadd.f32 %v1858_v33, %v1151_v34 }
 0x1df   :  { %v1191_v15 = vmax.f32 %v1175_v35, 0.0 }
 0x1e1   :  { %1207 = vst [vmem:[%s1930_s6 + $0x68] sm:$0xff] %v1191_v15 }
 0x1e2   :  { %v1153_v37 = vpop.f32.mrf.mxu1 }
 0x1e3   :  { %v1154_v38 = vadd.f32 %v1153_v37, %v1056_v36 }
 0x1e5   :  { %v1176_v39 = vadd.f32 %v1858_v33, %v1154_v38 }
 0x1e7   :  { %v1192_v40 = vmax.f32 %v1176_v39, 0.0 }
 0x1e9   :  { %1208 = vst [vmem:[%s1930_s6 + $0x70] sm:$0xff] %v1192_v40 }
 0x1ea   :  { %v1155_v43 = vpop.f32.mrf.mxu1 }
 0x1eb   :  { %v1156_v44 = vadd.f32 %v1155_v43, %v1058_v41 }
 0x1ed   :  { %v1177_v45 = vadd.f32 %v1858_v33, %v1156_v44 }
 0x1ef   :  { %v1193_v46 = vmax.f32 %v1177_v45, 0.0 }
 0x1f1   :  { %1209 = vst [vmem:[%s1930_s6 + $0x78] sm:$0xff] %v1193_v46 }

// kernel: encoder_forward.3
= control target key start
LH: loop header
LB: loop body
LE: loop exit
PB: predicated region body
PF: predicated region fallthrough
CT: control target
= control target key end

     0   :  { %11 = vsyncpa [#allocation4], 0  ;;  %s3450_s0 = inlined_call_operand.vmem [shape: s8[512,512], index: 0, kind: input, shape index: {}]   ;;  %s3451_s1 = inlined_call_operand.hbm [shape: bf16[512,128], index: 1, kind: input, shape index: {}]   ;;  %s3452_s2 = inlined_call_operand.vmem [shape: f32[512,1], index: 2, kind: input, shape index: {}]   ;;  %s3453_s3 = inlined_call_operand.hbm [shape: bf16[128,128], index: 3, kind: input, shape index: {}]   ;;  %s3454_s4 = inlined_call_operand.hbm [shape: bf16[128,128], index: 4, kind: input, shape index: {}]   ;;  %s3455_s5 = inlined_call_operand.vmem [shape: f32[1,128], index: 5, kind: input, shape index: {}]   ;;  %s3456_s6 = inlined_call_operand.vmem [shape: bf16[512,128], index: 6, kind: output, shape index: {}]  }
   0x1   :  { %12 = vsyncpa [#allocation6], 0  ;;  %s3102_s21 = smov 0   ;;  %s3104_s22 = smov 0  }
   0x2   :  { %s3106_s23 = smov 0  }
   0x3 LB: > { %s2423_s24 = sadd.s32 4294967295, %s3059_s23   ;;  %p2425_p0 = scmp.ge.s32.totalorder %s3059_s23, 1  ;;  %s3059_s23 = sphi %s3106_s23, %s18_s23   ;;  %s3055_s22 = sphi %s3104_s22, %s3461_s22   ;;  %s3051_s21 = sphi %s3102_s21, %s3460_s21  }
   0x4   : > { %p199_p1 = scmp.lt.s32.totalorder %s3059_s23, 3  ;;  %p3120_p2 = scmp.eq.s32.totalorder %s2423_s24, 0 }
   0x5   : > { %s224_s28 = sshll.u32 %s3453_s3, 4  ;;  %s3061_s30 = smov [#allocation5]   ;;  %s225_s28 = int_to_ptr.hbm [resolvable:$true] %s224_s28 }
   0x6   : > { %p3127_p3 = pnand %p2425_p0, %p199_p1  ;;  %s226_s7 = sshll.u32 %s3061_s30, 4  ;;  %s227_s7 = int_to_ptr.vmem [resolvable:$true] %s226_s7 }
   0x7   : > { %s30_s9 = sadd.s32 1, %s3055_s22  ;;  %s3062_s10 = smov 64  }
   0x8   : > { %p2889_p4 = pneg %p3127_p3  ;;  %p32_p6 = scmp.ge.s32.totalorder %s30_s9, 2 }
   0x9   : > { %s3063_s11 = smov 4   ;;  %s210_s14 = sshll.u32 %s3451_s1, 4  ;;  %s211_s14 = int_to_ptr.hbm [resolvable:$true] %s210_s14 }
   0xa   : > { %p3135_p5 = pnand %p3120_p2, %p2889_p4  ;;  %s3463_s9 = smov (%p32_p6, %s30_s9), 0 }
   0xb   : > { %s3064_s15 = smov [#allocation3]   ;;  %s238_s19 = sshll.u32 %s3454_s4, 4  ;;  %s239_s19 = int_to_ptr.hbm [resolvable:$true] %s238_s19 }
   0xc   : > { %2895 = dma.hbm_to_vmem [thread:$0]  (!%p3135_p5), %s225_s28, 1024, %s227_s7, [#allocation6], %s3062_s10, %s3062_s10, %s3063_s11  }
   0xd   : > { %s212_s16 = sshll.u32 %s3064_s15, 4  ;;  %s3065_s20 = smov [#allocation7]   ;;  %s213_s16 = int_to_ptr.vmem [resolvable:$true] %s212_s16 }
   0xe   : > { %2892 = dma.hbm_to_vmem [thread:$0]  (!%p3135_p5), %s211_s14, 4096, %s213_s16, [#allocation4], %s3062_s10, %s3062_s10, %s3063_s11  }
   0xf   : > { %s240_s24 = sshll.u32 %s3065_s20, 4  ;;  %283 = sbr.rel (%p3127_p3) target bundleno = 714 (0x2ca), region = 44  ;;  %s241_s24 = int_to_ptr.vmem [resolvable:$true] %s240_s24 }
  0x10   : > { %2898 = dma.hbm_to_vmem [thread:$0]  (!%p3135_p5), %s239_s19, 1024, %s241_s24, [#allocation6], %s3062_s10, %s3062_s10, %s3063_s11  }
  0x14   : > { %3042 = dma.done.wait (%p3120_p2), [#allocation4], 4096  }
  0x15   : > { %3044 = vsyncadd (%p3120_p2), [#allocation4], 4294963200 }
  0x16   : > { %3046 = dma.done.wait (%p3120_p2), [#allocation6], 2048  }
  0x17   : > { %3048 = vsyncadd (%p3120_p2), [#allocation6], 4294965248  ;;  %v2709_v0 = vld [vmem:[#allocation3 + $0x38] sm:$0xff]  ;;  %s2434_s26 = sshll.u32 %s3051_s21, 3  ;;  %v2708_v2 = vld [vmem:[#allocation3 + $0x30] sm:$0xff]  ;;  %s2437_s30 = sshll.u32 %s3051_s21, 5 }
  0x18   : > { %v2717_v1 = vld [vmem:[#allocation3 + $0x78] sm:$0xff]  ;;  %2861 = vmatpush.bf16.msra.mxu2 %v2709_v0  ;;  %v2716_v3 = vld [vmem:[#allocation3 + $0x70] sm:$0xff]  ;;  %1039 = vmatpush.bf16.msra.mxu0 %v2709_v0  ;;  %p336_p7 = scmp.lt.s32.totalorder %s2434_s26, 15  ;;  %v2707_v4 = vld [vmem:[#allocation3 + $0x28] sm:$0xff]  ;;  %p347_p8 = scmp.lt.s32.totalorder %s2437_s30, 63  ;;  %v3066_v61 = vmov 0  }
  0x19   : > { %2869 = vmatpush.bf16.msra.mxu3 %v2717_v1  ;;  %1128 = vmatpush.bf16.msra.mxu1 %v2717_v1  ;;  %v2715_v5 = vld [vmem:[#allocation3 + $0x68] sm:$0xff]  ;;  %v2706_v6 = vld [vmem:[#allocation3 + $0x20] sm:$0xff]  ;;  %v2705_v8 = vld [vmem:[#allocation3 + $0x18] sm:$0xff]  ;;  %s2569_s12 = sshll.u32 %s3051_s21, 8 }
  0x1a   : > { %s3465_s26 = smov (!%p336_p7, %s2434_s26), 15  ;;  %v2714_v7 = vld [vmem:[#allocation3 + $0x60] sm:$0xff]  ;;  %v2713_v9 = vld [vmem:[#allocation3 + $0x58] sm:$0xff]  ;;  %v2704_v10 = vld [vmem:[#allocation3 + $0x10] sm:$0xff]  ;;  %s3467_s30 = smov (!%p347_p8, %s2437_s30), 63  ;;  %2935 = vset.pattern.permute.xlu0 %v3066_v61  ;;  %2936 = vset.pattern.permute.xlu1 %v3066_v61 }
  0x1b   : > { %s2701_s25 = sshll.u32 %s3465_s26, 5  ;;  %v2712_v11 = vld [vmem:[#allocation3 + $0x50] sm:$0xff]  ;;  %v2703_v18 = vld [vmem:[#allocation3 + $0x8] sm:$0xff]  ;;  %v2702_v24 = vld [vmem:[#allocation3] sm:$0xff]  ;;  %s2438_s7 = sshll.u32 %s3467_s30, 3  ;;  %2937 = vset.pattern.permute.xlu2 %v3066_v61 }
  0x1c   : > { %2862 = vmatpush.bf16.msra.mxu2 %v2708_v2  ;;  %1040 = vmatpush.bf16.msra.mxu0 %v2708_v2  ;;  %s3168_s29 = scalar_lea.vmem %s3450_s0, %s2701_s25  ;;  %v2711_v19 = vld [vmem:[#allocation3 + $0x48] sm:$0xff]  ;;  %v2710_v25 = vld [vmem:[#allocation3 + $0x40] sm:$0xff]  ;;  %v2725_v26 = vld [vmem:[#allocation3 + $0xb8] sm:$0xff]  ;;  %s3181_s11 = scalar_lea.vmem %s3452_s2, %s2438_s7 }
  0x1d   : > { %2870 = vmatpush.bf16.msra.mxu3 %v2716_v3  ;;  %1129 = vmatpush.bf16.msra.mxu1 %v2716_v3  ;;  %v410_v12 = vld [vmem:[%s3168_s29 + $0x80] sm:$0xff]  ;;  %v411_v13 = vld [vmem:[%s3168_s29 + $0x88] sm:$0xff]  ;;  %v2733_v27 = vld [vmem:[#allocation3 + $0xf8] sm:$0xff]  ;;  %s1735_s13 = sshra.s32 %s2569_s12, 3  ;;  %s2440_s17 = sshll.u32 %s3467_s30, 2 }
  0x1e   : > { %v490_v14 = vunpack.c.0.s8 %v410_v12  ;;  %v494_v15 = vunpack.c.1.s8 %v410_v12  ;;  %v491_v16 = vunpack.c.0.s8 %v411_v13  ;;  %v495_v17 = vunpack.c.1.s8 %v411_v13  ;;  %v2724_v30 = vld [vmem:[#allocation3 + $0xb0] sm:$0xff]  ;;  %v2723_v32 = vld [vmem:[#allocation3 + $0xa8] sm:$0xff]  ;;  %v2722_v44 = vld [vmem:[#allocation3 + $0xa0] sm:$0xff]  ;;  %s2570_s14 = sshll.u32 %s1735_s13, 2  ;;  %s3355_s20 = scalar_lea.vmem %s3456_s6, %s2440_s17 }
  0x1f   : > { %v2732_v31 = vld [vmem:[#allocation3 + $0xf0] sm:$0xff]  ;;  %v2731_v33 = vld [vmem:[#allocation3 + $0xe8] sm:$0xff]  ;;  %v498_v34 = vunpack.c.2.s8 %v410_v12  ;;  %v502_v35 = vunpack.c.3.s8 %v410_v12  ;;  %v499_v36 = vunpack.c.2.s8 %v411_v13  ;;  %v503_v37 = vunpack.c.3.s8 %v411_v13  ;;  %v2730_v45 = vld [vmem:[#allocation3 + $0xe0] sm:$0xff]  ;;  %s3268_s21 = scalar_lea.vmem [#allocation3], %s2570_s14 }
  0x20   : > { %2863 = vmatpush.bf16.msra.mxu2 %v2707_v4  ;;  %1041 = vmatpush.bf16.msra.mxu0 %v2707_v4  ;;  %v618_v20 = vcvt.s32.f32 %v490_v14  ;;  %v622_v21 = vcvt.s32.f32 %v494_v15  ;;  %v619_v22 = vcvt.s32.f32 %v491_v16  ;;  %v623_v23 = vcvt.s32.f32 %v495_v17  ;;  %v414_v46 = vld [vmem:[%s3168_s29 + $0xa0] sm:$0xff]  ;;  %v415_v47 = vld [vmem:[%s3168_s29 + $0xa8] sm:$0xff]  ;;  %v2721_v58 = vld [vmem:[#allocation3 + $0x98] sm:$0xff] }
  0x21   : > { %2871 = vmatpush.bf16.msra.mxu3 %v2715_v5  ;;  %1130 = vmatpush.bf16.msra.mxu1 %v2715_v5  ;;  %v626_v38 = vcvt.s32.f32 %v498_v34  ;;  %v630_v39 = vcvt.s32.f32 %v502_v35  ;;  %v627_v40 = vcvt.s32.f32 %v499_v36  ;;  %v631_v41 = vcvt.s32.f32 %v503_v37  ;;  %v2729_v59 = vld [vmem:[#allocation3 + $0xd8] sm:$0xff]  ;;  %v1494_v60 = vld [vmem:[%s3181_s11] sm:$0xff]  ;;  %v419_v13 = vld [vmem:[%s3168_s29 + $0xc8] sm:$0xff] }
  0x22   : > { %v714_v28 = vpack.c.bf16 %v622_v21, %v618_v20  ;;  %v715_v29 = vpack.c.bf16 %v623_v23, %v619_v22  ;;  %v506_v48 = vunpack.c.0.s8 %v414_v46  ;;  %v510_v49 = vunpack.c.1.s8 %v414_v46  ;;  %1528 = vperm.xlu0 %2935, %v1494_v60   ;;  %v418_v12 = vld [vmem:[%s3168_s29 + $0xc0] sm:$0xff]  ;;  %v1500_v14 = vld [vmem:[%s3181_s11 + $0x30] sm:$0xff] }
  0x23   : > { %v718_v42 = vpack.c.bf16 %v630_v39, %v626_v38  ;;  %v719_v43 = vpack.c.bf16 %v631_v41, %v627_v40  ;;  %v507_v50 = vunpack.c.0.s8 %v415_v47  ;;  %v511_v51 = vunpack.c.1.s8 %v415_v47  ;;  %v1504_v35 = vld [vmem:[%s3181_s11 + $0x50] sm:$0xff]  ;;  %v1509_v40 = vld [vmem:[%s3181_s11 + $0x78] sm:$0xff] }
  0x24   : > { %2864 = vmatpush.bf16.msra.mxu2 %v2706_v6  ;;  %1042 = vmatpush.bf16.msra.mxu0 %v2706_v6  ;;  %v634_v52 = vcvt.s32.f32 %v506_v48  ;;  %v638_v53 = vcvt.s32.f32 %v510_v49  ;;  %v514_v62 = vunpack.c.2.s8 %v414_v46  ;;  %v518_v63 = vunpack.c.3.s8 %v414_v46  ;;  %v1495_v6 = vld [vmem:[%s3181_s11 + $0x8] sm:$0xff]  ;;  %v2726_v46 = vld [vmem:[#allocation3 + $0xc0] sm:$0xff]  ;;  %v1512_v48 = vld [vmem:[%s3181_s11 + $0x90] sm:$0xff] }
  0x25   : > { %2872 = vmatpush.bf16.msra.mxu3 %v2714_v7  ;;  %1131 = vmatpush.bf16.msra.mxu1 %v2714_v7  ;;  %v635_v54 = vcvt.s32.f32 %v507_v50  ;;  %v639_v55 = vcvt.s32.f32 %v511_v51  ;;  %v515_v0 = vunpack.c.2.s8 %v415_v47  ;;  %v519_v1 = vunpack.c.3.s8 %v415_v47  ;;  %v1507_v47 = vld [vmem:[%s3181_s11 + $0x68] sm:$0xff]  ;;  %v394_v49 = vld [vmem:[%s3168_s29] sm:$0xff] }
  0x26   : > { %v722_v56 = vpack.c.bf16 %v638_v53, %v634_v52  ;;  %v642_v2 = vcvt.s32.f32 %v514_v62  ;;  %v646_v3 = vcvt.s32.f32 %v518_v63  ;;  %v522_v15 = vunpack.c.0.s8 %v418_v12  ;;  %v395_v50 = vld [vmem:[%s3168_s29 + $0x8] sm:$0xff] }
  0x27   : > { %v723_v57 = vpack.c.bf16 %v639_v55, %v635_v54  ;;  %v643_v4 = vcvt.s32.f32 %v515_v0  ;;  %v647_v5 = vcvt.s32.f32 %v519_v1  ;;  %v526_v16 = vunpack.c.1.s8 %v418_v12  ;;  %v1510_v1 = vld [vmem:[%s3181_s11 + $0x80] sm:$0xff] }
  0x28   : > { %2865 = vmatpush.bf16.msra.mxu2 %v2705_v8  ;;  %1043 = vmatpush.bf16.msra.mxu0 %v2705_v8  ;;  %v726_v7 = vpack.c.bf16 %v646_v3, %v642_v2  ;;  %v523_v17 = vunpack.c.0.s8 %v419_v13  ;;  %v650_v20 = vcvt.s32.f32 %v522_v15  ;;  %v535_v34 = vunpack.c.3.s8 %v419_v13  ;;  %v1518_v15 = vld [vmem:[%s3181_s11 + $0xc0] sm:$0xff] }
  0x29   : > { %2873 = vmatpush.bf16.msra.mxu3 %v2713_v9  ;;  %1132 = vmatpush.bf16.msra.mxu1 %v2713_v9  ;;  %v727_v8 = vpack.c.bf16 %v647_v5, %v643_v4  ;;  %v2720_v9 = vld [vmem:[#allocation3 + $0x90] sm:$0xff]  ;;  %v654_v21 = vcvt.s32.f32 %v526_v16  ;;  %v426_v51 = vunpack.c.0.s8 %v394_v49  ;;  %v430_v52 = vunpack.c.1.s8 %v394_v49 }
  0x2a   : > { %1533 = vperm.xlu0 %2935, %v1495_v6   ;;  %v651_v22 = vcvt.s32.f32 %v523_v17  ;;  %v663_v39 = vcvt.s32.f32 %v535_v34  ;;  %v427_v53 = vunpack.c.0.s8 %v395_v50  ;;  %v431_v54 = vunpack.c.1.s8 %v395_v50  ;;  %v1515_v6 = vld [vmem:[%s3181_s11 + $0xa8] sm:$0xff]  ;;  %v1521_v34 = vld [vmem:[%s3181_s11 + $0xd8] sm:$0xff] }
  0x2b   : > { %v558_v60 = vcvt.s32.f32 %v430_v52  ;;  %v434_v16 = vunpack.c.2.s8 %v394_v49  ;;  %v438_v17 = vunpack.c.3.s8 %v394_v49  ;;  %v399_v49 = vld [vmem:[%s3168_s29 + $0x28] sm:$0xff] }
  0x2c   : > { %2866 = vmatpush.bf16.msra.mxu2 %v2704_v10  ;;  %1044 = vmatpush.bf16.msra.mxu0 %v2704_v10  ;;  %v2728_v10 = vld [vmem:[#allocation3 + $0xd0] sm:$0xff]  ;;  %v555_v61 = vcvt.s32.f32 %v427_v53  ;;  %v559_v62 = vcvt.s32.f32 %v431_v54  ;;  %v443_v52 = vunpack.c.0.s8 %v399_v49  ;;  %v447_v53 = vunpack.c.1.s8 %v399_v49 }
  0x2d   : > { %2874 = vmatpush.bf16.msra.mxu3 %v2712_v11  ;;  %1133 = vmatpush.bf16.msra.mxu1 %v2712_v11  ;;  %v1496_v11 = vld [vmem:[%s3181_s11 + $0x10] sm:$0xff] }
  0x2e   : > { %1538 = vperm.xlu1 %2936, %v1496_v11   ;;  %v683_v0 = vpack.c.bf16 %v559_v62, %v555_v61 }
  0x30   : > { %2867 = vmatpush.bf16.msra.mxu2 %v2703_v18  ;;  %1045 = vmatpush.bf16.msra.mxu0 %v2703_v18  ;;  %v527_v18 = vunpack.c.1.s8 %v419_v13 }
  0x31   : > { %2875 = vmatpush.bf16.msra.mxu3 %v2711_v19  ;;  %1134 = vmatpush.bf16.msra.mxu1 %v2711_v19  ;;  %v1497_v19 = vld [vmem:[%s3181_s11 + $0x18] sm:$0xff] }
  0x32   : > { %1558 = vperm.xlu0 %2935, %v1500_v14   ;;  %v655_v23 = vcvt.s32.f32 %v527_v18  ;;  %v1513_v14 = vld [vmem:[%s3181_s11 + $0x98] sm:$0xff]  ;;  %v435_v18 = vunpack.c.2.s8 %v395_v50 }
  0x34   : > { %2868 = vmatpush.bf16.msra.mxu2 %v2702_v24  ;;  %1046 = vmatpush.bf16.msra.mxu0 %v2702_v24  ;;  %v1503_v24 = vld [vmem:[%s3181_s11 + $0x48] sm:$0xff] }
  0x35   : > { %2876 = vmatpush.bf16.msra.mxu3 %v2710_v25  ;;  %1135 = vmatpush.bf16.msra.mxu1 %v2710_v25  ;;  %v730_v25 = vpack.c.bf16 %v654_v21, %v650_v20 }
  0x36   : > { %1543 = vperm.xlu1 %2936, %v1497_v19   ;;  %v439_v19 = vunpack.c.3.s8 %v395_v50 }
  0x37   : > { %1087 = vmatmul.bf16.vlgmr.msra.gmra.mxu2 %v714_v28  ;;  %v2727_v28 = vld [vmem:[#allocation3 + $0xc8] sm:$0xff] }
  0x38   : > { %1217 = vmatpush.bf16.msrb.mxu2 %v2725_v26  ;;  %1176 = vmatmul.bf16.vlgmr.msra.gmra.mxu3 %v715_v29  ;;  %v731_v26 = vpack.c.bf16 %v655_v23, %v651_v22  ;;  %v1501_v29 = vld [vmem:[%s3181_s11 + $0x38] sm:$0xff] }
  0x39   : > { %1306 = vmatpush.bf16.msrb.mxu3 %v2733_v27  ;;  %v2719_v27 = vld [vmem:[#allocation3 + $0x88] sm:$0xff]  ;;  %1136 = vmatmul.bf16.vlgmr.msra.gmra.mxu1 %v683_v0  ;;  %v1505_v0 = vld [vmem:[%s3181_s11 + $0x58] sm:$0xff] }
  0x3a   : > { %1573 = vperm.xlu0 %2935, %v1503_v24   ;;  %v562_v24 = vcvt.s32.f32 %v434_v16  ;;  %v455_v16 = vunpack.c.3.s8 %v399_v49 }
  0x3c   : > { %1218 = vmatpush.bf16.msrb.mxu2 %v2724_v30  ;;  %v1506_v30 = vld [vmem:[%s3181_s11 + $0x60] sm:$0xff] }
  0x3d   : > { %1307 = vmatpush.bf16.msrb.mxu3 %v2732_v31  ;;  %v530_v31 = vunpack.c.2.s8 %v418_v12 }
  0x3e   : > { %1563 = vperm.xlu1 %2936, %v1501_v29  }
  0x3f   : > { %v658_v36 = vcvt.s32.f32 %v530_v31 }
  0x40   : > { %1219 = vmatpush.bf16.msrb.mxu2 %v2723_v32  ;;  %v534_v32 = vunpack.c.3.s8 %v418_v12 }
  0x41   : > { %1308 = vmatpush.bf16.msrb.mxu3 %v2731_v33  ;;  %v531_v33 = vunpack.c.2.s8 %v419_v13  ;;  %v1498_v13 = vld [vmem:[%s3181_s11 + $0x20] sm:$0xff] }
  0x42   : > { %1588 = vperm.xlu0 %2935, %v1506_v30   ;;  %v662_v37 = vcvt.s32.f32 %v534_v32  ;;  %1548 = vperm.xlu2 %2937, %v1498_v13   ;;  %v1499_v32 = vld [vmem:[%s3181_s11 + $0x28] sm:$0xff] }
  0x43   : > { %v659_v38 = vcvt.s32.f32 %v531_v33  ;;  %v1516_v33 = vld [vmem:[%s3181_s11 + $0xb0] sm:$0xff] }
  0x44   : > { %1220 = vmatpush.bf16.msrb.mxu2 %v2722_v44  ;;  %v734_v41 = vpack.c.bf16 %v662_v37, %v658_v36  ;;  %v423_v44 = vld [vmem:[%s3168_s29 + $0xe8] sm:$0xff]  ;;  %v397_v36 = vld [vmem:[%s3168_s29 + $0x18] sm:$0xff] }
  0x45   : > { %1309 = vmatpush.bf16.msrb.mxu3 %v2730_v45  ;;  %v2718_v45 = vld [vmem:[#allocation3 + $0x80] sm:$0xff]  ;;  %v547_v11 = vunpack.c.2.s8 %v423_v44  ;;  %v551_v12 = vunpack.c.3.s8 %v423_v44 }
  0x46   : > { %1578 = vperm.xlu1 %2936, %v1504_v35   ;;  %v396_v35 = vld [vmem:[%s3168_s29 + $0x10] sm:$0xff] }
  0x47   : > { %1092 = vmatmul.bf16.gmra.mxu2 %v718_v42  ;;  %v735_v42 = vpack.c.bf16 %v663_v39, %v659_v38  ;;  %v675_v22 = vcvt.s32.f32 %v547_v11  ;;  %v679_v23 = vcvt.s32.f32 %v551_v12  ;;  %v428_v37 = vunpack.c.0.s8 %v396_v35  ;;  %v1508_v11 = vld [vmem:[%s3181_s11 + $0x70] sm:$0xff]  ;;  %v1525_v12 = vld [vmem:[%s3181_s11 + $0xf8] sm:$0xff] }
  0x48   : > { %1181 = vmatmul.bf16.gmra.mxu3 %v719_v43  ;;  %1221 = vmatpush.bf16.msrb.mxu2 %v2721_v58  ;;  %v422_v43 = vld [vmem:[%s3168_s29 + $0xe0] sm:$0xff]  ;;  %v543_v58 = vunpack.c.1.s8 %v423_v44  ;;  %v432_v38 = vunpack.c.1.s8 %v396_v35  ;;  %v429_v39 = vunpack.c.0.s8 %v397_v36 }
  0x49   : > { %1310 = vmatpush.bf16.msrb.mxu3 %v2729_v59  ;;  %v538_v55 = vunpack.c.0.s8 %v422_v43  ;;  %v554_v59 = vcvt.s32.f32 %v426_v51  ;;  %v743_v31 = vpack.c.bf16 %v679_v23, %v675_v22  ;;  %v556_v50 = vcvt.s32.f32 %v428_v37 }
  0x4a   : > { %1603 = vperm.xlu0 %2935, %v1509_v40   ;;  %v671_v5 = vcvt.s32.f32 %v543_v58  ;;  %1553 = vperm.xlu2 %2937, %v1499_v32   ;;  %v433_v40 = vunpack.c.1.s8 %v397_v36  ;;  %v560_v51 = vcvt.s32.f32 %v432_v38  ;;  %v557_v54 = vcvt.s32.f32 %v429_v39  ;;  %v1511_v32 = vld [vmem:[%s3181_s11 + $0x88] sm:$0xff] }
  0x4b   : > { %v682_v63 = vpack.c.bf16 %v558_v60, %v554_v59  ;;  %v666_v2 = vcvt.s32.f32 %v538_v55  ;;  %v571_v58 = vcvt.s32.f32 %v443_v52  ;;  %v575_v59 = vcvt.s32.f32 %v447_v53 }
  0x4c   : > { %1222 = vmatpush.bf16.msrb.mxu2 %v2720_v9  ;;  %v546_v9 = vunpack.c.2.s8 %v422_v43  ;;  %v561_v55 = vcvt.s32.f32 %v433_v40  ;;  %v684_v62 = vpack.c.bf16 %v560_v51, %v556_v50 }
  0x4d   : > { %1311 = vmatpush.bf16.msrb.mxu3 %v2728_v10  ;;  %1047 = vmatmul.bf16.vlgmr.msra.gmra.mxu0 %v682_v63  ;;  %v550_v10 = vunpack.c.3.s8 %v422_v43  ;;  %v691_v61 = vpack.c.bf16 %v575_v59, %v571_v58 }
  0x4e   : > { %1593 = vperm.xlu1 %2936, %v1507_v47   ;;  %v674_v20 = vcvt.s32.f32 %v546_v9  ;;  %v685_v63 = vpack.c.bf16 %v561_v55, %v557_v54  ;;  %v2764_v9 = vld [vmem:[#allocation7 + $0x30] sm:$0xff] }
  0x4f   : > { %v678_v21 = vcvt.s32.f32 %v550_v10  ;;  %v2756_v10 = vld [vmem:[#allocation5 + $0x30] sm:$0xff] }
  0x50   : > { %1223 = vmatpush.bf16.msrb.mxu2 %v2719_v27  ;;  %v567_v27 = vcvt.s32.f32 %v439_v19 }
  0x51   : > { %1312 = vmatpush.bf16.msrb.mxu3 %v2727_v28  ;;  %v742_v30 = vpack.c.bf16 %v678_v21, %v674_v20 }
  0x52   : > { %1618 = vperm.xlu0 %2935, %v1512_v48  }
  0x54   : > { %1224 = vmatpush.bf16.msrb.mxu2 %v2718_v45  ;;  %v1524_v45 = vld [vmem:[%s3181_s11 + $0xf0] sm:$0xff] }
  0x55   : > { %1313 = vmatpush.bf16.msrb.mxu3 %v2726_v46  ;;  %v398_v46 = vld [vmem:[%s3168_s29 + $0x20] sm:$0xff] }
  0x56   : > { %1608 = vperm.xlu1 %2936, %v1510_v1   ;;  %v442_v47 = vunpack.c.0.s8 %v398_v46  ;;  %v446_v48 = vunpack.c.1.s8 %v398_v46  ;;  %v1522_v1 = vld [vmem:[%s3181_s11 + $0xe0] sm:$0xff]  ;;  %v450_v13 = vunpack.c.2.s8 %v398_v46 }
  0x57   : > { %1097 = vmatmul.bf16.gmra.mxu2 %v722_v56  ;;  %v542_v56 = vunpack.c.1.s8 %v422_v43  ;;  %v1502_v43 = vld [vmem:[%s3181_s11 + $0x40] sm:$0xff] }
  0x58   : > { %1186 = vmatmul.bf16.gmra.mxu3 %v723_v57  ;;  %v539_v57 = vunpack.c.0.s8 %v423_v44  ;;  %1568 = vperm.xlu2 %2937, %v1502_v43   ;;  %v1519_v44 = vld [vmem:[%s3181_s11 + $0xc8] sm:$0xff]  ;;  %v578_v21 = vcvt.s32.f32 %v450_v13  ;;  %v1520_v13 = vld [vmem:[%s3181_s11 + $0xd0] sm:$0xff] }
  0x59   : > { %v670_v3 = vcvt.s32.f32 %v542_v56  ;;  %v570_v56 = vcvt.s32.f32 %v442_v47  ;;  %v2755_v43 = vld [vmem:[#allocation5 + $0x28] sm:$0xff] }
  0x5a   : > { %v667_v4 = vcvt.s32.f32 %v539_v57  ;;  %1633 = vperm.xlu0 %2935, %v1515_v6   ;;  %v574_v57 = vcvt.s32.f32 %v446_v48  ;;  %v437_v6 = vunpack.c.2.s8 %v397_v36 }
  0x5c   : > { %v690_v60 = vpack.c.bf16 %v574_v57, %v570_v56  ;;  %v565_v19 = vcvt.s32.f32 %v437_v6 }
  0x5e   : > { %1623 = vperm.xlu1 %2936, %v1513_v14   ;;  %v454_v14 = vunpack.c.3.s8 %v398_v46  ;;  %v403_v46 = vld [vmem:[%s3168_s29 + $0x48] sm:$0xff] }
  0x5f   : > { %v463_v50 = vunpack.c.1.s8 %v403_v46 }
  0x60   : > { %1583 = vperm.xlu2 %2937, %v1505_v0   ;;  %v582_v22 = vcvt.s32.f32 %v454_v14 }
  0x61   : > { %v591_v58 = vcvt.s32.f32 %v463_v50 }
  0x62   : > { %1648 = vperm.xlu0 %2935, %v1518_v15   ;;  %v451_v15 = vunpack.c.2.s8 %v399_v49  ;;  %v459_v49 = vunpack.c.0.s8 %v403_v46 }
  0x64   : > { %v579_v23 = vcvt.s32.f32 %v451_v15  ;;  %v587_v57 = vcvt.s32.f32 %v459_v49 }
  0x66   : > { %1638 = vperm.xlu1 %2936, %v1516_v33   ;;  %v400_v33 = vld [vmem:[%s3168_s29 + $0x30] sm:$0xff] }
  0x67   : > { %1102 = vmatmul.bf16.gmra.mxu2 %v726_v7  ;;  %v738_v7 = vpack.c.bf16 %v670_v3, %v666_v2  ;;  %v444_v37 = vunpack.c.0.s8 %v400_v33  ;;  %v448_v38 = vunpack.c.1.s8 %v400_v33  ;;  %v456_v6 = vunpack.c.3.s8 %v400_v33 }
  0x68   : > { %1191 = vmatmul.bf16.gmra.mxu3 %v727_v8  ;;  %v739_v8 = vpack.c.bf16 %v671_v5, %v667_v4  ;;  %v436_v4 = vunpack.c.2.s8 %v396_v35  ;;  %v440_v5 = vunpack.c.3.s8 %v396_v35  ;;  %1598 = vperm.xlu2 %2937, %v1508_v11   ;;  %v2762_v11 = vld [vmem:[#allocation7 + $0x20] sm:$0xff] }
  0x69   : > { %v572_v51 = vcvt.s32.f32 %v444_v37  ;;  %v576_v52 = vcvt.s32.f32 %v448_v38 }
  0x6a   : > { %1663 = vperm.xlu0 %2935, %v1521_v34   ;;  %v401_v34 = vld [vmem:[%s3168_s29 + $0x38] sm:$0xff] }
  0x6b   : > { %v445_v39 = vunpack.c.0.s8 %v401_v34  ;;  %v449_v40 = vunpack.c.1.s8 %v401_v34  ;;  %v692_v0 = vpack.c.bf16 %v576_v52, %v572_v51 }
  0x6d   : > { %v573_v53 = vcvt.s32.f32 %v445_v39  ;;  %v577_v54 = vcvt.s32.f32 %v449_v40 }
  0x6e   : > { %1653 = vperm.xlu1 %2936, %v1519_v44   ;;  %v1514_v44 = vld [vmem:[%s3181_s11 + $0xa0] sm:$0xff] }
  0x70   : > { %1613 = vperm.xlu2 %2937, %v1511_v32  }
  0x72   : > { %1678 = vperm.xlu0 %2935, %v1524_v45   ;;  %v402_v45 = vld [vmem:[%s3168_s29 + $0x40] sm:$0xff] }
  0x73   : > { %v458_v47 = vunpack.c.0.s8 %v402_v45  ;;  %v462_v48 = vunpack.c.1.s8 %v402_v45  ;;  %v466_v14 = vunpack.c.2.s8 %v402_v45  ;;  %v470_v15 = vunpack.c.3.s8 %v402_v45  ;;  %v2761_v45 = vld [vmem:[#allocation7 + $0x18] sm:$0xff] }
  0x75   : > { %v586_v55 = vcvt.s32.f32 %v458_v47  ;;  %v590_v56 = vcvt.s32.f32 %v462_v48  ;;  %v406_v47 = vld [vmem:[%s3168_s29 + $0x60] sm:$0xff]  ;;  %v407_v48 = vld [vmem:[%s3168_s29 + $0x68] sm:$0xff] }
  0x76   : > { %1668 = vperm.xlu1 %2936, %v1522_v1   ;;  %v693_v1 = vpack.c.bf16 %v577_v54, %v573_v53  ;;  %v474_v49 = vunpack.c.0.s8 %v406_v47  ;;  %v478_v50 = vunpack.c.1.s8 %v406_v47  ;;  %v475_v51 = vunpack.c.0.s8 %v407_v48 }
  0x77   : > { %1107 = vmatmul.bf16.gmra.mxu2 %v730_v25  ;;  %v566_v25 = vcvt.s32.f32 %v438_v17  ;;  %v564_v17 = vcvt.s32.f32 %v436_v4  ;;  %v698_v59 = vpack.c.bf16 %v590_v56, %v586_v55  ;;  %v479_v52 = vunpack.c.1.s8 %v407_v48 }
  0x78   : > { %1196 = vmatmul.bf16.gmra.mxu3 %v731_v26  ;;  %v563_v26 = vcvt.s32.f32 %v435_v18  ;;  %v568_v18 = vcvt.s32.f32 %v440_v5  ;;  %1628 = vperm.xlu2 %2937, %v1514_v44   ;;  %v452_v5 = vunpack.c.2.s8 %v400_v33 }
  0x79   : > { %v686_v28 = vpack.c.bf16 %v566_v25, %v562_v24  ;;  %v583_v24 = vcvt.s32.f32 %v455_v16  ;;  %v694_v25 = vpack.c.bf16 %v582_v22, %v578_v21  ;;  %v467_v16 = vunpack.c.2.s8 %v403_v46 }
  0x7a   : > { %v687_v29 = vpack.c.bf16 %v567_v27, %v563_v26  ;;  %v594_v22 = vcvt.s32.f32 %v466_v14  ;;  %v2760_v14 = vld [vmem:[#allocation7 + $0x10] sm:$0xff] }
  0x7b   : > { %1052 = vmatmul.bf16.gmra.mxu0 %v686_v28  ;;  %v695_v26 = vpack.c.bf16 %v583_v24, %v579_v23  ;;  %v598_v23 = vcvt.s32.f32 %v470_v15  ;;  %v595_v24 = vcvt.s32.f32 %v467_v16  ;;  %v2752_v15 = vld [vmem:[#allocation5 + $0x10] sm:$0xff]  ;;  %v482_v16 = vunpack.c.2.s8 %v406_v47 }
  0x7c   : > { %1141 = vmatmul.bf16.gmra.mxu1 %v687_v29 }
  0x7e   : > { %1683 = vperm.xlu1 %2936, %v1525_v12   ;;  %v2754_v12 = vld [vmem:[#allocation5 + $0x20] sm:$0xff] }
  0x87   : > { %1112 = vmatmul.bf16.gmra.mxu2 %v734_v41  ;;  %v2765_v41 = vld [vmem:[#allocation7 + $0x38] sm:$0xff] }
  0x88   : > { %1201 = vmatmul.bf16.gmra.mxu3 %v735_v42  ;;  %v2757_v42 = vld [vmem:[#allocation5 + $0x38] sm:$0xff]  ;;  %1947 = vmatpush.bf16.msrb.mxu0 %v2765_v41 }
  0x89   : > { %2084 = vmatpush.bf16.msrb.mxu1 %v2757_v42  ;;  %v2763_v42 = vld [vmem:[#allocation7 + $0x28] sm:$0xff] }
  0x8b   : > { %1057 = vmatmul.bf16.gmra.mxu0 %v690_v60  ;;  %v699_v60 = vpack.c.bf16 %v591_v58, %v587_v57  ;;  %v602_v57 = vcvt.s32.f32 %v474_v49  ;;  %v606_v58 = vcvt.s32.f32 %v478_v50  ;;  %v2751_v49 = vld [vmem:[#allocation5 + $0x8] sm:$0xff] }
  0x8c   : > { %1146 = vmatmul.bf16.gmra.mxu1 %v691_v61  ;;  %1948 = vmatpush.bf16.msrb.mxu0 %v2764_v9  ;;  %v457_v9 = vunpack.c.3.s8 %v401_v34 }
  0x8d   : > { %2085 = vmatpush.bf16.msrb.mxu1 %v2756_v10 }
  0x8e   : > { %v585_v21 = vcvt.s32.f32 %v457_v9 }
  0x90   : > { %1949 = vmatpush.bf16.msrb.mxu0 %v2763_v42 }
  0x91   : > { %2086 = vmatpush.bf16.msrb.mxu1 %v2755_v43 }
  0x94   : > { %1950 = vmatpush.bf16.msrb.mxu0 %v2762_v11 }
  0x95   : > { %2087 = vmatpush.bf16.msrb.mxu1 %v2754_v12 }
  0x97   : > { %1117 = vmatmul.bf16.gmra.mxu2 %v738_v7  ;;  %v441_v7 = vunpack.c.3.s8 %v397_v36 }
  0x98   : > { %1206 = vmatmul.bf16.gmra.mxu3 %v739_v8  ;;  %1951 = vmatpush.bf16.msrb.mxu0 %v2761_v45 }
  0x99   : > { %v569_v20 = vcvt.s32.f32 %v441_v7  ;;  %v453_v7 = vunpack.c.2.s8 %v401_v34  ;;  %v1523_v34 = vld [vmem:[%s3181_s11 + $0xe8] sm:$0xff] }
  0x9b   : > { %1062 = vmatmul.bf16.gmra.mxu0 %v694_v25 }
  0x9c   : > { %1151 = vmatmul.bf16.gmra.mxu1 %v695_v26  ;;  %v702_v26 = vpack.c.bf16 %v598_v23, %v594_v22  ;;  %1952 = vmatpush.bf16.msrb.mxu0 %v2760_v14 }
  0xa7   : > { %1122 = vmatmul.bf16.gmra.mxu2 %v742_v30  ;;  %v688_v30 = vpack.c.bf16 %v568_v18, %v564_v17  ;;  %v471_v17 = vunpack.c.3.s8 %v403_v46  ;;  %v580_v18 = vcvt.s32.f32 %v452_v5  ;;  %v2753_v46 = vld [vmem:[#allocation5 + $0x18] sm:$0xff] }
  0xa8   : > { %1211 = vmatmul.bf16.gmra.mxu3 %v743_v31  ;;  %v689_v31 = vpack.c.bf16 %v569_v20, %v565_v19  ;;  %v584_v19 = vcvt.s32.f32 %v456_v6  ;;  %v581_v20 = vcvt.s32.f32 %v453_v7  ;;  %2088 = vmatpush.bf16.msrb.mxu1 %v2753_v46 }
  0xa9   : > { %v599_v25 = vcvt.s32.f32 %v471_v17  ;;  %v486_v17 = vunpack.c.3.s8 %v406_v47 }
  0xaa   : > { %v696_v32 = vpack.c.bf16 %v584_v19, %v580_v18  ;;  %v697_v33 = vpack.c.bf16 %v585_v21, %v581_v20  ;;  %v483_v18 = vunpack.c.2.s8 %v407_v48  ;;  %v487_v19 = vunpack.c.3.s8 %v407_v48  ;;  %v2759_v48 = vld [vmem:[#allocation7 + $0x8] sm:$0xff] }
  0xab   : > { %1067 = vmatmul.bf16.gmra.mxu0 %v698_v59  ;;  %v603_v59 = vcvt.s32.f32 %v475_v51 }
  0xac   : > { %1156 = vmatmul.bf16.gmra.mxu1 %v699_v60  ;;  %v607_v60 = vcvt.s32.f32 %v479_v52  ;;  %1953 = vmatpush.bf16.msrb.mxu0 %v2759_v48 }
  0xad   : > { %2089 = vmatpush.bf16.msrb.mxu1 %v2752_v15  ;;  %v2750_v15 = vld [vmem:[#allocation5] sm:$0xff] }
  0xb1   : > { %2090 = vmatpush.bf16.msrb.mxu1 %v2751_v49 }
  0xb5   : > { %2091 = vmatpush.bf16.msrb.mxu1 %v2750_v15 }
  0xb7   : > { %1225 = vmatmul.bf16.vlgmr.msrb.gmra.mxu2 %v684_v62 }
  0xb8   : > { %1314 = vmatmul.bf16.vlgmr.msrb.gmra.mxu3 %v685_v63 }
  0xba   : > { %v1088_v2 = vpop.f32.mrf.mxu2 }
  0xbb   : > { %v1177_v3 = vpop.f32.mrf.mxu3  ;;  %1072 = vmatmul.bf16.gmra.mxu0 %v702_v26  ;;  %v611_v26 = vcvt.s32.f32 %v483_v18  ;;  %v2734_v18 = vld [vmem:[%s3268_s21] sm:$0xff] }
  0xbc   : > { %v3218_v8 = vadd.f32 %v1177_v3, %v1088_v2  ;;  %v1517_v2 = vld [vmem:[%s3181_s11 + $0xb8] sm:$0xff] }
  0xbd   : > { %1643 = vperm.xlu2 %2937, %v1517_v2  }
  0xc2   : > { %v1090_v27 = vpop.f32.mrf.mxu2 }
  0xc3   : > { %v1179_v28 = vpop.f32.mrf.mxu3 }
  0xc4   : > { %v3222_v29 = vadd.f32 %v1179_v28, %v1090_v27  ;;  %v703_v27 = vpack.c.bf16 %v599_v25, %v595_v24  ;;  %v610_v24 = vcvt.s32.f32 %v482_v16  ;;  %v614_v25 = vcvt.s32.f32 %v486_v17 }
  0xc5   : > { %1658 = vperm.xlu2 %2937, %v1520_v13  }
  0xc6   : > { %1161 = vmatmul.bf16.gmra.mxu1 %v703_v27  ;;  %v615_v27 = vcvt.s32.f32 %v487_v19 }
  0xc7   : > { %1230 = vmatmul.bf16.gmra.mxu2 %v688_v30 }
  0xc8   : > { %1319 = vmatmul.bf16.gmra.mxu3 %v689_v31 }
  0xca   : > { %v1093_v35 = vpop.f32.mrf.mxu2  ;;  %v3257_v50 = vpop.f32.mrf.mxu0 }
  0xcb   : > { %v1182_v36 = vpop.f32.mrf.mxu3 }
  0xcc   : > { %v3227_v41 = vadd.f32 %v1182_v36, %v1093_v35  ;;  %v404_v35 = vld [vmem:[%s3168_s29 + $0x50] sm:$0xff]  ;;  %v405_v36 = vld [vmem:[%s3168_s29 + $0x58] sm:$0xff] }
  0xcd   : > { %1673 = vperm.xlu2 %2937, %v1523_v34   ;;  %v460_v39 = vunpack.c.0.s8 %v404_v35  ;;  %v464_v40 = vunpack.c.1.s8 %v404_v35  ;;  %v461_v42 = vunpack.c.0.s8 %v405_v36  ;;  %v465_v43 = vunpack.c.1.s8 %v405_v36 }
  0xce   : > { %v468_v7 = vunpack.c.2.s8 %v404_v35  ;;  %v472_v9 = vunpack.c.3.s8 %v404_v35  ;;  %v469_v11 = vunpack.c.2.s8 %v405_v36  ;;  %v473_v12 = vunpack.c.3.s8 %v405_v36 }
  0xcf   : > { %v588_v53 = vcvt.s32.f32 %v460_v39  ;;  %v592_v54 = vcvt.s32.f32 %v464_v40  ;;  %v589_v55 = vcvt.s32.f32 %v461_v42  ;;  %v593_v56 = vcvt.s32.f32 %v465_v43 }
  0xd0   : > { %v596_v20 = vcvt.s32.f32 %v468_v7  ;;  %v600_v21 = vcvt.s32.f32 %v472_v9  ;;  %v597_v22 = vcvt.s32.f32 %v469_v11  ;;  %v601_v23 = vcvt.s32.f32 %v473_v12  ;;  %v2758_v7 = vld [vmem:[#allocation7] sm:$0xff] }
  0xd1   : > { %1954 = vmatpush.bf16.msrb.mxu0 %v2758_v7 }
  0xd2   : > { %v1095_v61 = vpop.f32.mrf.mxu2  ;;  %v704_v35 = vpack.c.bf16 %v600_v21, %v596_v20  ;;  %v705_v36 = vpack.c.bf16 %v601_v23, %v597_v22 }
  0xd3   : > { %v1184_v62 = vpop.f32.mrf.mxu3 }
  0xd4   : > { %v3232_v63 = vadd.f32 %v1184_v62, %v1095_v61  ;;  %v706_v61 = vpack.c.bf16 %v606_v58, %v602_v57  ;;  %v707_v62 = vpack.c.bf16 %v607_v60, %v603_v59  ;;  %v1137_v60 = vpop.f32.mrf.mxu1 }
  0xd6   : > { %1077 = vmatmul.bf16.gmra.mxu0 %v706_v61  ;;  %1166 = vmatmul.bf16.gmra.mxu1 %v707_v62  ;;  %v3262_v61 = vpop.f32.mrf.mxu0 }
  0xd7   : > { %1235 = vmatmul.bf16.gmra.mxu2 %v692_v0 }
  0xd8   : > { %1324 = vmatmul.bf16.gmra.mxu3 %v693_v1 }
  0xda   : > { %v1098_v3 = vpop.f32.mrf.mxu2 }
  0xdb   : > { %v1187_v4 = vpop.f32.mrf.mxu3 }
  0xdc   : > { %v3235_v10 = vadd.f32 %v1187_v4, %v1098_v3  ;;  %v700_v3 = vpack.c.bf16 %v592_v54, %v588_v53  ;;  %v701_v4 = vpack.c.bf16 %v593_v56, %v589_v55  ;;  %v1139_v16 = vpop.f32.mrf.mxu1 }
  0xe2   : > { %v1100_v28 = vpop.f32.mrf.mxu2 }
  0xe3   : > { %v1189_v30 = vpop.f32.mrf.mxu3 }
  0xe4   : > { %v3238_v31 = vadd.f32 %v1189_v30, %v1100_v28  ;;  %v710_v28 = vpack.c.bf16 %v614_v25, %v610_v24  ;;  %v711_v30 = vpack.c.bf16 %v615_v27, %v611_v26  ;;  %v412_v24 = vld [vmem:[%s3168_s29 + $0x90] sm:$0xff]  ;;  %v413_v25 = vld [vmem:[%s3168_s29 + $0x98] sm:$0xff] }
  0xe6   : > { %1082 = vmatmul.bf16.gmra.mxu0 %v710_v28  ;;  %1171 = vmatmul.bf16.gmra.mxu1 %v711_v30  ;;  %v492_v30 = vunpack.c.0.s8 %v412_v24 }
  0xe7   : > { %1240 = vmatmul.bf16.gmra.mxu2 %v696_v32 }
  0xe8   : > { %1329 = vmatmul.bf16.gmra.mxu3 %v697_v33 }
  0xea   : > { %v1103_v37 = vpop.f32.mrf.mxu2 }
  0xeb   : > { %v1192_v38 = vpop.f32.mrf.mxu3 }
  0xec   : > { %v3243_v44 = vadd.f32 %v1192_v38, %v1103_v37  ;;  %v408_v37 = vld [vmem:[%s3168_s29 + $0x70] sm:$0xff]  ;;  %v409_v38 = vld [vmem:[%s3168_s29 + $0x78] sm:$0xff] }
  0xed   : > { %v476_v42 = vunpack.c.0.s8 %v408_v37  ;;  %v480_v45 = vunpack.c.1.s8 %v408_v37  ;;  %v477_v46 = vunpack.c.0.s8 %v409_v38  ;;  %v481_v47 = vunpack.c.1.s8 %v409_v38 }
  0xef   : > { %v604_v51 = vcvt.s32.f32 %v476_v42  ;;  %v608_v52 = vcvt.s32.f32 %v480_v45  ;;  %v605_v53 = vcvt.s32.f32 %v477_v46  ;;  %v609_v54 = vcvt.s32.f32 %v481_v47  ;;  %v2735_v46 = vld [vmem:[%s3268_s21 + $0x8] sm:$0xff] }
  0xf1   : > { %v708_v58 = vpack.c.bf16 %v608_v52, %v604_v51  ;;  %v709_v59 = vpack.c.bf16 %v609_v54, %v605_v53 }
  0xf2   : > { %v1105_v0 = vpop.f32.mrf.mxu2 }
  0xf3   : > { %v1194_v1 = vpop.f32.mrf.mxu3 }
  0xf4   : > { %v3247_v2 = vadd.f32 %v1194_v1, %v1105_v0  ;;  %v484_v1 = vunpack.c.2.s8 %v408_v37 }
  0xf6   : > { %v612_v9 = vcvt.s32.f32 %v484_v1  ;;  %1955 = vmatmul.bf16.vlgmr.msrb.gmra.mxu0 %v2734_v18  ;;  %v505_v1 = vunpack.c.3.s8 %v413_v25  ;;  %v2736_v18 = vld [vmem:[%s3268_s21 + $0x10] sm:$0xff] }
  0xf7   : > { %1245 = vmatmul.bf16.gmra.mxu2 %v700_v3 }
  0xf8   : > { %1334 = vmatmul.bf16.gmra.mxu3 %v701_v4  ;;  %v488_v4 = vunpack.c.3.s8 %v408_v37  ;;  %v3266_v17 = vpop.f32.mrf.mxu0 }
  0xf9   : > { %v1142_v37 = vpop.f32.mrf.mxu1 }
  0xfa   : > { %v1108_v5 = vpop.f32.mrf.mxu2  ;;  %v616_v11 = vcvt.s32.f32 %v488_v4  ;;  %v1529_v4 = vpop.permute.xlu0 %1528 }
  0xfb   : > { %v1197_v6 = vpop.f32.mrf.mxu3 }
  0xfc   : > { %v3249_v13 = vadd.f32 %v1197_v6, %v1108_v5  ;;  %v485_v5 = vunpack.c.2.s8 %v409_v38  ;;  %v489_v6 = vunpack.c.3.s8 %v409_v38  ;;  %v712_v22 = vpack.c.bf16 %v616_v11, %v612_v9 }
  0xfd   : > { %v620_v38 = vcvt.s32.f32 %v492_v30  ;;  %v633_v11 = vcvt.s32.f32 %v505_v1  ;;  %v416_v30 = vld [vmem:[%s3168_s29 + $0xb0] sm:$0xff] }
  0xfe   : > { %v613_v12 = vcvt.s32.f32 %v485_v5  ;;  %v617_v14 = vcvt.s32.f32 %v489_v6 }
 0x100   : > { %v713_v23 = vpack.c.bf16 %v617_v14, %v613_v12  ;;  %v3275_v26 = vpop.f32.mrf.mxu0  ;;  %v1140_v14 = vadd.f32 %v1139_v16, %v3262_v61  ;;  %v417_v61 = vld [vmem:[%s3168_s29 + $0xb8] sm:$0xff] }
 0x101   : > { %v1144_v53 = vpop.f32.mrf.mxu1 }
 0x102   : > { %v1110_v32 = vpop.f32.mrf.mxu2 }
 0x103   : > { %v1199_v33 = vpop.f32.mrf.mxu3 }
 0x104   : > { %v3251_v34 = vadd.f32 %v1199_v33, %v1110_v32  ;;  %v496_v33 = vunpack.c.1.s8 %v412_v24 }
 0x106   : > { %1960 = vmatmul.bf16.gmra.mxu0 %v2735_v46  ;;  %v509_v46 = vunpack.c.0.s8 %v417_v61 }
 0x107   : > { %1250 = vmatmul.bf16.gmra.mxu2 %v704_v35  ;;  %v493_v35 = vunpack.c.0.s8 %v413_v25 }
 0x108   : > { %1339 = vmatmul.bf16.gmra.mxu3 %v705_v36  ;;  %v497_v36 = vunpack.c.1.s8 %v413_v25  ;;  %v3279_v45 = vpop.f32.mrf.mxu0 }
 0x109   : > { %v1147_v12 = vpop.f32.mrf.mxu1 }
 0x10a   : > { %v1113_v39 = vpop.f32.mrf.mxu2  ;;  %v625_v42 = vcvt.s32.f32 %v497_v36 }
 0x10b   : > { %v1202_v40 = vpop.f32.mrf.mxu3 }
 0x10c   : > { %v3255_v43 = vadd.f32 %v1202_v40, %v1113_v39  ;;  %v624_v39 = vcvt.s32.f32 %v496_v33  ;;  %v621_v40 = vcvt.s32.f32 %v493_v35 }
 0x10e   : > { %v716_v51 = vpack.c.bf16 %v624_v39, %v620_v38  ;;  %v717_v52 = vpack.c.bf16 %v625_v42, %v621_v40  ;;  %v508_v39 = vunpack.c.0.s8 %v416_v30  ;;  %v1143_v40 = vadd.f32 %v1142_v37, %v3266_v17 }
 0x10f   : > { %v512_v42 = vunpack.c.1.s8 %v416_v30 }
 0x110   : > { %v3284_v54 = vpop.f32.mrf.mxu0 }
 0x111   : > { %v1149_v33 = vpop.f32.mrf.mxu1 }
 0x112   : > { %v1115_v55 = vpop.f32.mrf.mxu2 }
 0x113   : > { %v1204_v56 = vpop.f32.mrf.mxu3 }
 0x114   : > { %v3259_v57 = vadd.f32 %v1204_v56, %v1115_v55 }
 0x116   : > { %1965 = vmatmul.bf16.gmra.mxu0 %v2736_v18 }
 0x117   : > { %1255 = vmatmul.bf16.gmra.mxu2 %v708_v58  ;;  %v500_v58 = vunpack.c.2.s8 %v412_v24 }
 0x118   : > { %1344 = vmatmul.bf16.gmra.mxu3 %v709_v59  ;;  %v1138_v59 = vadd.f32 %v1137_v60, %v3257_v50  ;;  %v3288_v15 = vpop.f32.mrf.mxu0 }
 0x119   : > { %v628_v5 = vcvt.s32.f32 %v500_v58 }
 0x11a   : > { %v1118_v62 = vpop.f32.mrf.mxu2 }
 0x11b   : > { %v1207_v0 = vpop.f32.mrf.mxu3 }
 0x11c   : > { %v3264_v3 = vadd.f32 %v1207_v0, %v1118_v62  ;;  %v504_v62 = vunpack.c.3.s8 %v412_v24  ;;  %v501_v0 = vunpack.c.2.s8 %v413_v25  ;;  %v1534_v25 = vpop.permute.xlu0 %1533 }
 0x11e   : > { %v632_v7 = vcvt.s32.f32 %v504_v62  ;;  %v629_v9 = vcvt.s32.f32 %v501_v0  ;;  %v2737_v0 = vld [vmem:[%s3268_s21 + $0x18] sm:$0xff] }
 0x120   : > { %v3293_v35 = vpop.f32.mrf.mxu0 }
 0x122   : > { %v1120_v19 = vpop.f32.mrf.mxu2 }
 0x123   : > { %v1209_v20 = vpop.f32.mrf.mxu3 }
 0x124   : > { %v3271_v21 = vadd.f32 %v1209_v20, %v1120_v19 }
 0x126   : > { %1970 = vmatmul.bf16.gmra.mxu0 %v2737_v0 }
 0x127   : > { %1260 = vmatmul.bf16.gmra.mxu2 %v712_v22  ;;  %v720_v22 = vpack.c.bf16 %v632_v7, %v628_v5  ;;  %v1152_v7 = vpop.f32.mrf.mxu1 }
 0x128   : > { %1349 = vmatmul.bf16.gmra.mxu3 %v713_v23  ;;  %v721_v23 = vpack.c.bf16 %v633_v11, %v629_v9  ;;  %v3297_v62 = vpop.f32.mrf.mxu0 }
 0x12a   : > { %v1123_v27 = vpop.f32.mrf.mxu2 }
 0x12b   : > { %v1212_v28 = vpop.f32.mrf.mxu3 }
 0x12c   : > { %v3277_v32 = vadd.f32 %v1212_v28, %v1123_v27 }
 0x132   : > { %v1125_v47 = vpop.f32.mrf.mxu2 }
 0x133   : > { %v1214_v48 = vpop.f32.mrf.mxu3 }
 0x134   : > { %v3282_v49 = vadd.f32 %v1214_v48, %v1125_v47  ;;  %v513_v47 = vunpack.c.1.s8 %v417_v61  ;;  %v1539_v48 = vpop.permute.xlu1 %1538 }
 0x136   : > { %v641_v58 = vcvt.s32.f32 %v513_v47 }
 0x137   : > { %1265 = vmatmul.bf16.gmra.mxu2 %v716_v51  ;;  %v636_v51 = vcvt.s32.f32 %v508_v39 }
 0x138   : > { %1354 = vmatmul.bf16.gmra.mxu3 %v717_v52 }
 0x13a   : > { %v1226_v55 = vpop.f32.mrf.mxu2 }
 0x13b   : > { %v1315_v56 = vpop.f32.mrf.mxu3  ;;  %v1227_v6 = vadd.f32 %v1226_v55, %v1138_v59  ;;  %v640_v55 = vcvt.s32.f32 %v512_v42  ;;  %v1145_v59 = vadd.f32 %v1144_v53, %v3275_v26  ;;  %v516_v53 = vunpack.c.2.s8 %v416_v30  ;;  %v2738_v42 = vld [vmem:[%s3268_s21 + $0x20] sm:$0xff] }
 0x13c   : > { %v1544_v11 = vpop.permute.xlu1 %1543  ;;  %1975 = vmatmul.bf16.gmra.mxu0 %v2738_v42 }
 0x13d   : > { %v1316_v50 = vadd.f32 %v1315_v56, %v1227_v6  ;;  %v637_v56 = vcvt.s32.f32 %v509_v46  ;;  %v724_v17 = vpack.c.bf16 %v640_v55, %v636_v51 }
 0x13f   : > { %v1686_v27 = vmul.f32 %v1529_v4, %v1316_v50  ;;  %v725_v37 = vpack.c.bf16 %v641_v58, %v637_v56  ;;  %v1148_v50 = vadd.f32 %v1147_v12, %v3279_v45 }
 0x142   : > { %v1228_v19 = vpop.f32.mrf.mxu2 }
 0x143   : > { %v1317_v20 = vpop.f32.mrf.mxu3  ;;  %v1229_v60 = vadd.f32 %v1228_v19, %v1140_v14 }
 0x145   : > { %v1318_v24 = vadd.f32 %v1317_v20, %v1229_v60  ;;  %v520_v60 = vunpack.c.3.s8 %v416_v30 }
 0x147   : > { %v1687_v28 = vmul.f32 %v1534_v25, %v1318_v24  ;;  %1270 = vmatmul.bf16.gmra.mxu2 %v720_v22  ;;  %v517_v22 = vunpack.c.2.s8 %v417_v61  ;;  %v3301_v24 = vpop.f32.mrf.mxu0  ;;  %v1549_v25 = vpop.permute.xlu2 %1548 }
 0x148   : > { %1359 = vmatmul.bf16.gmra.mxu3 %v721_v23  ;;  %v521_v23 = vunpack.c.3.s8 %v417_v61 }
 0x149   : > { %v1718_v16 = vpack.c.bf16 %v1687_v28, %v1686_v27  ;;  %v1154_v27 = vpop.f32.mrf.mxu1  ;;  %v644_v28 = vcvt.s32.f32 %v516_v53 }
 0x14a   : > { %v1231_v36 = vpop.f32.mrf.mxu2  ;;  %v649_v39 = vcvt.s32.f32 %v521_v23 }
 0x14b   : > { %v1320_v38 = vpop.f32.mrf.mxu3  ;;  %2092 = vmatmul.bf16.vlgmr.msrb.gmra.mxu1 %v1718_v16  ;;  %v1232_v52 = vadd.f32 %v1231_v36, %v1143_v40  ;;  %v648_v36 = vcvt.s32.f32 %v520_v60  ;;  %v1150_v40 = vadd.f32 %v1149_v33, %v3284_v54  ;;  %v420_v54 = vld [vmem:[%s3168_s29 + $0xd0] sm:$0xff]  ;;  %v421_v33 = vld [vmem:[%s3168_s29 + $0xd8] sm:$0xff] }
 0x14d   : > { %v1321_v5 = vadd.f32 %v1320_v38, %v1232_v52  ;;  %v645_v38 = vcvt.s32.f32 %v517_v22  ;;  %v728_v47 = vpack.c.bf16 %v648_v36, %v644_v28  ;;  %v1564_v36 = vpop.permute.xlu1 %1563 }
 0x14f   : > { %v1688_v14 = vmul.f32 %v1539_v48, %v1321_v5  ;;  %v729_v61 = vpack.c.bf16 %v649_v39, %v645_v38  ;;  %v3305_v51 = vpop.f32.mrf.mxu0  ;;  %v1554_v52 = vpop.permute.xlu2 %1553  ;;  %v1153_v5 = vadd.f32 %v1152_v7, %v3288_v15 }
 0x151   : > { %v1157_v58 = vpop.f32.mrf.mxu1 }
 0x152   : > { %v1233_v1 = vpop.f32.mrf.mxu2 }
 0x153   : > { %v1322_v4 = vpop.f32.mrf.mxu3  ;;  %v1234_v6 = vadd.f32 %v1233_v1, %v1145_v59 }
 0x155   : > { %v1323_v9 = vadd.f32 %v1322_v4, %v1234_v6  ;;  %v524_v4 = vunpack.c.0.s8 %v420_v54  ;;  %v528_v6 = vunpack.c.1.s8 %v420_v54 }
 0x157   : > { %1275 = vmatmul.bf16.gmra.mxu2 %v724_v17  ;;  %v1689_v18 = vmul.f32 %v1544_v11, %v1323_v9  ;;  %v525_v17 = vunpack.c.0.s8 %v421_v33  ;;  %v652_v9 = vcvt.s32.f32 %v524_v4 }
 0x158   : > { %1364 = vmatmul.bf16.gmra.mxu3 %v725_v37  ;;  %v529_v37 = vunpack.c.1.s8 %v421_v33 }
 0x159   : > { %v1719_v19 = vpack.c.bf16 %v1689_v18, %v1688_v14  ;;  %v656_v14 = vcvt.s32.f32 %v528_v6  ;;  %v653_v18 = vcvt.s32.f32 %v525_v17  ;;  %v1159_v53 = vpop.f32.mrf.mxu1 }
 0x15a   : > { %v1236_v20 = vpop.f32.mrf.mxu2 }
 0x15b   : > { %v1325_v26 = vpop.f32.mrf.mxu3  ;;  %2097 = vmatmul.bf16.gmra.mxu1 %v1719_v19  ;;  %v1237_v16 = vadd.f32 %v1236_v20, %v1148_v50  ;;  %v657_v19 = vcvt.s32.f32 %v529_v37  ;;  %v3310_v20 = vpop.f32.mrf.mxu0  ;;  %v2739_v50 = vld [vmem:[%s3268_s21 + $0x28] sm:$0xff]  ;;  %v732_v15 = vpack.c.bf16 %v656_v14, %v652_v9 }
 0x15c   : > { %1980 = vmatmul.bf16.gmra.mxu0 %v2739_v50 }
 0x15d   : > { %v1326_v12 = vadd.f32 %v1325_v26, %v1237_v16  ;;  %v1155_v26 = vadd.f32 %v1154_v27, %v3293_v35  ;;  %v733_v7 = vpack.c.bf16 %v657_v19, %v653_v18  ;;  %v1559_v16 = vpop.permute.xlu0 %1558  ;;  %v425_v19 = vld [vmem:[%s3168_s29 + $0xf8] sm:$0xff] }
 0x15f   : > { %v1690_v55 = vmul.f32 %v1549_v25, %v1326_v12 }
 0x161   : > { %v1162_v12 = vpop.f32.mrf.mxu1 }
 0x162   : > { %v1238_v46 = vpop.f32.mrf.mxu2 }
 0x163   : > { %v1327_v45 = vpop.f32.mrf.mxu3  ;;  %v1239_v30 = vadd.f32 %v1238_v46, %v1150_v40  ;;  %v3314_v42 = vpop.f32.mrf.mxu0  ;;  %v532_v46 = vunpack.c.2.s8 %v420_v54 }
 0x165   : > { %v1328_v48 = vadd.f32 %v1327_v45, %v1239_v30  ;;  %v1158_v45 = vadd.f32 %v1157_v58, %v3297_v62  ;;  %v536_v30 = vunpack.c.3.s8 %v420_v54  ;;  %v1574_v9 = vpop.permute.xlu0 %1573 }
 0x167   : > { %1280 = vmatmul.bf16.gmra.mxu2 %v728_v47  ;;  %v1691_v56 = vmul.f32 %v1554_v52, %v1328_v48  ;;  %v533_v47 = vunpack.c.2.s8 %v421_v33  ;;  %v660_v48 = vcvt.s32.f32 %v532_v46 }
 0x168   : > { %1369 = vmatmul.bf16.gmra.mxu3 %v729_v61  ;;  %v537_v61 = vunpack.c.3.s8 %v421_v33 }
 0x169   : > { %v1720_v59 = vpack.c.bf16 %v1691_v56, %v1690_v55  ;;  %v664_v55 = vcvt.s32.f32 %v536_v30  ;;  %v661_v56 = vcvt.s32.f32 %v533_v47  ;;  %v1164_v33 = vpop.f32.mrf.mxu1 }
 0x16a   : > { %v1241_v0 = vpop.f32.mrf.mxu2 }
 0x16b   : > { %v1330_v1 = vpop.f32.mrf.mxu3  ;;  %2102 = vmatmul.bf16.gmra.mxu1 %v1720_v59  ;;  %v1242_v11 = vadd.f32 %v1241_v0, %v1153_v5  ;;  %v665_v59 = vcvt.s32.f32 %v537_v61  ;;  %v1160_v0 = vadd.f32 %v1159_v53, %v3301_v24  ;;  %v736_v62 = vpack.c.bf16 %v664_v55, %v660_v48  ;;  %v1080_v54 = vpop.f32.mrf.mxu0  ;;  %v424_v24 = vld [vmem:[%s3168_s29 + $0xf0] sm:$0xff] }
 0x16c   : > { %v1579_v48 = vpop.permute.xlu1 %1578 }
 0x16d   : > { %v1331_v23 = vadd.f32 %v1330_v1, %v1242_v11  ;;  %v2740_v1 = vld [vmem:[%s3268_s21 + $0x30] sm:$0xff]  ;;  %v737_v58 = vpack.c.bf16 %v665_v59, %v661_v56  ;;  %v1569_v11 = vpop.permute.xlu2 %1568 }
 0x16e   : > { %1985 = vmatmul.bf16.gmra.mxu0 %v2740_v1 }
 0x16f   : > { %v1692_v38 = vmul.f32 %v1559_v16, %v1331_v23  ;;  %v544_v23 = vunpack.c.1.s8 %v424_v24 }
 0x172   : > { %v1243_v60 = vpop.f32.mrf.mxu2 }
 0x173   : > { %v1332_v22 = vpop.f32.mrf.mxu3  ;;  %v1244_v25 = vadd.f32 %v1243_v60, %v1155_v26  ;;  %v540_v60 = vunpack.c.0.s8 %v424_v24 }
 0x175   : > { %v1333_v28 = vadd.f32 %v1332_v22, %v1244_v25  ;;  %v1163_v22 = vadd.f32 %v1162_v12, %v3305_v51  ;;  %v541_v25 = vunpack.c.0.s8 %v425_v19 }
 0x177   : > { %1285 = vmatmul.bf16.gmra.mxu2 %v732_v15  ;;  %v1693_v39 = vmul.f32 %v1564_v36, %v1333_v28  ;;  %v545_v15 = vunpack.c.1.s8 %v425_v19  ;;  %v1083_v28 = vpop.f32.mrf.mxu0  ;;  %v1167_v36 = vpop.f32.mrf.mxu1 }
 0x178   : > { %1374 = vmatmul.bf16.gmra.mxu3 %v733_v7  ;;  %v668_v7 = vcvt.s32.f32 %v540_v60 }
 0x179   : > { %v1721_v40 = vpack.c.bf16 %v1693_v39, %v1692_v38  ;;  %v672_v38 = vcvt.s32.f32 %v544_v23  ;;  %v669_v39 = vcvt.s32.f32 %v541_v25 }
 0x17a   : > { %v1246_v35 = vpop.f32.mrf.mxu2 }
 0x17b   : > { %v1335_v27 = vpop.f32.mrf.mxu3  ;;  %2107 = vmatmul.bf16.gmra.mxu1 %v1721_v40  ;;  %v1247_v52 = vadd.f32 %v1246_v35, %v1158_v45  ;;  %v673_v40 = vcvt.s32.f32 %v545_v15  ;;  %v1165_v35 = vadd.f32 %v1164_v33, %v3310_v20  ;;  %v740_v61 = vpack.c.bf16 %v672_v38, %v668_v7  ;;  %v1589_v7 = vpop.permute.xlu0 %1588 }
 0x17d   : > { %v1336_v6 = vadd.f32 %v1335_v27, %v1247_v52  ;;  %v2741_v27 = vld [vmem:[%s3268_s21 + $0x38] sm:$0xff]  ;;  %v741_v51 = vpack.c.bf16 %v673_v40, %v669_v39  ;;  %v1584_v52 = vpop.permute.xlu2 %1583 }
 0x17e   : > { %1990 = vmatmul.bf16.gmra.mxu0 %v2741_v27 }
 0x17f   : > { %v1694_v14 = vmul.f32 %v1569_v11, %v1336_v6  ;;  %v1085_v59 = vpop.f32.mrf.mxu0  ;;  %v1168_v6 = vadd.f32 %v1167_v36, %v3314_v42 }
 0x182   : > { %v1248_v4 = vpop.f32.mrf.mxu2 }
 0x183   : > { %v1337_v5 = vpop.f32.mrf.mxu3  ;;  %v1249_v17 = vadd.f32 %v1248_v4, %v1160_v0  ;;  %v1169_v0 = vpop.f32.mrf.mxu1 }
 0x185   : > { %v1338_v37 = vadd.f32 %v1337_v5, %v1249_v17  ;;  %v548_v5 = vunpack.c.2.s8 %v424_v24  ;;  %v552_v17 = vunpack.c.3.s8 %v424_v24 }
 0x187   : > { %v1695_v18 = vmul.f32 %v1574_v9, %v1338_v37  ;;  %1290 = vmatmul.bf16.gmra.mxu2 %v736_v62  ;;  %v549_v62 = vunpack.c.2.s8 %v425_v19  ;;  %v676_v37 = vcvt.s32.f32 %v548_v5  ;;  %v680_v9 = vcvt.s32.f32 %v552_v17  ;;  %v2744_v17 = vld [vmem:[%s3268_s21 + $0x50] sm:$0xff] }
 0x188   : > { %1379 = vmatmul.bf16.gmra.mxu3 %v737_v58  ;;  %v553_v58 = vunpack.c.3.s8 %v425_v19  ;;  %v1594_v19 = vpop.permute.xlu1 %1593 }
 0x189   : > { %v1722_v26 = vpack.c.bf16 %v1695_v18, %v1694_v14  ;;  %v677_v11 = vcvt.s32.f32 %v549_v62  ;;  %v3325_v18 = vpop.f32.mrf.mxu0  ;;  %v744_v25 = vpack.c.bf16 %v680_v9, %v676_v37 }
 0x18a   : > { %v1251_v53 = vpop.f32.mrf.mxu2  ;;  %v681_v14 = vcvt.s32.f32 %v553_v58 }
 0x18b   : > { %v1340_v50 = vpop.f32.mrf.mxu3  ;;  %2112 = vmatmul.bf16.gmra.mxu1 %v1722_v26  ;;  %v1252_v16 = vadd.f32 %v1251_v53, %v1163_v22  ;;  %v1170_v26 = vadd.f32 %v1169_v0, %v1080_v54  ;;  %v2742_v53 = vld [vmem:[%s3268_s21 + $0x40] sm:$0xff]  ;;  %v1172_v42 = vpop.f32.mrf.mxu1 }
 0x18c   : > { %v745_v15 = vpack.c.bf16 %v681_v14, %v677_v11 }
 0x18d   : > { %v1341_v30 = vadd.f32 %v1340_v50, %v1252_v16 }
 0x18e   : > { %1995 = vmatmul.bf16.gmra.mxu0 %v2742_v53 }
 0x18f   : > { %v1696_v55 = vmul.f32 %v1579_v48, %v1341_v30 }
 0x190   : > { %v1609_v11 = vpop.permute.xlu1 %1608 }
 0x191   : > { %v1958_v38 = vpop.f32.mrf.mxu0 }
 0x192   : > { %v1253_v46 = vpop.f32.mrf.mxu2 }
 0x193   : > { %v1342_v45 = vpop.f32.mrf.mxu3  ;;  %v1254_v47 = vadd.f32 %v1253_v46, %v1165_v35  ;;  %v1173_v35 = vadd.f32 %v1172_v42, %v1083_v28  ;;  %v1174_v27 = vpop.f32.mrf.mxu1 }
 0x194   : > { %v1175_v30 = vadd.f32 %v1174_v27, %v1085_v59 }
 0x195   : > { %v1343_v12 = vadd.f32 %v1342_v45, %v1254_v47  ;;  %v2743_v47 = vld [vmem:[%s3268_s21 + $0x48] sm:$0xff] }
 0x197   : > { %v1697_v56 = vmul.f32 %v1584_v52, %v1343_v12  ;;  %1295 = vmatmul.bf16.gmra.mxu2 %v740_v61 }
 0x198   : > { %1384 = vmatmul.bf16.gmra.mxu3 %v741_v51 }
 0x199   : > { %v1723_v1 = vpack.c.bf16 %v1697_v56, %v1696_v55  ;;  %v3328_v45 = vpop.f32.mrf.mxu0  ;;  %v1604_v55 = vpop.permute.xlu0 %1603 }
 0x19a   : > { %v1256_v20 = vpop.f32.mrf.mxu2  ;;  %v1599_v56 = vpop.permute.xlu2 %1598 }
 0x19b   : > { %v1345_v4 = vpop.f32.mrf.mxu3  ;;  %2117 = vmatmul.bf16.gmra.mxu1 %v1723_v1  ;;  %v1257_v33 = vadd.f32 %v1256_v20, %v1168_v6 }
 0x19d   : > { %v1346_v22 = vadd.f32 %v1345_v4, %v1257_v33 }
 0x19e   : > { %2000 = vmatmul.bf16.gmra.mxu0 %v2743_v47 }
 0x19f   : > { %v1698_v16 = vmul.f32 %v1589_v7, %v1346_v22 }
 0x1a1   : > { %v1963_v20 = vpop.f32.mrf.mxu0 }
 0x1a2   : > { %v1258_v50 = vpop.f32.mrf.mxu2  ;;  %v1614_v14 = vpop.permute.xlu2 %1613 }
 0x1a3   : > { %v1347_v60 = vpop.f32.mrf.mxu3  ;;  %v1259_v23 = vadd.f32 %v1258_v50, %v1170_v26 }
 0x1a5   : > { %v1348_v24 = vadd.f32 %v1347_v60, %v1259_v23 }
 0x1a7   : > { %v1699_v36 = vmul.f32 %v1594_v19, %v1348_v24  ;;  %1300 = vmatmul.bf16.gmra.mxu2 %v744_v25 }
 0x1a8   : > { %1389 = vmatmul.bf16.gmra.mxu3 %v745_v15 }
 0x1a9   : > { %v1724_v39 = vpack.c.bf16 %v1699_v36, %v1698_v16  ;;  %v3332_v59 = vpop.f32.mrf.mxu0  ;;  %v2745_v16 = vld [vmem:[%s3268_s21 + $0x58] sm:$0xff] }
 0x1aa   : > { %v1261_v54 = vpop.f32.mrf.mxu2 }
 0x1ab   : > { %v1350_v40 = vpop.f32.mrf.mxu3  ;;  %2122 = vmatmul.bf16.gmra.mxu1 %v1724_v39  ;;  %v1262_v46 = vadd.f32 %v1261_v54, %v1173_v35 }
 0x1ad   : > { %v1351_v12 = vadd.f32 %v1350_v40, %v1262_v46 }
 0x1ae   : > { %2005 = vmatmul.bf16.gmra.mxu0 %v2744_v17 }
 0x1af   : > { %v1700_v0 = vmul.f32 %v1599_v56, %v1351_v12 }
 0x1b1   : > { %v3336_v60 = vpop.f32.mrf.mxu0 }
 0x1b2   : > { %v1263_v61 = vpop.f32.mrf.mxu2 }
 0x1b3   : > { %v1352_v51 = vpop.f32.mrf.mxu3  ;;  %v1264_v48 = vadd.f32 %v1263_v61, %v1175_v30  ;;  %v1624_v30 = vpop.permute.xlu1 %1623 }
 0x1b5   : > { %v1353_v52 = vadd.f32 %v1352_v51, %v1264_v48 }
 0x1b7   : > { %v1701_v1 = vmul.f32 %v1604_v55, %v1353_v52 }
 0x1b9   : > { %v1725_v28 = vpack.c.bf16 %v1701_v1, %v1700_v0  ;;  %v3345_v24 = vpop.f32.mrf.mxu0 }
 0x1ba   : > { %v1266_v4 = vpop.f32.mrf.mxu2 }
 0x1bb   : > { %v1355_v5 = vpop.f32.mrf.mxu3  ;;  %2127 = vmatmul.bf16.gmra.mxu1 %v1725_v28  ;;  %v1267_v6 = vadd.f32 %v1266_v4, %v3218_v8 }
 0x1bd   : > { %v1356_v37 = vadd.f32 %v1355_v5, %v1267_v6  ;;  %v2746_v5 = vld [vmem:[%s3268_s21 + $0x60] sm:$0xff] }
 0x1be   : > { %2010 = vmatmul.bf16.gmra.mxu0 %v2745_v16  ;;  %v2747_v16 = vld [vmem:[%s3268_s21 + $0x68] sm:$0xff] }
 0x1bf   : > { %v1702_v26 = vmul.f32 %v1609_v11, %v1356_v37  ;;  %v1629_v11 = vpop.permute.xlu2 %1628 }
 0x1c1   : > { %v3357_v12 = vpop.f32.mrf.mxu0 }
 0x1c2   : > { %v1268_v62 = vpop.f32.mrf.mxu2 }
 0x1c3   : > { %v1357_v58 = vpop.f32.mrf.mxu3  ;;  %v1269_v33 = vadd.f32 %v1268_v62, %v3222_v29  ;;  %v3342_v29 = vld [vmem:[%s3455_s5] ss:$0 sm:$0xff] }
 0x1c5   : > { %v1358_v9 = vadd.f32 %v1357_v58, %v1269_v33 }
 0x1c7   : > { %v1703_v53 = vmul.f32 %v1614_v14, %v1358_v9 }
 0x1c8   : > { %v2093_v50 = vpop.f32.mrf.mxu1 }
 0x1c9   : > { %v1726_v8 = vpack.c.bf16 %v1703_v53, %v1702_v26  ;;  %v2094_v25 = vadd.f32 %v2093_v50, %v3325_v18  ;;  %v3362_v1 = vpop.f32.mrf.mxu0 }
 0x1ca   : > { %v1271_v22 = vpop.f32.mrf.mxu2 }
 0x1cb   : > { %v1360_v23 = vpop.f32.mrf.mxu3  ;;  %2132 = vmatmul.bf16.gmra.mxu1 %v1726_v8  ;;  %v1272_v15 = vadd.f32 %v1271_v22, %v3227_v41  ;;  %v2177_v7 = vadd.f32 %v3342_v29, %v2094_v25  ;;  %v1619_v41 = vpop.permute.xlu0 %1618 }
 0x1cd   : > { %v1361_v54 = vadd.f32 %v1360_v23, %v1272_v15  ;;  %v2209_v35 = vmax.f32 %v2177_v7, 0.0 }
 0x1ce   : > { %2015 = vmatmul.bf16.gmra.mxu0 %v2746_v5 }
 0x1d0   : > { %v2095_v42 = vpop.f32.mrf.mxu1 }
 0x1d1   : > { %v2096_v19 = vadd.f32 %v2095_v42, %v1958_v38  ;;  %v1704_v38 = vmul.f32 %v1619_v41, %v1361_v54  ;;  %v3368_v50 = vpop.f32.mrf.mxu0 }
 0x1d2   : > { %v1273_v36 = vpop.f32.mrf.mxu2 }
 0x1d3   : > { %v1362_v39 = vpop.f32.mrf.mxu3  ;;  %v2178_v18 = vadd.f32 %v3342_v29, %v2096_v19  ;;  %v1274_v40 = vadd.f32 %v1273_v36, %v3232_v63 }
 0x1d5   : > { %v2210_v27 = vmax.f32 %v2178_v18, 0.0  ;;  %v1363_v46 = vadd.f32 %v1362_v39, %v1274_v40 }
 0x1d7   : > { %v2769_v47 = vpack.c.bf16 %v2210_v27, %v2209_v35  ;;  %v1705_v61 = vmul.f32 %v1624_v30, %v1363_v46  ;;  %v1639_v27 = vpop.permute.xlu1 %1638  ;;  %v1644_v46 = vpop.permute.xlu2 %1643 }
 0x1d8   : > { %v2098_v51 = vpop.f32.mrf.mxu1 }
 0x1d9   : > { %2770 = vst [vmem:[%s3355_s20] sm:$0xff] %v2769_v47   ;;  %v1727_v63 = vpack.c.bf16 %v1705_v61, %v1704_v38  ;;  %v2099_v55 = vadd.f32 %v2098_v51, %v3328_v45  ;;  %v3373_v42 = vpop.f32.mrf.mxu0 }
 0x1da   : > { %v1276_v48 = vpop.f32.mrf.mxu2 }
 0x1db   : > { %v1365_v52 = vpop.f32.mrf.mxu3  ;;  %2137 = vmatmul.bf16.gmra.mxu1 %v1727_v63  ;;  %v1277_v56 = vadd.f32 %v1276_v48, %v3235_v10  ;;  %v2179_v28 = vadd.f32 %v3342_v29, %v2099_v55  ;;  %v1634_v10 = vpop.permute.xlu0 %1633 }
 0x1dd   : > { %v1366_v62 = vadd.f32 %v1365_v52, %v1277_v56  ;;  %v2211_v33 = vmax.f32 %v2179_v28, 0.0  ;;  %v2748_v28 = vld [vmem:[%s3268_s21 + $0x70] sm:$0xff] }
 0x1de   : > { %2020 = vmatmul.bf16.gmra.mxu0 %v2747_v16 }
 0x1df   : > { %v1706_v14 = vmul.f32 %v1629_v11, %v1366_v62 }
 0x1e0   : > { %v2100_v0 = vpop.f32.mrf.mxu1 }
 0x1e1   : > { %v2101_v4 = vadd.f32 %v2100_v0, %v1963_v20  ;;  %v3380_v47 = vpop.f32.mrf.mxu0 }
 0x1e2   : > { %v1278_v6 = vpop.f32.mrf.mxu2 }
 0x1e3   : > { %v1367_v17 = vpop.f32.mrf.mxu3  ;;  %v2180_v58 = vadd.f32 %v3342_v29, %v2101_v4  ;;  %v1279_v37 = vadd.f32 %v1278_v6, %v3238_v31 }
 0x1e5   : > { %v2212_v45 = vmax.f32 %v2180_v58, 0.0  ;;  %v1368_v9 = vadd.f32 %v1367_v17, %v1279_v37  ;;  %v1649_v37 = vpop.permute.xlu0 %1648 }
 0x1e7   : > { %v2774_v26 = vpack.c.bf16 %v2212_v45, %v2211_v33  ;;  %v1707_v53 = vmul.f32 %v1634_v10, %v1368_v9  ;;  %v1654_v33 = vpop.permute.xlu1 %1653 }
 0x1e8   : > { %v2103_v20 = vpop.f32.mrf.mxu1 }
 0x1e9   : > { %2846 = vst [vmem:[%s3355_s20 + $0x8] sm:$0xff] %v2774_v26   ;;  %v1728_v8 = vpack.c.bf16 %v1707_v53, %v1706_v14  ;;  %v2104_v31 = vadd.f32 %v2103_v20, %v3332_v59 }
 0x1ea   : > { %v1281_v22 = vpop.f32.mrf.mxu2 }
 0x1eb   : > { %v1370_v23 = vpop.f32.mrf.mxu3  ;;  %2142 = vmatmul.bf16.gmra.mxu1 %v1728_v8  ;;  %v1282_v25 = vadd.f32 %v1281_v22, %v3243_v44  ;;  %v2181_v7 = vadd.f32 %v3342_v29, %v2104_v31  ;;  %v3387_v0 = vpop.f32.mrf.mxu0  ;;  %v2749_v31 = vld [vmem:[%s3268_s21 + $0x78] sm:$0xff] }
 0x1ed   : > { %v1371_v54 = vadd.f32 %v1370_v23, %v1282_v25  ;;  %v2213_v59 = vmax.f32 %v2181_v7, 0.0 }
 0x1ee   : > { %2025 = vmatmul.bf16.gmra.mxu0 %v2748_v28 }
 0x1ef   : > { %v1708_v41 = vmul.f32 %v1639_v27, %v1371_v54 }
 0x1f0   : > { %v2105_v15 = vpop.f32.mrf.mxu1 }
 0x1f1   : > { %v2106_v19 = vadd.f32 %v2105_v15, %v3336_v60 }
 0x1f2   : > { %v1283_v36 = vpop.f32.mrf.mxu2 }
 0x1f3   : > { %v1372_v39 = vpop.f32.mrf.mxu3  ;;  %v2182_v18 = vadd.f32 %v3342_v29, %v2106_v19  ;;  %v1284_v40 = vadd.f32 %v1283_v36, %v3247_v2  ;;  %v1988_v53 = vpop.f32.mrf.mxu0 }
 0x1f5   : > { %v2214_v35 = vmax.f32 %v2182_v18, 0.0  ;;  %v1373_v44 = vadd.f32 %v1372_v39, %v1284_v40  ;;  %v1659_v18 = vpop.permute.xlu2 %1658 }
 0x1f7   : > { %v2779_v30 = vpack.c.bf16 %v2214_v35, %v2213_v59  ;;  %v1709_v38 = vmul.f32 %v1644_v46, %v1373_v44 }
 0x1f8   : > { %v2108_v60 = vpop.f32.mrf.mxu1 }
 0x1f9   : > { %2847 = vst [vmem:[%s3355_s20 + $0x10] sm:$0xff] %v2779_v30   ;;  %v1729_v61 = vpack.c.bf16 %v1709_v38, %v1708_v41  ;;  %v2109_v2 = vadd.f32 %v2108_v60, %v3345_v24 }
 0x1fa   : > { %v1286_v51 = vpop.f32.mrf.mxu2 }
 0x1fb   : > { %v1375_v63 = vpop.f32.mrf.mxu3  ;;  %2147 = vmatmul.bf16.gmra.mxu1 %v1729_v61  ;;  %v1287_v48 = vadd.f32 %v1286_v51, %v3249_v13  ;;  %v2183_v55 = vadd.f32 %v3342_v29, %v2109_v2  ;;  %v1991_v54 = vpop.f32.mrf.mxu0 }
 0x1fd   : > { %v1376_v6 = vadd.f32 %v1375_v63, %v1287_v48  ;;  %v2215_v24 = vmax.f32 %v2183_v55, 0.0 }
 0x1fe   : > { %2030 = vmatmul.bf16.gmra.mxu0 %v2749_v31 }
 0x1ff   : > { %v1710_v45 = vmul.f32 %v1649_v37, %v1376_v6 }
 0x200   : > { %v2110_v52 = vpop.f32.mrf.mxu1 }
 0x201   : > { %v2111_v56 = vadd.f32 %v2110_v52, %v3357_v12 }
 0x202   : > { %v1288_v4 = vpop.f32.mrf.mxu2 }
 0x203   : > { %v1377_v5 = vpop.f32.mrf.mxu3  ;;  %v2184_v17 = vadd.f32 %v3342_v29, %v2111_v56  ;;  %v1289_v62 = vadd.f32 %v1288_v4, %v3251_v34  ;;  %v1993_v30 = vpop.f32.mrf.mxu0 }
 0x204   : > { %v1674_v4 = vpop.permute.xlu2 %1673 }
 0x205   : > { %v2216_v58 = vmax.f32 %v2184_v17, 0.0  ;;  %v1378_v13 = vadd.f32 %v1377_v5, %v1289_v62 }
 0x207   : > { %v2784_v12 = vpack.c.bf16 %v2216_v58, %v2215_v24  ;;  %v1711_v9 = vmul.f32 %v1654_v33, %v1378_v13 }
 0x208   : > { %v2113_v10 = vpop.f32.mrf.mxu1 }
 0x209   : > { %2848 = vst [vmem:[%s3355_s20 + $0x18] sm:$0xff] %v2784_v12   ;;  %v1730_v11 = vpack.c.bf16 %v1711_v9, %v1710_v45  ;;  %v2114_v20 = vadd.f32 %v2113_v10, %v3362_v1 }
 0x20a   : > { %v1291_v14 = vpop.f32.mrf.mxu2 }
 0x20b   : > { %v1380_v26 = vpop.f32.mrf.mxu3  ;;  %2152 = vmatmul.bf16.gmra.mxu1 %v1730_v11  ;;  %v1292_v34 = vadd.f32 %v1291_v14, %v3255_v43  ;;  %v2185_v22 = vadd.f32 %v3342_v29, %v2114_v20  ;;  %v1664_v43 = vpop.permute.xlu0 %1663 }
 0x20c   : > { %v1996_v24 = vpop.f32.mrf.mxu0 }
 0x20d   : > { %v1381_v7 = vadd.f32 %v1380_v26, %v1292_v34  ;;  %v2217_v36 = vmax.f32 %v2185_v22, 0.0 }
 0x20f   : > { %v1712_v40 = vmul.f32 %v1659_v18, %v1381_v7 }
 0x210   : > { %v2115_v8 = vpop.f32.mrf.mxu1 }
 0x211   : > { %v2116_v23 = vadd.f32 %v2115_v8, %v3368_v50 }
 0x212   : > { %v1293_v25 = vpop.f32.mrf.mxu2 }
 0x213   : > { %v1382_v15 = vpop.f32.mrf.mxu3  ;;  %v2186_v19 = vadd.f32 %v3342_v29, %v2116_v23  ;;  %v1294_v16 = vadd.f32 %v1293_v25, %v3259_v57  ;;  %v1679_v22 = vpop.permute.xlu0 %1678 }
 0x214   : > { %v1998_v26 = vpop.f32.mrf.mxu0 }
 0x215   : > { %v2218_v39 = vmax.f32 %v2186_v19, 0.0  ;;  %v1383_v1 = vadd.f32 %v1382_v15, %v1294_v16 }
 0x217   : > { %v2789_v59 = vpack.c.bf16 %v2218_v39, %v2217_v36  ;;  %v1713_v35 = vmul.f32 %v1664_v43, %v1383_v1 }
 0x218   : > { %v2118_v50 = vpop.f32.mrf.mxu1 }
 0x219   : > { %2849 = vst [vmem:[%s3355_s20 + $0x20] sm:$0xff] %v2789_v59   ;;  %v1731_v44 = vpack.c.bf16 %v1713_v35, %v1712_v40  ;;  %v2119_v41 = vadd.f32 %v2118_v50, %v3373_v42  ;;  %v1669_v42 = vpop.permute.xlu1 %1668 }
 0x21a   : > { %v1296_v27 = vpop.f32.mrf.mxu2 }
 0x21b   : > { %v1385_v46 = vpop.f32.mrf.mxu3  ;;  %2157 = vmatmul.bf16.gmra.mxu1 %v1731_v44  ;;  %v1297_v57 = vadd.f32 %v1296_v27, %v3264_v3  ;;  %v2187_v60 = vadd.f32 %v3342_v29, %v2119_v41 }
 0x21c   : > { %v2001_v7 = vpop.f32.mrf.mxu0 }
 0x21d   : > { %v1386_v2 = vadd.f32 %v1385_v46, %v1297_v57  ;;  %v2219_v55 = vmax.f32 %v2187_v60, 0.0 }
 0x21f   : > { %v1714_v3 = vmul.f32 %v1669_v42, %v1386_v2 }
 0x220   : > { %v2120_v38 = vpop.f32.mrf.mxu1 }
 0x221   : > { %v2121_v61 = vadd.f32 %v2120_v38, %v3380_v47 }
 0x222   : > { %v1298_v51 = vpop.f32.mrf.mxu2 }
 0x223   : > { %v1387_v63 = vpop.f32.mrf.mxu3  ;;  %v2188_v48 = vadd.f32 %v3342_v29, %v2121_v61  ;;  %v1299_v52 = vadd.f32 %v1298_v51, %v3271_v21 }
 0x224   : > { %v2003_v40 = vpop.f32.mrf.mxu0 }
 0x225   : > { %v2220_v56 = vmax.f32 %v2188_v48, 0.0  ;;  %v1388_v28 = vadd.f32 %v1387_v63, %v1299_v52 }
 0x227   : > { %v2794_v5 = vpack.c.bf16 %v2220_v56, %v2219_v55  ;;  %v1715_v6 = vmul.f32 %v1674_v4, %v1388_v28 }
 0x228   : > { %v2123_v17 = vpop.f32.mrf.mxu1 }
 0x229   : > { %2850 = vst [vmem:[%s3355_s20 + $0x28] sm:$0xff] %v2794_v5   ;;  %v1732_v62 = vpack.c.bf16 %v1715_v6, %v1714_v3  ;;  %v2124_v13 = vadd.f32 %v2123_v17, %v3387_v0  ;;  %v1684_v0 = vpop.permute.xlu1 %1683 }
 0x22a   : > { %v1301_v47 = vpop.f32.mrf.mxu2 }
 0x22b   : > { %v1390_v58 = vpop.f32.mrf.mxu3  ;;  %2162 = vmatmul.bf16.gmra.mxu1 %v1732_v62  ;;  %v1302_v37 = vadd.f32 %v1301_v47, %v3277_v32  ;;  %v2189_v33 = vadd.f32 %v3342_v29, %v2124_v13 }
 0x22d   : > { %v1391_v9 = vadd.f32 %v1390_v58, %v1302_v37  ;;  %v2221_v20 = vmax.f32 %v2189_v33, 0.0 }
 0x22f   : > { %v1716_v23 = vmul.f32 %v1679_v22, %v1391_v9 }
 0x230   : > { %v2125_v21 = vpop.f32.mrf.mxu1 }
 0x231   : > { %v2126_v45 = vadd.f32 %v2125_v21, %v1988_v53 }
 0x232   : > { %v1303_v12 = vpop.f32.mrf.mxu2 }
 0x233   : > { %v2190_v10 = vadd.f32 %v3342_v29, %v2126_v45  ;;  %v1304_v11 = vadd.f32 %v1303_v12, %v3282_v49  ;;  %v1392_v14 = vpop.f32.mrf.mxu3 }
 0x235   : > { %v2222_v34 = vmax.f32 %v2190_v10, 0.0  ;;  %v1393_v8 = vadd.f32 %v1392_v14, %v1304_v11 }
 0x237   : > { %v2799_v32 = vpack.c.bf16 %v2222_v34, %v2221_v20  ;;  %v1717_v31 = vmul.f32 %v1684_v0, %v1393_v8 }
 0x238   : > { %v2128_v25 = vpop.f32.mrf.mxu1 }
 0x239   : > { %2851 = vst [vmem:[%s3355_s20 + $0x30] sm:$0xff] %v2799_v32   ;;  %v1733_v53 = vpack.c.bf16 %v1717_v31, %v1716_v23  ;;  %v2129_v15 = vadd.f32 %v2128_v25, %v1991_v54  ;;  %v2006_v54 = vpop.f32.mrf.mxu0 }
 0x23b   : > { %2167 = vmatmul.bf16.gmra.mxu1 %v1733_v53  ;;  %v2191_v49 = vadd.f32 %v3342_v29, %v2129_v15 }
 0x23d   : > { %v2223_v39 = vmax.f32 %v2191_v49, 0.0 }
 0x240   : > { %v2130_v19 = vpop.f32.mrf.mxu1 }
 0x241   : > { %v2131_v16 = vadd.f32 %v2130_v19, %v1993_v30  ;;  %v2008_v38 = vpop.f32.mrf.mxu0 }
 0x243   : > { %v2192_v36 = vadd.f32 %v3342_v29, %v2131_v16 }
 0x245   : > { %v2224_v1 = vmax.f32 %v2192_v36, 0.0 }
 0x247   : > { %v2804_v43 = vpack.c.bf16 %v2224_v1, %v2223_v39 }
 0x248   : > { %v2133_v18 = vpop.f32.mrf.mxu1 }
 0x249   : > { %2852 = vst [vmem:[%s3355_s20 + $0x38] sm:$0xff] %v2804_v43   ;;  %v2134_v59 = vadd.f32 %v2133_v18, %v1996_v24  ;;  %v2011_v55 = vpop.f32.mrf.mxu0 }
 0x24b   : > { %v2193_v50 = vadd.f32 %v3342_v29, %v2134_v59 }
 0x24d   : > { %v2225_v46 = vmax.f32 %v2193_v50, 0.0 }
 0x250   : > { %v2135_v35 = vpop.f32.mrf.mxu1 }
 0x251   : > { %v2136_v44 = vadd.f32 %v2135_v35, %v1998_v26  ;;  %v2013_v3 = vpop.f32.mrf.mxu0 }
 0x253   : > { %v2194_v27 = vadd.f32 %v3342_v29, %v2136_v44 }
 0x255   : > { %v2226_v41 = vmax.f32 %v2194_v27, 0.0 }
 0x257   : > { %v2809_v57 = vpack.c.bf16 %v2226_v41, %v2225_v46 }
 0x258   : > { %v2138_v30 = vpop.f32.mrf.mxu1 }
 0x259   : > { %2853 = vst [vmem:[%s3355_s20 + $0x40] sm:$0xff] %v2809_v57   ;;  %v2139_v60 = vadd.f32 %v2138_v30, %v2001_v7  ;;  %v2016_v13 = vpop.f32.mrf.mxu0 }
 0x25b   : > { %v2195_v51 = vadd.f32 %v3342_v29, %v2139_v60 }
 0x25d   : > { %v2227_v48 = vmax.f32 %v2195_v51, 0.0 }
 0x260   : > { %v2140_v61 = vpop.f32.mrf.mxu1 }
 0x261   : > { %v2141_v63 = vadd.f32 %v2140_v61, %v2003_v40  ;;  %v2018_v9 = vpop.f32.mrf.mxu0 }
 0x263   : > { %v2196_v2 = vadd.f32 %v3342_v29, %v2141_v63 }
 0x265   : > { %v2228_v52 = vmax.f32 %v2196_v2, 0.0 }
 0x267   : > { %v2814_v56 = vpack.c.bf16 %v2228_v52, %v2227_v48 }
 0x268   : > { %v2143_v28 = vpop.f32.mrf.mxu1 }
 0x269   : > { %2854 = vst [vmem:[%s3355_s20 + $0x48] sm:$0xff] %v2814_v56   ;;  %v2144_v42 = vadd.f32 %v2143_v28, %v2006_v54  ;;  %v2021_v34 = vpop.f32.mrf.mxu0 }
 0x26b   : > { %v2197_v5 = vadd.f32 %v3342_v29, %v2144_v42 }
 0x26d   : > { %v2229_v62 = vmax.f32 %v2197_v5, 0.0 }
 0x270   : > { %v2145_v4 = vpop.f32.mrf.mxu1 }
 0x271   : > { %v2146_v6 = vadd.f32 %v2145_v4, %v2008_v38  ;;  %v2023_v53 = vpop.f32.mrf.mxu0 }
 0x273   : > { %v2198_v17 = vadd.f32 %v3342_v29, %v2146_v6 }
 0x275   : > { %v2230_v24 = vmax.f32 %v2198_v17, 0.0 }
 0x277   : > { %v2819_v47 = vpack.c.bf16 %v2230_v24, %v2229_v62 }
 0x278   : > { %v2148_v58 = vpop.f32.mrf.mxu1 }
 0x279   : > { %2855 = vst [vmem:[%s3355_s20 + $0x50] sm:$0xff] %v2819_v47   ;;  %v2149_v37 = vadd.f32 %v2148_v58, %v2011_v55  ;;  %v2026_v36 = vpop.f32.mrf.mxu0 }
 0x27b   : > { %v2199_v33 = vadd.f32 %v3342_v29, %v2149_v37 }
 0x27d   : > { %v2231_v10 = vmax.f32 %v2199_v33, 0.0 }
 0x280   : > { %v2150_v21 = vpop.f32.mrf.mxu1 }
 0x281   : > { %v2151_v45 = vadd.f32 %v2150_v21, %v2013_v3  ;;  %v2028_v59 = vpop.f32.mrf.mxu0 }
 0x283   : > { %v2200_v12 = vadd.f32 %v3342_v29, %v2151_v45 }
 0x285   : > { %v2232_v11 = vmax.f32 %v2200_v12, 0.0 }
 0x287   : > { %v2824_v14 = vpack.c.bf16 %v2232_v11, %v2231_v10 }
 0x288   : > { %v2153_v26 = vpop.f32.mrf.mxu1 }
 0x289   : > { %2856 = vst [vmem:[%s3355_s20 + $0x58] sm:$0xff] %v2824_v14   ;;  %v2154_v20 = vadd.f32 %v2153_v26, %v2016_v13  ;;  %v2031_v57 = vpop.f32.mrf.mxu0 }
 0x28b   : > { %v2201_v22 = vadd.f32 %v3342_v29, %v2154_v20 }
 0x28d   : > { %v2233_v32 = vmax.f32 %v2201_v22, 0.0 }
 0x290   : > { %v2155_v8 = vpop.f32.mrf.mxu1 }
 0x291   : > { %v2156_v0 = vadd.f32 %v2155_v8, %v2018_v9  ;;  %v2033_v61 = vpop.f32.mrf.mxu0 }
 0x293   : > { %v2202_v23 = vadd.f32 %v3342_v29, %v2156_v0 }
 0x295   : > { %v2234_v31 = vmax.f32 %v2202_v23, 0.0 }
 0x297   : > { %v2829_v25 = vpack.c.bf16 %v2234_v31, %v2233_v32 }
 0x298   : > { %v2158_v15 = vpop.f32.mrf.mxu1 }
 0x299   : > { %2857 = vst [vmem:[%s3355_s20 + $0x60] sm:$0xff] %v2829_v25   ;;  %v2159_v7 = vadd.f32 %v2158_v15, %v2021_v34 }
 0x29b   : > { %v2203_v49 = vadd.f32 %v3342_v29, %v2159_v7 }
 0x29d   : > { %v2235_v1 = vmax.f32 %v2203_v49, 0.0 }
 0x2a0   : > { %v2160_v19 = vpop.f32.mrf.mxu1 }
 0x2a1   : > { %v2161_v16 = vadd.f32 %v2160_v19, %v2023_v53 }
 0x2a3   : > { %v2204_v39 = vadd.f32 %v3342_v29, %v2161_v16 }
 0x2a5   : > { %v2236_v43 = vmax.f32 %v2204_v39, 0.0 }
 0x2a7   : > { %v2834_v18 = vpack.c.bf16 %v2236_v43, %v2235_v1 }
 0x2a8   : > { %v2163_v40 = vpop.f32.mrf.mxu1 }
 0x2a9   : > { %2858 = vst [vmem:[%s3355_s20 + $0x68] sm:$0xff] %v2834_v18   ;;  %v2164_v35 = vadd.f32 %v2163_v40, %v2026_v36 }
 0x2ab   : > { %v2205_v44 = vadd.f32 %v3342_v29, %v2164_v35 }
 0x2ad   : > { %v2237_v46 = vmax.f32 %v2205_v44, 0.0 }
 0x2b0   : > { %v2165_v50 = vpop.f32.mrf.mxu1 }
 0x2b1   : > { %v2166_v54 = vadd.f32 %v2165_v50, %v2028_v59 }
 0x2b3   : > { %v2206_v27 = vadd.f32 %v3342_v29, %v2166_v54 }
 0x2b5   : > { %v2238_v41 = vmax.f32 %v2206_v27, 0.0 }
 0x2b7   : > { %v2839_v30 = vpack.c.bf16 %v2238_v41, %v2237_v46 }
 0x2b8   : > { %v2168_v38 = vpop.f32.mrf.mxu1 }
 0x2b9   : > { %2859 = vst [vmem:[%s3355_s20 + $0x70] sm:$0xff] %v2839_v30   ;;  %v2169_v60 = vadd.f32 %v2168_v38, %v2031_v57 }
 0x2bb   : > { %v2207_v63 = vadd.f32 %v3342_v29, %v2169_v60 }
 0x2bd   : > { %v2239_v52 = vmax.f32 %v2207_v63, 0.0 }
 0x2c0   : > { %v2170_v51 = vpop.f32.mrf.mxu1 }
 0x2c1   : > { %v2171_v2 = vadd.f32 %v2170_v51, %v2033_v61 }
 0x2c3   : > { %v2208_v48 = vadd.f32 %v3342_v29, %v2171_v2 }
 0x2c5   : > { %v2240_v55 = vmax.f32 %v2208_v48, 0.0 }
 0x2c7   : > { %v2844_v56 = vpack.c.bf16 %v2240_v55, %v2239_v52 }
 0x2c9   : > { %2860 = vst [vmem:[%s3355_s20 + $0x78] sm:$0xff] %v2844_v56  }
 0x2ca PF: > { %s18_s23 = sadd.s32 1, %s3059_s23   ;;  %s3460_s21 = smov %s3055_s22 }
 0x2cb   : > { %p15_p9 = scmp.ge.s32.totalorder %s18_s23, 4   ;;  %s3461_s22 = smov %s3463_s9 }
 0x2cd   :  { %17 = sbr.rel (!%p15_p9) target bundleno = 3 (0x3), region = 100 }
 0x2d2   :  { %2327 = vsyncpa [#allocation4], 1 }
 0x2d3   :  { %2329 = vsyncpa [#allocation4 + $0x1], 1 }
 0x2d4   :  { %2330 = vsyncpa [#allocation6], 1 }

// kernel: encoder_forward.4
= control target key start
LH: loop header
LB: loop body
LE: loop exit
PB: predicated region body
PF: predicated region fallthrough
CT: control target
= control target key end

     0   :  { %s2879_s21 = smov 0   ;;  %s2881_s22 = smov 0   ;;  %s3332_s0 = inlined_call_operand.vmem [shape: s8[512,512], index: 0, kind: input, shape index: {}]   ;;  %s3333_s1 = inlined_call_operand.vmem [shape: bf16[512,128], index: 1, kind: input, shape index: {}]   ;;  %s3334_s2 = inlined_call_operand.vmem [shape: f32[512,1], index: 2, kind: input, shape index: {}]   ;;  %s3335_s3 = inlined_call_operand.vmem [shape: bf16[128,128], index: 3, kind: input, shape index: {}]   ;;  %s3336_s4 = inlined_call_operand.vmem [shape: bf16[128,128], index: 4, kind: input, shape index: {}]   ;;  %s3337_s5 = inlined_call_operand.vmem [shape: f32[1,128], index: 5, kind: input, shape index: {}]   ;;  %s3338_s6 = inlined_call_operand.vmem [shape: bf16[512,128], index: 6, kind: output, shape index: {}]  }
   0x1   :  { %s2883_s23 = smov 0  }
   0x2 LB: > { %s28_s24 = sadd.s32 1, %s2837_s22  ;;  %p2346_p0 = scmp.ge.s32.totalorder %s2841_s23, 1  ;;  %s2841_s23 = sphi %s2883_s23, %s16_s23   ;;  %s2837_s22 = sphi %s2881_s22, %s3340_s22   ;;  %s2833_s21 = sphi %s2879_s21, %s3339_s21  }
   0x3   : > { %p30_p1 = scmp.ge.s32.totalorder %s28_s24, 2  ;;  %p244_p2 = scmp.lt.s32.totalorder %s2841_s23, 3 }
   0x5   : > { %s3342_s24 = smov (%p30_p1, %s28_s24), 0  ;;  %p245_p3 = pnand %p2346_p0, %p244_p2 }
   0x6   : > { %s2347_s29 = sshll.u32 (!%p245_p3), %s2833_s21, 3  ;;  %s2350_s11 = sshll.u32 (!%p245_p3), %s2833_s21, 5 }
   0x7   : > { %248 = sbr.rel (%p245_p3) target bundleno = 703 (0x2bf), region = 44  ;;  %p286_p4 = scmp.lt.s32.totalorder (!%p245_p3), %s2347_s29, 15 }
   0x8   : > { %p297_p5 = scmp.lt.s32.totalorder (!%p245_p3), %s2350_s11, 63  ;;  %s2482_s10 = sshll.u32 (!%p245_p3), %s2833_s21, 8 }
   0x9   : > { %s1685_s12 = sshra.s32 (!%p245_p3), %s2482_s10, 3 }
   0xa   : > { %s2483_s13 = sshll.u32 (!%p245_p3), %s1685_s12, 2 }
   0xb   : > { %s3145_s17 = scalar_lea.vmem (!%p245_p3), %s3333_s1, %s2483_s13 }
   0xc   : > { %v2622_v0 = vld [vmem:[%s3333_s1 + $0x38] sm:$0xff]  ;;  %v2621_v2 = vld [vmem:[%s3333_s1 + $0x30] sm:$0xff]  ;;  %v2620_v4 = vld [vmem:[%s3333_s1 + $0x28] sm:$0xff]  ;;  %s3344_s29 = smov (!%p286_p4, %s2347_s29), 15  ;;  %s3346_s11 = smov (!%p297_p5, %s2350_s11), 63  ;;  %v2843_v61 = vmov 0  }
   0xd   : > { %v2630_v1 = vld [vmem:[%s3333_s1 + $0x78] sm:$0xff]  ;;  %2774 = vmatpush.bf16.msra.mxu2 %v2622_v0  ;;  %v2629_v3 = vld [vmem:[%s3333_s1 + $0x70] sm:$0xff]  ;;  %989 = vmatpush.bf16.msra.mxu0 %v2622_v0  ;;  %v2628_v5 = vld [vmem:[%s3333_s1 + $0x68] sm:$0xff]  ;;  %s2614_s18 = sshll.u32 %s3344_s29, 5  ;;  %s2351_s16 = sshll.u32 %s3346_s11, 3 }
   0xe   : > { %2782 = vmatpush.bf16.msra.mxu3 %v2630_v1  ;;  %1078 = vmatpush.bf16.msra.mxu1 %v2630_v1  ;;  %v2619_v6 = vld [vmem:[%s3333_s1 + $0x20] sm:$0xff]  ;;  %v2618_v8 = vld [vmem:[%s3333_s1 + $0x18] sm:$0xff]  ;;  %s2933_s30 = scalar_lea.vmem %s3332_s0, %s2614_s18  ;;  %v2617_v10 = vld [vmem:[%s3333_s1 + $0x10] sm:$0xff]  ;;  %s2988_s19 = scalar_lea.vmem %s3334_s2, %s2351_s16 }
   0xf   : > { %v2627_v7 = vld [vmem:[%s3333_s1 + $0x60] sm:$0xff]  ;;  %v2626_v9 = vld [vmem:[%s3333_s1 + $0x58] sm:$0xff]  ;;  %v2625_v11 = vld [vmem:[%s3333_s1 + $0x50] sm:$0xff]  ;;  %2815 = vset.pattern.permute.xlu0 %v2843_v61  ;;  %2816 = vset.pattern.permute.xlu1 %v2843_v61  ;;  %s2353_s25 = sshll.u32 %s3346_s11, 2 }
  0x10   : > { %v360_v12 = vld [vmem:[%s2933_s30 + $0x80] sm:$0xff]  ;;  %v361_v13 = vld [vmem:[%s2933_s30 + $0x88] sm:$0xff]  ;;  %v2638_v26 = vld [vmem:[%s3333_s1 + $0xb8] sm:$0xff]  ;;  %2817 = vset.pattern.permute.xlu2 %v2843_v61  ;;  %s3237_s28 = scalar_lea.vmem %s3338_s6, %s2353_s25 }
  0x11   : > { %2775 = vmatpush.bf16.msra.mxu2 %v2621_v2  ;;  %990 = vmatpush.bf16.msra.mxu0 %v2621_v2  ;;  %v440_v14 = vunpack.c.0.s8 %v360_v12  ;;  %v444_v15 = vunpack.c.1.s8 %v360_v12  ;;  %v441_v16 = vunpack.c.0.s8 %v361_v13  ;;  %v445_v17 = vunpack.c.1.s8 %v361_v13  ;;  %v2616_v18 = vld [vmem:[%s3333_s1 + $0x8] sm:$0xff]  ;;  %v2615_v24 = vld [vmem:[%s3333_s1] sm:$0xff]  ;;  %v2646_v27 = vld [vmem:[%s3333_s1 + $0xf8] sm:$0xff] }
  0x12   : > { %2783 = vmatpush.bf16.msra.mxu3 %v2629_v3  ;;  %1079 = vmatpush.bf16.msra.mxu1 %v2629_v3  ;;  %v2624_v19 = vld [vmem:[%s3333_s1 + $0x48] sm:$0xff]  ;;  %v2623_v25 = vld [vmem:[%s3333_s1 + $0x40] sm:$0xff]  ;;  %v2637_v30 = vld [vmem:[%s3333_s1 + $0xb0] sm:$0xff]  ;;  %v448_v34 = vunpack.c.2.s8 %v360_v12  ;;  %v452_v35 = vunpack.c.3.s8 %v360_v12  ;;  %v449_v36 = vunpack.c.2.s8 %v361_v13  ;;  %v453_v37 = vunpack.c.3.s8 %v361_v13 }
  0x13   : > { %v568_v20 = vcvt.s32.f32 %v440_v14  ;;  %v572_v21 = vcvt.s32.f32 %v444_v15  ;;  %v569_v22 = vcvt.s32.f32 %v441_v16  ;;  %v573_v23 = vcvt.s32.f32 %v445_v17  ;;  %v2645_v31 = vld [vmem:[%s3333_s1 + $0xf0] sm:$0xff]  ;;  %v2636_v32 = vld [vmem:[%s3333_s1 + $0xa8] sm:$0xff]  ;;  %v2635_v44 = vld [vmem:[%s3333_s1 + $0xa0] sm:$0xff] }
  0x14   : > { %v2644_v33 = vld [vmem:[%s3333_s1 + $0xe8] sm:$0xff]  ;;  %v576_v38 = vcvt.s32.f32 %v448_v34  ;;  %v580_v39 = vcvt.s32.f32 %v452_v35  ;;  %v577_v40 = vcvt.s32.f32 %v449_v36  ;;  %v581_v41 = vcvt.s32.f32 %v453_v37  ;;  %v2643_v45 = vld [vmem:[%s3333_s1 + $0xe0] sm:$0xff]  ;;  %v2634_v58 = vld [vmem:[%s3333_s1 + $0x98] sm:$0xff] }
  0x15   : > { %2776 = vmatpush.bf16.msra.mxu2 %v2620_v4  ;;  %991 = vmatpush.bf16.msra.mxu0 %v2620_v4  ;;  %v664_v28 = vpack.c.bf16 %v572_v21, %v568_v20  ;;  %v665_v29 = vpack.c.bf16 %v573_v23, %v569_v22  ;;  %v364_v46 = vld [vmem:[%s2933_s30 + $0xa0] sm:$0xff]  ;;  %v365_v47 = vld [vmem:[%s2933_s30 + $0xa8] sm:$0xff]  ;;  %v2642_v59 = vld [vmem:[%s3333_s1 + $0xd8] sm:$0xff] }
  0x16   : > { %2784 = vmatpush.bf16.msra.mxu3 %v2628_v5  ;;  %1080 = vmatpush.bf16.msra.mxu1 %v2628_v5  ;;  %v668_v42 = vpack.c.bf16 %v580_v39, %v576_v38  ;;  %v669_v43 = vpack.c.bf16 %v581_v41, %v577_v40  ;;  %v456_v48 = vunpack.c.0.s8 %v364_v46  ;;  %v460_v49 = vunpack.c.1.s8 %v364_v46  ;;  %v1444_v60 = vld [vmem:[%s2988_s19] sm:$0xff]  ;;  %v369_v13 = vld [vmem:[%s2933_s30 + $0xc8] sm:$0xff]  ;;  %v1450_v14 = vld [vmem:[%s2988_s19 + $0x30] sm:$0xff] }
  0x17   : > { %v457_v50 = vunpack.c.0.s8 %v365_v47  ;;  %v461_v51 = vunpack.c.1.s8 %v365_v47  ;;  %1478 = vperm.xlu0 %2815, %v1444_v60   ;;  %v464_v62 = vunpack.c.2.s8 %v364_v46  ;;  %v468_v63 = vunpack.c.3.s8 %v364_v46  ;;  %v368_v12 = vld [vmem:[%s2933_s30 + $0xc0] sm:$0xff]  ;;  %v1454_v35 = vld [vmem:[%s2988_s19 + $0x50] sm:$0xff]  ;;  %v1459_v40 = vld [vmem:[%s2988_s19 + $0x78] sm:$0xff] }
  0x18   : > { %v584_v52 = vcvt.s32.f32 %v456_v48  ;;  %v588_v53 = vcvt.s32.f32 %v460_v49  ;;  %v465_v0 = vunpack.c.2.s8 %v365_v47  ;;  %v469_v1 = vunpack.c.3.s8 %v365_v47  ;;  %v2639_v46 = vld [vmem:[%s3333_s1 + $0xc0] sm:$0xff]  ;;  %v1457_v47 = vld [vmem:[%s2988_s19 + $0x68] sm:$0xff]  ;;  %v1462_v48 = vld [vmem:[%s2988_s19 + $0x90] sm:$0xff] }
  0x19   : > { %2777 = vmatpush.bf16.msra.mxu2 %v2619_v6  ;;  %992 = vmatpush.bf16.msra.mxu0 %v2619_v6  ;;  %v585_v54 = vcvt.s32.f32 %v457_v50  ;;  %v589_v55 = vcvt.s32.f32 %v461_v51  ;;  %v592_v2 = vcvt.s32.f32 %v464_v62  ;;  %v596_v3 = vcvt.s32.f32 %v468_v63  ;;  %v1445_v6 = vld [vmem:[%s2988_s19 + $0x8] sm:$0xff]  ;;  %v344_v49 = vld [vmem:[%s2933_s30] sm:$0xff] }
  0x1a   : > { %2785 = vmatpush.bf16.msra.mxu3 %v2627_v7  ;;  %1081 = vmatpush.bf16.msra.mxu1 %v2627_v7  ;;  %v672_v56 = vpack.c.bf16 %v588_v53, %v584_v52  ;;  %v593_v4 = vcvt.s32.f32 %v465_v0  ;;  %v597_v5 = vcvt.s32.f32 %v469_v1  ;;  %v472_v15 = vunpack.c.0.s8 %v368_v12  ;;  %v345_v50 = vld [vmem:[%s2933_s30 + $0x8] sm:$0xff]  ;;  %v1460_v1 = vld [vmem:[%s2988_s19 + $0x80] sm:$0xff] }
  0x1b   : > { %v673_v57 = vpack.c.bf16 %v589_v55, %v585_v54  ;;  %v676_v7 = vpack.c.bf16 %v596_v3, %v592_v2  ;;  %v476_v16 = vunpack.c.1.s8 %v368_v12  ;;  %v473_v17 = vunpack.c.0.s8 %v369_v13 }
  0x1c   : > { %v600_v20 = vcvt.s32.f32 %v472_v15  ;;  %v485_v34 = vunpack.c.3.s8 %v369_v13  ;;  %v376_v51 = vunpack.c.0.s8 %v344_v49  ;;  %v380_v52 = vunpack.c.1.s8 %v344_v49  ;;  %v1468_v15 = vld [vmem:[%s2988_s19 + $0xc0] sm:$0xff] }
  0x1d   : > { %2778 = vmatpush.bf16.msra.mxu2 %v2618_v8  ;;  %993 = vmatpush.bf16.msra.mxu0 %v2618_v8  ;;  %v677_v8 = vpack.c.bf16 %v597_v5, %v593_v4  ;;  %v604_v21 = vcvt.s32.f32 %v476_v16  ;;  %v601_v22 = vcvt.s32.f32 %v473_v17  ;;  %v377_v53 = vunpack.c.0.s8 %v345_v50 }
  0x1e   : > { %2786 = vmatpush.bf16.msra.mxu3 %v2626_v9  ;;  %1082 = vmatpush.bf16.msra.mxu1 %v2626_v9  ;;  %v2633_v9 = vld [vmem:[%s3333_s1 + $0x90] sm:$0xff]  ;;  %v613_v39 = vcvt.s32.f32 %v485_v34  ;;  %v381_v54 = vunpack.c.1.s8 %v345_v50  ;;  %v508_v60 = vcvt.s32.f32 %v380_v52  ;;  %v384_v16 = vunpack.c.2.s8 %v344_v49  ;;  %v1471_v34 = vld [vmem:[%s2988_s19 + $0xd8] sm:$0xff] }
  0x1f   : > { %1483 = vperm.xlu0 %2815, %v1445_v6   ;;  %v505_v61 = vcvt.s32.f32 %v377_v53  ;;  %v1465_v6 = vld [vmem:[%s2988_s19 + $0xa8] sm:$0xff]  ;;  %v388_v17 = vunpack.c.3.s8 %v344_v49 }
  0x20   : > { %v509_v62 = vcvt.s32.f32 %v381_v54  ;;  %v349_v49 = vld [vmem:[%s2933_s30 + $0x28] sm:$0xff] }
  0x21   : > { %2779 = vmatpush.bf16.msra.mxu2 %v2617_v10  ;;  %994 = vmatpush.bf16.msra.mxu0 %v2617_v10  ;;  %v2641_v10 = vld [vmem:[%s3333_s1 + $0xd0] sm:$0xff]  ;;  %v393_v52 = vunpack.c.0.s8 %v349_v49  ;;  %v397_v53 = vunpack.c.1.s8 %v349_v49 }
  0x22   : > { %2787 = vmatpush.bf16.msra.mxu3 %v2625_v11  ;;  %1083 = vmatpush.bf16.msra.mxu1 %v2625_v11  ;;  %v1446_v11 = vld [vmem:[%s2988_s19 + $0x10] sm:$0xff]  ;;  %v633_v0 = vpack.c.bf16 %v509_v62, %v505_v61 }
  0x23   : > { %1488 = vperm.xlu1 %2816, %v1446_v11  }
  0x25   : > { %2780 = vmatpush.bf16.msra.mxu2 %v2616_v18  ;;  %995 = vmatpush.bf16.msra.mxu0 %v2616_v18  ;;  %v477_v18 = vunpack.c.1.s8 %v369_v13 }
  0x26   : > { %2788 = vmatpush.bf16.msra.mxu3 %v2624_v19  ;;  %1084 = vmatpush.bf16.msra.mxu1 %v2624_v19  ;;  %v1447_v19 = vld [vmem:[%s2988_s19 + $0x18] sm:$0xff] }
  0x27   : > { %1508 = vperm.xlu0 %2815, %v1450_v14   ;;  %v605_v23 = vcvt.s32.f32 %v477_v18  ;;  %v1463_v14 = vld [vmem:[%s2988_s19 + $0x98] sm:$0xff]  ;;  %v385_v18 = vunpack.c.2.s8 %v345_v50 }
  0x29   : > { %2781 = vmatpush.bf16.msra.mxu2 %v2615_v24  ;;  %996 = vmatpush.bf16.msra.mxu0 %v2615_v24  ;;  %v1453_v24 = vld [vmem:[%s2988_s19 + $0x48] sm:$0xff] }
  0x2a   : > { %2789 = vmatpush.bf16.msra.mxu3 %v2623_v25  ;;  %1085 = vmatpush.bf16.msra.mxu1 %v2623_v25  ;;  %v680_v25 = vpack.c.bf16 %v604_v21, %v600_v20 }
  0x2b   : > { %1493 = vperm.xlu1 %2816, %v1447_v19   ;;  %v389_v19 = vunpack.c.3.s8 %v345_v50 }
  0x2c   : > { %1037 = vmatmul.bf16.vlgmr.msra.gmra.mxu2 %v664_v28  ;;  %v2640_v28 = vld [vmem:[%s3333_s1 + $0xc8] sm:$0xff] }
  0x2d   : > { %1167 = vmatpush.bf16.msrb.mxu2 %v2638_v26  ;;  %1126 = vmatmul.bf16.vlgmr.msra.gmra.mxu3 %v665_v29  ;;  %v681_v26 = vpack.c.bf16 %v605_v23, %v601_v22  ;;  %v1451_v29 = vld [vmem:[%s2988_s19 + $0x38] sm:$0xff] }
  0x2e   : > { %1256 = vmatpush.bf16.msrb.mxu3 %v2646_v27  ;;  %v2632_v27 = vld [vmem:[%s3333_s1 + $0x88] sm:$0xff]  ;;  %1086 = vmatmul.bf16.vlgmr.msra.gmra.mxu1 %v633_v0  ;;  %v1455_v0 = vld [vmem:[%s2988_s19 + $0x58] sm:$0xff] }
  0x2f   : > { %1523 = vperm.xlu0 %2815, %v1453_v24   ;;  %v512_v24 = vcvt.s32.f32 %v384_v16  ;;  %v405_v16 = vunpack.c.3.s8 %v349_v49 }
  0x31   : > { %1168 = vmatpush.bf16.msrb.mxu2 %v2637_v30  ;;  %v1456_v30 = vld [vmem:[%s2988_s19 + $0x60] sm:$0xff] }
  0x32   : > { %1257 = vmatpush.bf16.msrb.mxu3 %v2645_v31  ;;  %v480_v31 = vunpack.c.2.s8 %v368_v12 }
  0x33   : > { %1513 = vperm.xlu1 %2816, %v1451_v29  }
  0x34   : > { %v608_v36 = vcvt.s32.f32 %v480_v31 }
  0x35   : > { %1169 = vmatpush.bf16.msrb.mxu2 %v2636_v32  ;;  %v484_v32 = vunpack.c.3.s8 %v368_v12 }
  0x36   : > { %1258 = vmatpush.bf16.msrb.mxu3 %v2644_v33  ;;  %v481_v33 = vunpack.c.2.s8 %v369_v13  ;;  %v1448_v13 = vld [vmem:[%s2988_s19 + $0x20] sm:$0xff] }
  0x37   : > { %1538 = vperm.xlu0 %2815, %v1456_v30   ;;  %v612_v37 = vcvt.s32.f32 %v484_v32  ;;  %1498 = vperm.xlu2 %2817, %v1448_v13   ;;  %v1449_v32 = vld [vmem:[%s2988_s19 + $0x28] sm:$0xff] }
  0x38   : > { %v609_v38 = vcvt.s32.f32 %v481_v33  ;;  %v1466_v33 = vld [vmem:[%s2988_s19 + $0xb0] sm:$0xff] }
  0x39   : > { %1170 = vmatpush.bf16.msrb.mxu2 %v2635_v44  ;;  %v684_v41 = vpack.c.bf16 %v612_v37, %v608_v36  ;;  %v373_v44 = vld [vmem:[%s2933_s30 + $0xe8] sm:$0xff]  ;;  %v347_v36 = vld [vmem:[%s2933_s30 + $0x18] sm:$0xff] }
  0x3a   : > { %1259 = vmatpush.bf16.msrb.mxu3 %v2643_v45  ;;  %v2631_v45 = vld [vmem:[%s3333_s1 + $0x80] sm:$0xff]  ;;  %v497_v11 = vunpack.c.2.s8 %v373_v44  ;;  %v501_v12 = vunpack.c.3.s8 %v373_v44 }
  0x3b   : > { %1528 = vperm.xlu1 %2816, %v1454_v35   ;;  %v346_v35 = vld [vmem:[%s2933_s30 + $0x10] sm:$0xff] }
  0x3c   : > { %1042 = vmatmul.bf16.gmra.mxu2 %v668_v42  ;;  %v685_v42 = vpack.c.bf16 %v613_v39, %v609_v38  ;;  %v625_v22 = vcvt.s32.f32 %v497_v11  ;;  %v629_v23 = vcvt.s32.f32 %v501_v12  ;;  %v378_v37 = vunpack.c.0.s8 %v346_v35  ;;  %v1458_v11 = vld [vmem:[%s2988_s19 + $0x70] sm:$0xff]  ;;  %v1475_v12 = vld [vmem:[%s2988_s19 + $0xf8] sm:$0xff] }
  0x3d   : > { %1131 = vmatmul.bf16.gmra.mxu3 %v669_v43  ;;  %1171 = vmatpush.bf16.msrb.mxu2 %v2634_v58  ;;  %v372_v43 = vld [vmem:[%s2933_s30 + $0xe0] sm:$0xff]  ;;  %v493_v58 = vunpack.c.1.s8 %v373_v44  ;;  %v382_v38 = vunpack.c.1.s8 %v346_v35  ;;  %v379_v39 = vunpack.c.0.s8 %v347_v36 }
  0x3e   : > { %1260 = vmatpush.bf16.msrb.mxu3 %v2642_v59  ;;  %v488_v55 = vunpack.c.0.s8 %v372_v43  ;;  %v504_v59 = vcvt.s32.f32 %v376_v51  ;;  %v693_v31 = vpack.c.bf16 %v629_v23, %v625_v22  ;;  %v506_v50 = vcvt.s32.f32 %v378_v37 }
  0x3f   : > { %1553 = vperm.xlu0 %2815, %v1459_v40   ;;  %v621_v5 = vcvt.s32.f32 %v493_v58  ;;  %1503 = vperm.xlu2 %2817, %v1449_v32   ;;  %v383_v40 = vunpack.c.1.s8 %v347_v36  ;;  %v510_v51 = vcvt.s32.f32 %v382_v38  ;;  %v507_v54 = vcvt.s32.f32 %v379_v39  ;;  %v1461_v32 = vld [vmem:[%s2988_s19 + $0x88] sm:$0xff] }
  0x40   : > { %v632_v63 = vpack.c.bf16 %v508_v60, %v504_v59  ;;  %v616_v2 = vcvt.s32.f32 %v488_v55  ;;  %v521_v58 = vcvt.s32.f32 %v393_v52  ;;  %v525_v59 = vcvt.s32.f32 %v397_v53 }
  0x41   : > { %1172 = vmatpush.bf16.msrb.mxu2 %v2633_v9  ;;  %v496_v9 = vunpack.c.2.s8 %v372_v43  ;;  %v511_v55 = vcvt.s32.f32 %v383_v40  ;;  %v634_v62 = vpack.c.bf16 %v510_v51, %v506_v50 }
  0x42   : > { %1261 = vmatpush.bf16.msrb.mxu3 %v2641_v10  ;;  %997 = vmatmul.bf16.vlgmr.msra.gmra.mxu0 %v632_v63  ;;  %v500_v10 = vunpack.c.3.s8 %v372_v43  ;;  %v641_v61 = vpack.c.bf16 %v525_v59, %v521_v58 }
  0x43   : > { %1543 = vperm.xlu1 %2816, %v1457_v47   ;;  %v624_v20 = vcvt.s32.f32 %v496_v9  ;;  %v635_v63 = vpack.c.bf16 %v511_v55, %v507_v54  ;;  %v2677_v9 = vld [vmem:[%s3336_s4 + $0x30] sm:$0xff] }
  0x44   : > { %v628_v21 = vcvt.s32.f32 %v500_v10  ;;  %v2669_v10 = vld [vmem:[%s3335_s3 + $0x30] sm:$0xff] }
  0x45   : > { %1173 = vmatpush.bf16.msrb.mxu2 %v2632_v27  ;;  %v517_v27 = vcvt.s32.f32 %v389_v19 }
  0x46   : > { %1262 = vmatpush.bf16.msrb.mxu3 %v2640_v28  ;;  %v692_v30 = vpack.c.bf16 %v628_v21, %v624_v20 }
  0x47   : > { %1568 = vperm.xlu0 %2815, %v1462_v48  }
  0x49   : > { %1174 = vmatpush.bf16.msrb.mxu2 %v2631_v45  ;;  %v1474_v45 = vld [vmem:[%s2988_s19 + $0xf0] sm:$0xff] }
  0x4a   : > { %1263 = vmatpush.bf16.msrb.mxu3 %v2639_v46  ;;  %v348_v46 = vld [vmem:[%s2933_s30 + $0x20] sm:$0xff] }
  0x4b   : > { %1558 = vperm.xlu1 %2816, %v1460_v1   ;;  %v392_v47 = vunpack.c.0.s8 %v348_v46  ;;  %v396_v48 = vunpack.c.1.s8 %v348_v46  ;;  %v1472_v1 = vld [vmem:[%s2988_s19 + $0xe0] sm:$0xff]  ;;  %v400_v13 = vunpack.c.2.s8 %v348_v46 }
  0x4c   : > { %1047 = vmatmul.bf16.gmra.mxu2 %v672_v56  ;;  %v492_v56 = vunpack.c.1.s8 %v372_v43  ;;  %v1452_v43 = vld [vmem:[%s2988_s19 + $0x40] sm:$0xff] }
  0x4d   : > { %1136 = vmatmul.bf16.gmra.mxu3 %v673_v57  ;;  %v489_v57 = vunpack.c.0.s8 %v373_v44  ;;  %1518 = vperm.xlu2 %2817, %v1452_v43   ;;  %v1469_v44 = vld [vmem:[%s2988_s19 + $0xc8] sm:$0xff]  ;;  %v528_v21 = vcvt.s32.f32 %v400_v13  ;;  %v1470_v13 = vld [vmem:[%s2988_s19 + $0xd0] sm:$0xff] }
  0x4e   : > { %v620_v3 = vcvt.s32.f32 %v492_v56  ;;  %v520_v56 = vcvt.s32.f32 %v392_v47  ;;  %v2668_v43 = vld [vmem:[%s3335_s3 + $0x28] sm:$0xff] }
  0x4f   : > { %v617_v4 = vcvt.s32.f32 %v489_v57  ;;  %1583 = vperm.xlu0 %2815, %v1465_v6   ;;  %v524_v57 = vcvt.s32.f32 %v396_v48  ;;  %v387_v6 = vunpack.c.2.s8 %v347_v36 }
  0x51   : > { %v640_v60 = vpack.c.bf16 %v524_v57, %v520_v56  ;;  %v515_v19 = vcvt.s32.f32 %v387_v6 }
  0x53   : > { %1573 = vperm.xlu1 %2816, %v1463_v14   ;;  %v404_v14 = vunpack.c.3.s8 %v348_v46  ;;  %v353_v46 = vld [vmem:[%s2933_s30 + $0x48] sm:$0xff] }
  0x54   : > { %v413_v50 = vunpack.c.1.s8 %v353_v46 }
  0x55   : > { %1533 = vperm.xlu2 %2817, %v1455_v0   ;;  %v532_v22 = vcvt.s32.f32 %v404_v14 }
  0x56   : > { %v541_v58 = vcvt.s32.f32 %v413_v50 }
  0x57   : > { %1598 = vperm.xlu0 %2815, %v1468_v15   ;;  %v401_v15 = vunpack.c.2.s8 %v349_v49  ;;  %v409_v49 = vunpack.c.0.s8 %v353_v46 }
  0x59   : > { %v529_v23 = vcvt.s32.f32 %v401_v15  ;;  %v537_v57 = vcvt.s32.f32 %v409_v49 }
  0x5b   : > { %1588 = vperm.xlu1 %2816, %v1466_v33   ;;  %v350_v33 = vld [vmem:[%s2933_s30 + $0x30] sm:$0xff] }
  0x5c   : > { %1052 = vmatmul.bf16.gmra.mxu2 %v676_v7  ;;  %v688_v7 = vpack.c.bf16 %v620_v3, %v616_v2  ;;  %v394_v37 = vunpack.c.0.s8 %v350_v33  ;;  %v398_v38 = vunpack.c.1.s8 %v350_v33  ;;  %v406_v6 = vunpack.c.3.s8 %v350_v33 }
  0x5d   : > { %1141 = vmatmul.bf16.gmra.mxu3 %v677_v8  ;;  %v689_v8 = vpack.c.bf16 %v621_v5, %v617_v4  ;;  %v386_v4 = vunpack.c.2.s8 %v346_v35  ;;  %v390_v5 = vunpack.c.3.s8 %v346_v35  ;;  %1548 = vperm.xlu2 %2817, %v1458_v11   ;;  %v2675_v11 = vld [vmem:[%s3336_s4 + $0x20] sm:$0xff] }
  0x5e   : > { %v522_v51 = vcvt.s32.f32 %v394_v37  ;;  %v526_v52 = vcvt.s32.f32 %v398_v38 }
  0x5f   : > { %1613 = vperm.xlu0 %2815, %v1471_v34   ;;  %v351_v34 = vld [vmem:[%s2933_s30 + $0x38] sm:$0xff] }
  0x60   : > { %v395_v39 = vunpack.c.0.s8 %v351_v34  ;;  %v399_v40 = vunpack.c.1.s8 %v351_v34  ;;  %v642_v0 = vpack.c.bf16 %v526_v52, %v522_v51 }
  0x62   : > { %v523_v53 = vcvt.s32.f32 %v395_v39  ;;  %v527_v54 = vcvt.s32.f32 %v399_v40 }
  0x63   : > { %1603 = vperm.xlu1 %2816, %v1469_v44   ;;  %v1464_v44 = vld [vmem:[%s2988_s19 + $0xa0] sm:$0xff] }
  0x65   : > { %1563 = vperm.xlu2 %2817, %v1461_v32  }
  0x67   : > { %1628 = vperm.xlu0 %2815, %v1474_v45   ;;  %v352_v45 = vld [vmem:[%s2933_s30 + $0x40] sm:$0xff] }
  0x68   : > { %v408_v47 = vunpack.c.0.s8 %v352_v45  ;;  %v412_v48 = vunpack.c.1.s8 %v352_v45  ;;  %v416_v14 = vunpack.c.2.s8 %v352_v45  ;;  %v420_v15 = vunpack.c.3.s8 %v352_v45  ;;  %v2674_v45 = vld [vmem:[%s3336_s4 + $0x18] sm:$0xff] }
  0x6a   : > { %v536_v55 = vcvt.s32.f32 %v408_v47  ;;  %v540_v56 = vcvt.s32.f32 %v412_v48  ;;  %v356_v47 = vld [vmem:[%s2933_s30 + $0x60] sm:$0xff]  ;;  %v357_v48 = vld [vmem:[%s2933_s30 + $0x68] sm:$0xff] }
  0x6b   : > { %1618 = vperm.xlu1 %2816, %v1472_v1   ;;  %v643_v1 = vpack.c.bf16 %v527_v54, %v523_v53  ;;  %v424_v49 = vunpack.c.0.s8 %v356_v47  ;;  %v428_v50 = vunpack.c.1.s8 %v356_v47  ;;  %v425_v51 = vunpack.c.0.s8 %v357_v48 }
  0x6c   : > { %1057 = vmatmul.bf16.gmra.mxu2 %v680_v25  ;;  %v516_v25 = vcvt.s32.f32 %v388_v17  ;;  %v514_v17 = vcvt.s32.f32 %v386_v4  ;;  %v648_v59 = vpack.c.bf16 %v540_v56, %v536_v55  ;;  %v429_v52 = vunpack.c.1.s8 %v357_v48 }
  0x6d   : > { %1146 = vmatmul.bf16.gmra.mxu3 %v681_v26  ;;  %v513_v26 = vcvt.s32.f32 %v385_v18  ;;  %v518_v18 = vcvt.s32.f32 %v390_v5  ;;  %1578 = vperm.xlu2 %2817, %v1464_v44   ;;  %v402_v5 = vunpack.c.2.s8 %v350_v33 }
  0x6e   : > { %v636_v28 = vpack.c.bf16 %v516_v25, %v512_v24  ;;  %v533_v24 = vcvt.s32.f32 %v405_v16  ;;  %v644_v25 = vpack.c.bf16 %v532_v22, %v528_v21  ;;  %v417_v16 = vunpack.c.2.s8 %v353_v46 }
  0x6f   : > { %v637_v29 = vpack.c.bf16 %v517_v27, %v513_v26  ;;  %v544_v22 = vcvt.s32.f32 %v416_v14  ;;  %v2673_v14 = vld [vmem:[%s3336_s4 + $0x10] sm:$0xff] }
  0x70   : > { %1002 = vmatmul.bf16.gmra.mxu0 %v636_v28  ;;  %v645_v26 = vpack.c.bf16 %v533_v24, %v529_v23  ;;  %v548_v23 = vcvt.s32.f32 %v420_v15  ;;  %v545_v24 = vcvt.s32.f32 %v417_v16  ;;  %v2665_v15 = vld [vmem:[%s3335_s3 + $0x10] sm:$0xff]  ;;  %v432_v16 = vunpack.c.2.s8 %v356_v47 }
  0x71   : > { %1091 = vmatmul.bf16.gmra.mxu1 %v637_v29 }
  0x73   : > { %1633 = vperm.xlu1 %2816, %v1475_v12   ;;  %v2667_v12 = vld [vmem:[%s3335_s3 + $0x20] sm:$0xff] }
  0x7c   : > { %1062 = vmatmul.bf16.gmra.mxu2 %v684_v41  ;;  %v2678_v41 = vld [vmem:[%s3336_s4 + $0x38] sm:$0xff] }
  0x7d   : > { %1151 = vmatmul.bf16.gmra.mxu3 %v685_v42  ;;  %v2670_v42 = vld [vmem:[%s3335_s3 + $0x38] sm:$0xff]  ;;  %1897 = vmatpush.bf16.msrb.mxu0 %v2678_v41 }
  0x7e   : > { %2034 = vmatpush.bf16.msrb.mxu1 %v2670_v42  ;;  %v2676_v42 = vld [vmem:[%s3336_s4 + $0x28] sm:$0xff] }
  0x80   : > { %1007 = vmatmul.bf16.gmra.mxu0 %v640_v60  ;;  %v649_v60 = vpack.c.bf16 %v541_v58, %v537_v57  ;;  %v552_v57 = vcvt.s32.f32 %v424_v49  ;;  %v556_v58 = vcvt.s32.f32 %v428_v50  ;;  %v2664_v49 = vld [vmem:[%s3335_s3 + $0x8] sm:$0xff] }
  0x81   : > { %1096 = vmatmul.bf16.gmra.mxu1 %v641_v61  ;;  %1898 = vmatpush.bf16.msrb.mxu0 %v2677_v9  ;;  %v407_v9 = vunpack.c.3.s8 %v351_v34 }
  0x82   : > { %2035 = vmatpush.bf16.msrb.mxu1 %v2669_v10 }
  0x83   : > { %v535_v21 = vcvt.s32.f32 %v407_v9 }
  0x85   : > { %1899 = vmatpush.bf16.msrb.mxu0 %v2676_v42 }
  0x86   : > { %2036 = vmatpush.bf16.msrb.mxu1 %v2668_v43 }
  0x89   : > { %1900 = vmatpush.bf16.msrb.mxu0 %v2675_v11 }
  0x8a   : > { %2037 = vmatpush.bf16.msrb.mxu1 %v2667_v12 }
  0x8c   : > { %1067 = vmatmul.bf16.gmra.mxu2 %v688_v7  ;;  %v391_v7 = vunpack.c.3.s8 %v347_v36 }
  0x8d   : > { %1156 = vmatmul.bf16.gmra.mxu3 %v689_v8  ;;  %1901 = vmatpush.bf16.msrb.mxu0 %v2674_v45 }
  0x8e   : > { %v519_v20 = vcvt.s32.f32 %v391_v7  ;;  %v403_v7 = vunpack.c.2.s8 %v351_v34  ;;  %v1473_v34 = vld [vmem:[%s2988_s19 + $0xe8] sm:$0xff] }
  0x90   : > { %1012 = vmatmul.bf16.gmra.mxu0 %v644_v25 }
  0x91   : > { %1101 = vmatmul.bf16.gmra.mxu1 %v645_v26  ;;  %v652_v26 = vpack.c.bf16 %v548_v23, %v544_v22  ;;  %1902 = vmatpush.bf16.msrb.mxu0 %v2673_v14 }
  0x9c   : > { %1072 = vmatmul.bf16.gmra.mxu2 %v692_v30  ;;  %v638_v30 = vpack.c.bf16 %v518_v18, %v514_v17  ;;  %v421_v17 = vunpack.c.3.s8 %v353_v46  ;;  %v530_v18 = vcvt.s32.f32 %v402_v5  ;;  %v2666_v46 = vld [vmem:[%s3335_s3 + $0x18] sm:$0xff] }
  0x9d   : > { %1161 = vmatmul.bf16.gmra.mxu3 %v693_v31  ;;  %v639_v31 = vpack.c.bf16 %v519_v20, %v515_v19  ;;  %v534_v19 = vcvt.s32.f32 %v406_v6  ;;  %v531_v20 = vcvt.s32.f32 %v403_v7  ;;  %2038 = vmatpush.bf16.msrb.mxu1 %v2666_v46 }
  0x9e   : > { %v549_v25 = vcvt.s32.f32 %v421_v17  ;;  %v436_v17 = vunpack.c.3.s8 %v356_v47 }
  0x9f   : > { %v646_v32 = vpack.c.bf16 %v534_v19, %v530_v18  ;;  %v647_v33 = vpack.c.bf16 %v535_v21, %v531_v20  ;;  %v433_v18 = vunpack.c.2.s8 %v357_v48  ;;  %v437_v19 = vunpack.c.3.s8 %v357_v48  ;;  %v2672_v48 = vld [vmem:[%s3336_s4 + $0x8] sm:$0xff] }
  0xa0   : > { %1017 = vmatmul.bf16.gmra.mxu0 %v648_v59  ;;  %v553_v59 = vcvt.s32.f32 %v425_v51 }
  0xa1   : > { %1106 = vmatmul.bf16.gmra.mxu1 %v649_v60  ;;  %v557_v60 = vcvt.s32.f32 %v429_v52  ;;  %1903 = vmatpush.bf16.msrb.mxu0 %v2672_v48 }
  0xa2   : > { %2039 = vmatpush.bf16.msrb.mxu1 %v2665_v15  ;;  %v2663_v15 = vld [vmem:[%s3335_s3] sm:$0xff] }
  0xa6   : > { %2040 = vmatpush.bf16.msrb.mxu1 %v2664_v49 }
  0xaa   : > { %2041 = vmatpush.bf16.msrb.mxu1 %v2663_v15 }
  0xac   : > { %1175 = vmatmul.bf16.vlgmr.msrb.gmra.mxu2 %v634_v62 }
  0xad   : > { %1264 = vmatmul.bf16.vlgmr.msrb.gmra.mxu3 %v635_v63 }
  0xaf   : > { %v1038_v2 = vpop.f32.mrf.mxu2 }
  0xb0   : > { %v1127_v3 = vpop.f32.mrf.mxu3  ;;  %1022 = vmatmul.bf16.gmra.mxu0 %v652_v26  ;;  %v561_v26 = vcvt.s32.f32 %v433_v18  ;;  %v2647_v18 = vld [vmem:[%s3145_s17] sm:$0xff] }
  0xb1   : > { %v3055_v8 = vadd.f32 %v1127_v3, %v1038_v2  ;;  %v1467_v2 = vld [vmem:[%s2988_s19 + $0xb8] sm:$0xff] }
  0xb2   : > { %1593 = vperm.xlu2 %2817, %v1467_v2  }
  0xb7   : > { %v1040_v27 = vpop.f32.mrf.mxu2 }
  0xb8   : > { %v1129_v28 = vpop.f32.mrf.mxu3 }
  0xb9   : > { %v3065_v29 = vadd.f32 %v1129_v28, %v1040_v27  ;;  %v653_v27 = vpack.c.bf16 %v549_v25, %v545_v24  ;;  %v560_v24 = vcvt.s32.f32 %v432_v16  ;;  %v564_v25 = vcvt.s32.f32 %v436_v17 }
  0xba   : > { %1608 = vperm.xlu2 %2817, %v1470_v13  }
  0xbb   : > { %1111 = vmatmul.bf16.gmra.mxu1 %v653_v27  ;;  %v565_v27 = vcvt.s32.f32 %v437_v19 }
  0xbc   : > { %1180 = vmatmul.bf16.gmra.mxu2 %v638_v30 }
  0xbd   : > { %1269 = vmatmul.bf16.gmra.mxu3 %v639_v31 }
  0xbf   : > { %v1043_v35 = vpop.f32.mrf.mxu2  ;;  %v3130_v50 = vpop.f32.mrf.mxu0 }
  0xc0   : > { %v1132_v36 = vpop.f32.mrf.mxu3 }
  0xc1   : > { %v3070_v41 = vadd.f32 %v1132_v36, %v1043_v35  ;;  %v354_v35 = vld [vmem:[%s2933_s30 + $0x50] sm:$0xff]  ;;  %v355_v36 = vld [vmem:[%s2933_s30 + $0x58] sm:$0xff] }
  0xc2   : > { %1623 = vperm.xlu2 %2817, %v1473_v34   ;;  %v410_v39 = vunpack.c.0.s8 %v354_v35  ;;  %v414_v40 = vunpack.c.1.s8 %v354_v35  ;;  %v411_v42 = vunpack.c.0.s8 %v355_v36  ;;  %v415_v43 = vunpack.c.1.s8 %v355_v36 }
  0xc3   : > { %v418_v7 = vunpack.c.2.s8 %v354_v35  ;;  %v422_v9 = vunpack.c.3.s8 %v354_v35  ;;  %v419_v11 = vunpack.c.2.s8 %v355_v36  ;;  %v423_v12 = vunpack.c.3.s8 %v355_v36 }
  0xc4   : > { %v538_v53 = vcvt.s32.f32 %v410_v39  ;;  %v542_v54 = vcvt.s32.f32 %v414_v40  ;;  %v539_v55 = vcvt.s32.f32 %v411_v42  ;;  %v543_v56 = vcvt.s32.f32 %v415_v43 }
  0xc5   : > { %v546_v20 = vcvt.s32.f32 %v418_v7  ;;  %v550_v21 = vcvt.s32.f32 %v422_v9  ;;  %v547_v22 = vcvt.s32.f32 %v419_v11  ;;  %v551_v23 = vcvt.s32.f32 %v423_v12  ;;  %v2671_v7 = vld [vmem:[%s3336_s4] sm:$0xff] }
  0xc6   : > { %1904 = vmatpush.bf16.msrb.mxu0 %v2671_v7 }
  0xc7   : > { %v1045_v61 = vpop.f32.mrf.mxu2  ;;  %v654_v35 = vpack.c.bf16 %v550_v21, %v546_v20  ;;  %v655_v36 = vpack.c.bf16 %v551_v23, %v547_v22 }
  0xc8   : > { %v1134_v62 = vpop.f32.mrf.mxu3 }
  0xc9   : > { %v3081_v63 = vadd.f32 %v1134_v62, %v1045_v61  ;;  %v656_v61 = vpack.c.bf16 %v556_v58, %v552_v57  ;;  %v657_v62 = vpack.c.bf16 %v557_v60, %v553_v59  ;;  %v1087_v60 = vpop.f32.mrf.mxu1 }
  0xcb   : > { %1027 = vmatmul.bf16.gmra.mxu0 %v656_v61  ;;  %1116 = vmatmul.bf16.gmra.mxu1 %v657_v62  ;;  %v3135_v61 = vpop.f32.mrf.mxu0 }
  0xcc   : > { %1185 = vmatmul.bf16.gmra.mxu2 %v642_v0 }
  0xcd   : > { %1274 = vmatmul.bf16.gmra.mxu3 %v643_v1 }
  0xcf   : > { %v1048_v3 = vpop.f32.mrf.mxu2 }
  0xd0   : > { %v1137_v4 = vpop.f32.mrf.mxu3 }
  0xd1   : > { %v3084_v10 = vadd.f32 %v1137_v4, %v1048_v3  ;;  %v650_v3 = vpack.c.bf16 %v542_v54, %v538_v53  ;;  %v651_v4 = vpack.c.bf16 %v543_v56, %v539_v55  ;;  %v1089_v16 = vpop.f32.mrf.mxu1 }
  0xd7   : > { %v1050_v28 = vpop.f32.mrf.mxu2 }
  0xd8   : > { %v1139_v30 = vpop.f32.mrf.mxu3 }
  0xd9   : > { %v3093_v31 = vadd.f32 %v1139_v30, %v1050_v28  ;;  %v660_v28 = vpack.c.bf16 %v564_v25, %v560_v24  ;;  %v661_v30 = vpack.c.bf16 %v565_v27, %v561_v26  ;;  %v362_v24 = vld [vmem:[%s2933_s30 + $0x90] sm:$0xff]  ;;  %v363_v25 = vld [vmem:[%s2933_s30 + $0x98] sm:$0xff] }
  0xdb   : > { %1032 = vmatmul.bf16.gmra.mxu0 %v660_v28  ;;  %1121 = vmatmul.bf16.gmra.mxu1 %v661_v30  ;;  %v442_v30 = vunpack.c.0.s8 %v362_v24 }
  0xdc   : > { %1190 = vmatmul.bf16.gmra.mxu2 %v646_v32 }
  0xdd   : > { %1279 = vmatmul.bf16.gmra.mxu3 %v647_v33 }
  0xdf   : > { %v1053_v37 = vpop.f32.mrf.mxu2 }
  0xe0   : > { %v1142_v38 = vpop.f32.mrf.mxu3 }
  0xe1   : > { %v3098_v44 = vadd.f32 %v1142_v38, %v1053_v37  ;;  %v358_v37 = vld [vmem:[%s2933_s30 + $0x70] sm:$0xff]  ;;  %v359_v38 = vld [vmem:[%s2933_s30 + $0x78] sm:$0xff] }
  0xe2   : > { %v426_v42 = vunpack.c.0.s8 %v358_v37  ;;  %v430_v45 = vunpack.c.1.s8 %v358_v37  ;;  %v427_v46 = vunpack.c.0.s8 %v359_v38  ;;  %v431_v47 = vunpack.c.1.s8 %v359_v38 }
  0xe4   : > { %v554_v51 = vcvt.s32.f32 %v426_v42  ;;  %v558_v52 = vcvt.s32.f32 %v430_v45  ;;  %v555_v53 = vcvt.s32.f32 %v427_v46  ;;  %v559_v54 = vcvt.s32.f32 %v431_v47  ;;  %v2648_v46 = vld [vmem:[%s3145_s17 + $0x8] sm:$0xff] }
  0xe6   : > { %v658_v58 = vpack.c.bf16 %v558_v52, %v554_v51  ;;  %v659_v59 = vpack.c.bf16 %v559_v54, %v555_v53 }
  0xe7   : > { %v1055_v0 = vpop.f32.mrf.mxu2 }
  0xe8   : > { %v1144_v1 = vpop.f32.mrf.mxu3 }
  0xe9   : > { %v3108_v2 = vadd.f32 %v1144_v1, %v1055_v0  ;;  %v434_v1 = vunpack.c.2.s8 %v358_v37 }
  0xeb   : > { %v562_v9 = vcvt.s32.f32 %v434_v1  ;;  %1905 = vmatmul.bf16.vlgmr.msrb.gmra.mxu0 %v2647_v18  ;;  %v455_v1 = vunpack.c.3.s8 %v363_v25  ;;  %v2649_v18 = vld [vmem:[%s3145_s17 + $0x10] sm:$0xff] }
  0xec   : > { %1195 = vmatmul.bf16.gmra.mxu2 %v650_v3 }
  0xed   : > { %1284 = vmatmul.bf16.gmra.mxu3 %v651_v4  ;;  %v438_v4 = vunpack.c.3.s8 %v358_v37  ;;  %v3150_v17 = vpop.f32.mrf.mxu0 }
  0xee   : > { %v1092_v37 = vpop.f32.mrf.mxu1 }
  0xef   : > { %v1058_v5 = vpop.f32.mrf.mxu2  ;;  %v566_v11 = vcvt.s32.f32 %v438_v4  ;;  %v1479_v4 = vpop.permute.xlu0 %1478 }
  0xf0   : > { %v1147_v6 = vpop.f32.mrf.mxu3 }
  0xf1   : > { %v3110_v13 = vadd.f32 %v1147_v6, %v1058_v5  ;;  %v435_v5 = vunpack.c.2.s8 %v359_v38  ;;  %v439_v6 = vunpack.c.3.s8 %v359_v38  ;;  %v662_v22 = vpack.c.bf16 %v566_v11, %v562_v9 }
  0xf2   : > { %v570_v38 = vcvt.s32.f32 %v442_v30  ;;  %v583_v11 = vcvt.s32.f32 %v455_v1  ;;  %v366_v30 = vld [vmem:[%s2933_s30 + $0xb0] sm:$0xff] }
  0xf3   : > { %v563_v12 = vcvt.s32.f32 %v435_v5  ;;  %v567_v14 = vcvt.s32.f32 %v439_v6 }
  0xf5   : > { %v663_v23 = vpack.c.bf16 %v567_v14, %v563_v12  ;;  %v3157_v26 = vpop.f32.mrf.mxu0  ;;  %v1090_v14 = vadd.f32 %v1089_v16, %v3135_v61  ;;  %v367_v61 = vld [vmem:[%s2933_s30 + $0xb8] sm:$0xff] }
  0xf6   : > { %v1094_v53 = vpop.f32.mrf.mxu1 }
  0xf7   : > { %v1060_v32 = vpop.f32.mrf.mxu2 }
  0xf8   : > { %v1149_v33 = vpop.f32.mrf.mxu3 }
  0xf9   : > { %v3118_v34 = vadd.f32 %v1149_v33, %v1060_v32  ;;  %v446_v33 = vunpack.c.1.s8 %v362_v24 }
  0xfb   : > { %1910 = vmatmul.bf16.gmra.mxu0 %v2648_v46  ;;  %v459_v46 = vunpack.c.0.s8 %v367_v61 }
  0xfc   : > { %1200 = vmatmul.bf16.gmra.mxu2 %v654_v35  ;;  %v443_v35 = vunpack.c.0.s8 %v363_v25 }
  0xfd   : > { %1289 = vmatmul.bf16.gmra.mxu3 %v655_v36  ;;  %v447_v36 = vunpack.c.1.s8 %v363_v25  ;;  %v3161_v45 = vpop.f32.mrf.mxu0 }
  0xfe   : > { %v1097_v12 = vpop.f32.mrf.mxu1 }
  0xff   : > { %v1063_v39 = vpop.f32.mrf.mxu2  ;;  %v575_v42 = vcvt.s32.f32 %v447_v36 }
 0x100   : > { %v1152_v40 = vpop.f32.mrf.mxu3 }
 0x101   : > { %v3122_v43 = vadd.f32 %v1152_v40, %v1063_v39  ;;  %v574_v39 = vcvt.s32.f32 %v446_v33  ;;  %v571_v40 = vcvt.s32.f32 %v443_v35 }
 0x103   : > { %v666_v51 = vpack.c.bf16 %v574_v39, %v570_v38  ;;  %v667_v52 = vpack.c.bf16 %v575_v42, %v571_v40  ;;  %v458_v39 = vunpack.c.0.s8 %v366_v30  ;;  %v1093_v40 = vadd.f32 %v1092_v37, %v3150_v17 }
 0x104   : > { %v462_v42 = vunpack.c.1.s8 %v366_v30 }
 0x105   : > { %v3166_v54 = vpop.f32.mrf.mxu0 }
 0x106   : > { %v1099_v33 = vpop.f32.mrf.mxu1 }
 0x107   : > { %v1065_v55 = vpop.f32.mrf.mxu2 }
 0x108   : > { %v1154_v56 = vpop.f32.mrf.mxu3 }
 0x109   : > { %v3132_v57 = vadd.f32 %v1154_v56, %v1065_v55 }
 0x10b   : > { %1915 = vmatmul.bf16.gmra.mxu0 %v2649_v18 }
 0x10c   : > { %1205 = vmatmul.bf16.gmra.mxu2 %v658_v58  ;;  %v450_v58 = vunpack.c.2.s8 %v362_v24 }
 0x10d   : > { %1294 = vmatmul.bf16.gmra.mxu3 %v659_v59  ;;  %v1088_v59 = vadd.f32 %v1087_v60, %v3130_v50  ;;  %v3170_v15 = vpop.f32.mrf.mxu0 }
 0x10e   : > { %v578_v5 = vcvt.s32.f32 %v450_v58 }
 0x10f   : > { %v1068_v62 = vpop.f32.mrf.mxu2 }
 0x110   : > { %v1157_v0 = vpop.f32.mrf.mxu3 }
 0x111   : > { %v3137_v3 = vadd.f32 %v1157_v0, %v1068_v62  ;;  %v454_v62 = vunpack.c.3.s8 %v362_v24  ;;  %v451_v0 = vunpack.c.2.s8 %v363_v25  ;;  %v1484_v25 = vpop.permute.xlu0 %1483 }
 0x113   : > { %v582_v7 = vcvt.s32.f32 %v454_v62  ;;  %v579_v9 = vcvt.s32.f32 %v451_v0  ;;  %v2650_v0 = vld [vmem:[%s3145_s17 + $0x18] sm:$0xff] }
 0x115   : > { %v3175_v35 = vpop.f32.mrf.mxu0 }
 0x117   : > { %v1070_v19 = vpop.f32.mrf.mxu2 }
 0x118   : > { %v1159_v20 = vpop.f32.mrf.mxu3 }
 0x119   : > { %v3153_v21 = vadd.f32 %v1159_v20, %v1070_v19 }
 0x11b   : > { %1920 = vmatmul.bf16.gmra.mxu0 %v2650_v0 }
 0x11c   : > { %1210 = vmatmul.bf16.gmra.mxu2 %v662_v22  ;;  %v670_v22 = vpack.c.bf16 %v582_v7, %v578_v5  ;;  %v1102_v7 = vpop.f32.mrf.mxu1 }
 0x11d   : > { %1299 = vmatmul.bf16.gmra.mxu3 %v663_v23  ;;  %v671_v23 = vpack.c.bf16 %v583_v11, %v579_v9  ;;  %v3179_v62 = vpop.f32.mrf.mxu0 }
 0x11f   : > { %v1073_v27 = vpop.f32.mrf.mxu2 }
 0x120   : > { %v1162_v28 = vpop.f32.mrf.mxu3 }
 0x121   : > { %v3159_v32 = vadd.f32 %v1162_v28, %v1073_v27 }
 0x127   : > { %v1075_v47 = vpop.f32.mrf.mxu2 }
 0x128   : > { %v1164_v48 = vpop.f32.mrf.mxu3 }
 0x129   : > { %v3164_v49 = vadd.f32 %v1164_v48, %v1075_v47  ;;  %v463_v47 = vunpack.c.1.s8 %v367_v61  ;;  %v1489_v48 = vpop.permute.xlu1 %1488 }
 0x12b   : > { %v591_v58 = vcvt.s32.f32 %v463_v47 }
 0x12c   : > { %1215 = vmatmul.bf16.gmra.mxu2 %v666_v51  ;;  %v586_v51 = vcvt.s32.f32 %v458_v39 }
 0x12d   : > { %1304 = vmatmul.bf16.gmra.mxu3 %v667_v52 }
 0x12f   : > { %v1176_v55 = vpop.f32.mrf.mxu2 }
 0x130   : > { %v1265_v56 = vpop.f32.mrf.mxu3  ;;  %v1177_v6 = vadd.f32 %v1176_v55, %v1088_v59  ;;  %v590_v55 = vcvt.s32.f32 %v462_v42  ;;  %v1095_v59 = vadd.f32 %v1094_v53, %v3157_v26  ;;  %v466_v53 = vunpack.c.2.s8 %v366_v30  ;;  %v2651_v42 = vld [vmem:[%s3145_s17 + $0x20] sm:$0xff] }
 0x131   : > { %v1494_v11 = vpop.permute.xlu1 %1493  ;;  %1925 = vmatmul.bf16.gmra.mxu0 %v2651_v42 }
 0x132   : > { %v1266_v50 = vadd.f32 %v1265_v56, %v1177_v6  ;;  %v587_v56 = vcvt.s32.f32 %v459_v46  ;;  %v674_v17 = vpack.c.bf16 %v590_v55, %v586_v51 }
 0x134   : > { %v1636_v27 = vmul.f32 %v1479_v4, %v1266_v50  ;;  %v675_v37 = vpack.c.bf16 %v591_v58, %v587_v56  ;;  %v1098_v50 = vadd.f32 %v1097_v12, %v3161_v45 }
 0x137   : > { %v1178_v19 = vpop.f32.mrf.mxu2 }
 0x138   : > { %v1267_v20 = vpop.f32.mrf.mxu3  ;;  %v1179_v60 = vadd.f32 %v1178_v19, %v1090_v14 }
 0x13a   : > { %v1268_v24 = vadd.f32 %v1267_v20, %v1179_v60  ;;  %v470_v60 = vunpack.c.3.s8 %v366_v30 }
 0x13c   : > { %v1637_v28 = vmul.f32 %v1484_v25, %v1268_v24  ;;  %1220 = vmatmul.bf16.gmra.mxu2 %v670_v22  ;;  %v467_v22 = vunpack.c.2.s8 %v367_v61  ;;  %v3183_v24 = vpop.f32.mrf.mxu0  ;;  %v1499_v25 = vpop.permute.xlu2 %1498 }
 0x13d   : > { %1309 = vmatmul.bf16.gmra.mxu3 %v671_v23  ;;  %v471_v23 = vunpack.c.3.s8 %v367_v61 }
 0x13e   : > { %v1668_v16 = vpack.c.bf16 %v1637_v28, %v1636_v27  ;;  %v1104_v27 = vpop.f32.mrf.mxu1  ;;  %v594_v28 = vcvt.s32.f32 %v466_v53 }
 0x13f   : > { %v1181_v36 = vpop.f32.mrf.mxu2  ;;  %v599_v39 = vcvt.s32.f32 %v471_v23 }
 0x140   : > { %v1270_v38 = vpop.f32.mrf.mxu3  ;;  %2042 = vmatmul.bf16.vlgmr.msrb.gmra.mxu1 %v1668_v16  ;;  %v1182_v52 = vadd.f32 %v1181_v36, %v1093_v40  ;;  %v598_v36 = vcvt.s32.f32 %v470_v60  ;;  %v1100_v40 = vadd.f32 %v1099_v33, %v3166_v54  ;;  %v370_v54 = vld [vmem:[%s2933_s30 + $0xd0] sm:$0xff]  ;;  %v371_v33 = vld [vmem:[%s2933_s30 + $0xd8] sm:$0xff] }
 0x142   : > { %v1271_v5 = vadd.f32 %v1270_v38, %v1182_v52  ;;  %v595_v38 = vcvt.s32.f32 %v467_v22  ;;  %v678_v47 = vpack.c.bf16 %v598_v36, %v594_v28  ;;  %v1514_v36 = vpop.permute.xlu1 %1513 }
 0x144   : > { %v1638_v14 = vmul.f32 %v1489_v48, %v1271_v5  ;;  %v679_v61 = vpack.c.bf16 %v599_v39, %v595_v38  ;;  %v3187_v51 = vpop.f32.mrf.mxu0  ;;  %v1504_v52 = vpop.permute.xlu2 %1503  ;;  %v1103_v5 = vadd.f32 %v1102_v7, %v3170_v15 }
 0x146   : > { %v1107_v58 = vpop.f32.mrf.mxu1 }
 0x147   : > { %v1183_v1 = vpop.f32.mrf.mxu2 }
 0x148   : > { %v1272_v4 = vpop.f32.mrf.mxu3  ;;  %v1184_v6 = vadd.f32 %v1183_v1, %v1095_v59 }
 0x14a   : > { %v1273_v9 = vadd.f32 %v1272_v4, %v1184_v6  ;;  %v474_v4 = vunpack.c.0.s8 %v370_v54  ;;  %v478_v6 = vunpack.c.1.s8 %v370_v54 }
 0x14c   : > { %1225 = vmatmul.bf16.gmra.mxu2 %v674_v17  ;;  %v1639_v18 = vmul.f32 %v1494_v11, %v1273_v9  ;;  %v475_v17 = vunpack.c.0.s8 %v371_v33  ;;  %v602_v9 = vcvt.s32.f32 %v474_v4 }
 0x14d   : > { %1314 = vmatmul.bf16.gmra.mxu3 %v675_v37  ;;  %v479_v37 = vunpack.c.1.s8 %v371_v33 }
 0x14e   : > { %v1669_v19 = vpack.c.bf16 %v1639_v18, %v1638_v14  ;;  %v606_v14 = vcvt.s32.f32 %v478_v6  ;;  %v603_v18 = vcvt.s32.f32 %v475_v17  ;;  %v1109_v53 = vpop.f32.mrf.mxu1 }
 0x14f   : > { %v1186_v20 = vpop.f32.mrf.mxu2 }
 0x150   : > { %v1275_v26 = vpop.f32.mrf.mxu3  ;;  %2047 = vmatmul.bf16.gmra.mxu1 %v1669_v19  ;;  %v1187_v16 = vadd.f32 %v1186_v20, %v1098_v50  ;;  %v607_v19 = vcvt.s32.f32 %v479_v37  ;;  %v3192_v20 = vpop.f32.mrf.mxu0  ;;  %v2652_v50 = vld [vmem:[%s3145_s17 + $0x28] sm:$0xff]  ;;  %v682_v15 = vpack.c.bf16 %v606_v14, %v602_v9 }
 0x151   : > { %1930 = vmatmul.bf16.gmra.mxu0 %v2652_v50 }
 0x152   : > { %v1276_v12 = vadd.f32 %v1275_v26, %v1187_v16  ;;  %v1105_v26 = vadd.f32 %v1104_v27, %v3175_v35  ;;  %v683_v7 = vpack.c.bf16 %v607_v19, %v603_v18  ;;  %v1509_v16 = vpop.permute.xlu0 %1508  ;;  %v375_v19 = vld [vmem:[%s2933_s30 + $0xf8] sm:$0xff] }
 0x154   : > { %v1640_v55 = vmul.f32 %v1499_v25, %v1276_v12 }
 0x156   : > { %v1112_v12 = vpop.f32.mrf.mxu1 }
 0x157   : > { %v1188_v46 = vpop.f32.mrf.mxu2 }
 0x158   : > { %v1277_v45 = vpop.f32.mrf.mxu3  ;;  %v1189_v30 = vadd.f32 %v1188_v46, %v1100_v40  ;;  %v3196_v42 = vpop.f32.mrf.mxu0  ;;  %v482_v46 = vunpack.c.2.s8 %v370_v54 }
 0x15a   : > { %v1278_v48 = vadd.f32 %v1277_v45, %v1189_v30  ;;  %v1108_v45 = vadd.f32 %v1107_v58, %v3179_v62  ;;  %v486_v30 = vunpack.c.3.s8 %v370_v54  ;;  %v1524_v9 = vpop.permute.xlu0 %1523 }
 0x15c   : > { %1230 = vmatmul.bf16.gmra.mxu2 %v678_v47  ;;  %v1641_v56 = vmul.f32 %v1504_v52, %v1278_v48  ;;  %v483_v47 = vunpack.c.2.s8 %v371_v33  ;;  %v610_v48 = vcvt.s32.f32 %v482_v46 }
 0x15d   : > { %1319 = vmatmul.bf16.gmra.mxu3 %v679_v61  ;;  %v487_v61 = vunpack.c.3.s8 %v371_v33 }
 0x15e   : > { %v1670_v59 = vpack.c.bf16 %v1641_v56, %v1640_v55  ;;  %v614_v55 = vcvt.s32.f32 %v486_v30  ;;  %v611_v56 = vcvt.s32.f32 %v483_v47  ;;  %v1114_v33 = vpop.f32.mrf.mxu1 }
 0x15f   : > { %v1191_v0 = vpop.f32.mrf.mxu2 }
 0x160   : > { %v1280_v1 = vpop.f32.mrf.mxu3  ;;  %2052 = vmatmul.bf16.gmra.mxu1 %v1670_v59  ;;  %v1192_v11 = vadd.f32 %v1191_v0, %v1103_v5  ;;  %v615_v59 = vcvt.s32.f32 %v487_v61  ;;  %v1110_v0 = vadd.f32 %v1109_v53, %v3183_v24  ;;  %v686_v62 = vpack.c.bf16 %v614_v55, %v610_v48  ;;  %v1030_v54 = vpop.f32.mrf.mxu0  ;;  %v374_v24 = vld [vmem:[%s2933_s30 + $0xf0] sm:$0xff] }
 0x161   : > { %v1529_v48 = vpop.permute.xlu1 %1528 }
 0x162   : > { %v1281_v23 = vadd.f32 %v1280_v1, %v1192_v11  ;;  %v2653_v1 = vld [vmem:[%s3145_s17 + $0x30] sm:$0xff]  ;;  %v687_v58 = vpack.c.bf16 %v615_v59, %v611_v56  ;;  %v1519_v11 = vpop.permute.xlu2 %1518 }
 0x163   : > { %1935 = vmatmul.bf16.gmra.mxu0 %v2653_v1 }
 0x164   : > { %v1642_v38 = vmul.f32 %v1509_v16, %v1281_v23  ;;  %v494_v23 = vunpack.c.1.s8 %v374_v24 }
 0x167   : > { %v1193_v60 = vpop.f32.mrf.mxu2 }
 0x168   : > { %v1282_v22 = vpop.f32.mrf.mxu3  ;;  %v1194_v25 = vadd.f32 %v1193_v60, %v1105_v26  ;;  %v490_v60 = vunpack.c.0.s8 %v374_v24 }
 0x16a   : > { %v1283_v28 = vadd.f32 %v1282_v22, %v1194_v25  ;;  %v1113_v22 = vadd.f32 %v1112_v12, %v3187_v51  ;;  %v491_v25 = vunpack.c.0.s8 %v375_v19 }
 0x16c   : > { %1235 = vmatmul.bf16.gmra.mxu2 %v682_v15  ;;  %v1643_v39 = vmul.f32 %v1514_v36, %v1283_v28  ;;  %v495_v15 = vunpack.c.1.s8 %v375_v19  ;;  %v1033_v28 = vpop.f32.mrf.mxu0  ;;  %v1117_v36 = vpop.f32.mrf.mxu1 }
 0x16d   : > { %1324 = vmatmul.bf16.gmra.mxu3 %v683_v7  ;;  %v618_v7 = vcvt.s32.f32 %v490_v60 }
 0x16e   : > { %v1671_v40 = vpack.c.bf16 %v1643_v39, %v1642_v38  ;;  %v622_v38 = vcvt.s32.f32 %v494_v23  ;;  %v619_v39 = vcvt.s32.f32 %v491_v25 }
 0x16f   : > { %v1196_v35 = vpop.f32.mrf.mxu2 }
 0x170   : > { %v1285_v27 = vpop.f32.mrf.mxu3  ;;  %2057 = vmatmul.bf16.gmra.mxu1 %v1671_v40  ;;  %v1197_v52 = vadd.f32 %v1196_v35, %v1108_v45  ;;  %v623_v40 = vcvt.s32.f32 %v495_v15  ;;  %v1115_v35 = vadd.f32 %v1114_v33, %v3192_v20  ;;  %v690_v61 = vpack.c.bf16 %v622_v38, %v618_v7  ;;  %v1539_v7 = vpop.permute.xlu0 %1538 }
 0x172   : > { %v1286_v6 = vadd.f32 %v1285_v27, %v1197_v52  ;;  %v2654_v27 = vld [vmem:[%s3145_s17 + $0x38] sm:$0xff]  ;;  %v691_v51 = vpack.c.bf16 %v623_v40, %v619_v39  ;;  %v1534_v52 = vpop.permute.xlu2 %1533 }
 0x173   : > { %1940 = vmatmul.bf16.gmra.mxu0 %v2654_v27 }
 0x174   : > { %v1644_v14 = vmul.f32 %v1519_v11, %v1286_v6  ;;  %v1035_v59 = vpop.f32.mrf.mxu0  ;;  %v1118_v6 = vadd.f32 %v1117_v36, %v3196_v42 }
 0x177   : > { %v1198_v4 = vpop.f32.mrf.mxu2 }
 0x178   : > { %v1287_v5 = vpop.f32.mrf.mxu3  ;;  %v1199_v17 = vadd.f32 %v1198_v4, %v1110_v0  ;;  %v1119_v0 = vpop.f32.mrf.mxu1 }
 0x17a   : > { %v1288_v37 = vadd.f32 %v1287_v5, %v1199_v17  ;;  %v498_v5 = vunpack.c.2.s8 %v374_v24  ;;  %v502_v17 = vunpack.c.3.s8 %v374_v24 }
 0x17c   : > { %v1645_v18 = vmul.f32 %v1524_v9, %v1288_v37  ;;  %1240 = vmatmul.bf16.gmra.mxu2 %v686_v62  ;;  %v499_v62 = vunpack.c.2.s8 %v375_v19  ;;  %v626_v37 = vcvt.s32.f32 %v498_v5  ;;  %v630_v9 = vcvt.s32.f32 %v502_v17  ;;  %v2657_v17 = vld [vmem:[%s3145_s17 + $0x50] sm:$0xff] }
 0x17d   : > { %1329 = vmatmul.bf16.gmra.mxu3 %v687_v58  ;;  %v503_v58 = vunpack.c.3.s8 %v375_v19  ;;  %v1544_v19 = vpop.permute.xlu1 %1543 }
 0x17e   : > { %v1672_v26 = vpack.c.bf16 %v1645_v18, %v1644_v14  ;;  %v627_v11 = vcvt.s32.f32 %v499_v62  ;;  %v3207_v18 = vpop.f32.mrf.mxu0  ;;  %v694_v25 = vpack.c.bf16 %v630_v9, %v626_v37 }
 0x17f   : > { %v1201_v53 = vpop.f32.mrf.mxu2  ;;  %v631_v14 = vcvt.s32.f32 %v503_v58 }
 0x180   : > { %v1290_v50 = vpop.f32.mrf.mxu3  ;;  %2062 = vmatmul.bf16.gmra.mxu1 %v1672_v26  ;;  %v1202_v16 = vadd.f32 %v1201_v53, %v1113_v22  ;;  %v1120_v26 = vadd.f32 %v1119_v0, %v1030_v54  ;;  %v2655_v53 = vld [vmem:[%s3145_s17 + $0x40] sm:$0xff]  ;;  %v1122_v42 = vpop.f32.mrf.mxu1 }
 0x181   : > { %v695_v15 = vpack.c.bf16 %v631_v14, %v627_v11 }
 0x182   : > { %v1291_v30 = vadd.f32 %v1290_v50, %v1202_v16 }
 0x183   : > { %1945 = vmatmul.bf16.gmra.mxu0 %v2655_v53 }
 0x184   : > { %v1646_v55 = vmul.f32 %v1529_v48, %v1291_v30 }
 0x185   : > { %v1559_v11 = vpop.permute.xlu1 %1558 }
 0x186   : > { %v1908_v38 = vpop.f32.mrf.mxu0 }
 0x187   : > { %v1203_v46 = vpop.f32.mrf.mxu2 }
 0x188   : > { %v1292_v45 = vpop.f32.mrf.mxu3  ;;  %v1204_v47 = vadd.f32 %v1203_v46, %v1115_v35  ;;  %v1123_v35 = vadd.f32 %v1122_v42, %v1033_v28  ;;  %v1124_v27 = vpop.f32.mrf.mxu1 }
 0x189   : > { %v1125_v30 = vadd.f32 %v1124_v27, %v1035_v59 }
 0x18a   : > { %v1293_v12 = vadd.f32 %v1292_v45, %v1204_v47  ;;  %v2656_v47 = vld [vmem:[%s3145_s17 + $0x48] sm:$0xff] }
 0x18c   : > { %v1647_v56 = vmul.f32 %v1534_v52, %v1293_v12  ;;  %1245 = vmatmul.bf16.gmra.mxu2 %v690_v61 }
 0x18d   : > { %1334 = vmatmul.bf16.gmra.mxu3 %v691_v51 }
 0x18e   : > { %v1673_v1 = vpack.c.bf16 %v1647_v56, %v1646_v55  ;;  %v3210_v45 = vpop.f32.mrf.mxu0  ;;  %v1554_v55 = vpop.permute.xlu0 %1553 }
 0x18f   : > { %v1206_v20 = vpop.f32.mrf.mxu2  ;;  %v1549_v56 = vpop.permute.xlu2 %1548 }
 0x190   : > { %v1295_v4 = vpop.f32.mrf.mxu3  ;;  %2067 = vmatmul.bf16.gmra.mxu1 %v1673_v1  ;;  %v1207_v33 = vadd.f32 %v1206_v20, %v1118_v6 }
 0x192   : > { %v1296_v22 = vadd.f32 %v1295_v4, %v1207_v33 }
 0x193   : > { %1950 = vmatmul.bf16.gmra.mxu0 %v2656_v47 }
 0x194   : > { %v1648_v16 = vmul.f32 %v1539_v7, %v1296_v22 }
 0x196   : > { %v1913_v20 = vpop.f32.mrf.mxu0 }
 0x197   : > { %v1208_v50 = vpop.f32.mrf.mxu2  ;;  %v1564_v14 = vpop.permute.xlu2 %1563 }
 0x198   : > { %v1297_v60 = vpop.f32.mrf.mxu3  ;;  %v1209_v23 = vadd.f32 %v1208_v50, %v1120_v26 }
 0x19a   : > { %v1298_v24 = vadd.f32 %v1297_v60, %v1209_v23 }
 0x19c   : > { %v1649_v36 = vmul.f32 %v1544_v19, %v1298_v24  ;;  %1250 = vmatmul.bf16.gmra.mxu2 %v694_v25 }
 0x19d   : > { %1339 = vmatmul.bf16.gmra.mxu3 %v695_v15 }
 0x19e   : > { %v1674_v39 = vpack.c.bf16 %v1649_v36, %v1648_v16  ;;  %v3214_v59 = vpop.f32.mrf.mxu0  ;;  %v2658_v16 = vld [vmem:[%s3145_s17 + $0x58] sm:$0xff] }
 0x19f   : > { %v1211_v54 = vpop.f32.mrf.mxu2 }
 0x1a0   : > { %v1300_v40 = vpop.f32.mrf.mxu3  ;;  %2072 = vmatmul.bf16.gmra.mxu1 %v1674_v39  ;;  %v1212_v46 = vadd.f32 %v1211_v54, %v1123_v35 }
 0x1a2   : > { %v1301_v12 = vadd.f32 %v1300_v40, %v1212_v46 }
 0x1a3   : > { %1955 = vmatmul.bf16.gmra.mxu0 %v2657_v17 }
 0x1a4   : > { %v1650_v0 = vmul.f32 %v1549_v56, %v1301_v12 }
 0x1a6   : > { %v3218_v60 = vpop.f32.mrf.mxu0 }
 0x1a7   : > { %v1213_v61 = vpop.f32.mrf.mxu2 }
 0x1a8   : > { %v1302_v51 = vpop.f32.mrf.mxu3  ;;  %v1214_v48 = vadd.f32 %v1213_v61, %v1125_v30  ;;  %v1574_v30 = vpop.permute.xlu1 %1573 }
 0x1aa   : > { %v1303_v52 = vadd.f32 %v1302_v51, %v1214_v48 }
 0x1ac   : > { %v1651_v1 = vmul.f32 %v1554_v55, %v1303_v52 }
 0x1ae   : > { %v1675_v28 = vpack.c.bf16 %v1651_v1, %v1650_v0  ;;  %v3227_v24 = vpop.f32.mrf.mxu0 }
 0x1af   : > { %v1216_v4 = vpop.f32.mrf.mxu2 }
 0x1b0   : > { %v1305_v5 = vpop.f32.mrf.mxu3  ;;  %2077 = vmatmul.bf16.gmra.mxu1 %v1675_v28  ;;  %v1217_v6 = vadd.f32 %v1216_v4, %v3055_v8 }
 0x1b2   : > { %v1306_v37 = vadd.f32 %v1305_v5, %v1217_v6  ;;  %v2659_v5 = vld [vmem:[%s3145_s17 + $0x60] sm:$0xff] }
 0x1b3   : > { %1960 = vmatmul.bf16.gmra.mxu0 %v2658_v16  ;;  %v2660_v16 = vld [vmem:[%s3145_s17 + $0x68] sm:$0xff] }
 0x1b4   : > { %v1652_v26 = vmul.f32 %v1559_v11, %v1306_v37  ;;  %v1579_v11 = vpop.permute.xlu2 %1578 }
 0x1b6   : > { %v3239_v12 = vpop.f32.mrf.mxu0 }
 0x1b7   : > { %v1218_v62 = vpop.f32.mrf.mxu2 }
 0x1b8   : > { %v1307_v58 = vpop.f32.mrf.mxu3  ;;  %v1219_v33 = vadd.f32 %v1218_v62, %v3065_v29  ;;  %v3224_v29 = vld [vmem:[%s3337_s5] ss:$0 sm:$0xff] }
 0x1ba   : > { %v1308_v9 = vadd.f32 %v1307_v58, %v1219_v33 }
 0x1bc   : > { %v1653_v53 = vmul.f32 %v1564_v14, %v1308_v9 }
 0x1bd   : > { %v2043_v50 = vpop.f32.mrf.mxu1 }
 0x1be   : > { %v1676_v8 = vpack.c.bf16 %v1653_v53, %v1652_v26  ;;  %v2044_v25 = vadd.f32 %v2043_v50, %v3207_v18  ;;  %v3244_v1 = vpop.f32.mrf.mxu0 }
 0x1bf   : > { %v1221_v22 = vpop.f32.mrf.mxu2 }
 0x1c0   : > { %v1310_v23 = vpop.f32.mrf.mxu3  ;;  %2082 = vmatmul.bf16.gmra.mxu1 %v1676_v8  ;;  %v1222_v15 = vadd.f32 %v1221_v22, %v3070_v41  ;;  %v2127_v7 = vadd.f32 %v3224_v29, %v2044_v25  ;;  %v1569_v41 = vpop.permute.xlu0 %1568 }
 0x1c2   : > { %v1311_v54 = vadd.f32 %v1310_v23, %v1222_v15  ;;  %v2159_v35 = vmax.f32 %v2127_v7, 0.0 }
 0x1c3   : > { %1965 = vmatmul.bf16.gmra.mxu0 %v2659_v5 }
 0x1c5   : > { %v2045_v42 = vpop.f32.mrf.mxu1 }
 0x1c6   : > { %v2046_v19 = vadd.f32 %v2045_v42, %v1908_v38  ;;  %v1654_v38 = vmul.f32 %v1569_v41, %v1311_v54  ;;  %v3250_v50 = vpop.f32.mrf.mxu0 }
 0x1c7   : > { %v1223_v36 = vpop.f32.mrf.mxu2 }
 0x1c8   : > { %v1312_v39 = vpop.f32.mrf.mxu3  ;;  %v2128_v18 = vadd.f32 %v3224_v29, %v2046_v19  ;;  %v1224_v40 = vadd.f32 %v1223_v36, %v3081_v63 }
 0x1ca   : > { %v2160_v27 = vmax.f32 %v2128_v18, 0.0  ;;  %v1313_v46 = vadd.f32 %v1312_v39, %v1224_v40 }
 0x1cc   : > { %v2682_v47 = vpack.c.bf16 %v2160_v27, %v2159_v35  ;;  %v1655_v61 = vmul.f32 %v1574_v30, %v1313_v46  ;;  %v1589_v27 = vpop.permute.xlu1 %1588  ;;  %v1594_v46 = vpop.permute.xlu2 %1593 }
 0x1cd   : > { %v2048_v51 = vpop.f32.mrf.mxu1 }
 0x1ce   : > { %2683 = vst [vmem:[%s3237_s28] sm:$0xff] %v2682_v47   ;;  %v1677_v63 = vpack.c.bf16 %v1655_v61, %v1654_v38  ;;  %v2049_v55 = vadd.f32 %v2048_v51, %v3210_v45  ;;  %v3255_v42 = vpop.f32.mrf.mxu0 }
 0x1cf   : > { %v1226_v48 = vpop.f32.mrf.mxu2 }
 0x1d0   : > { %v1315_v52 = vpop.f32.mrf.mxu3  ;;  %2087 = vmatmul.bf16.gmra.mxu1 %v1677_v63  ;;  %v1227_v56 = vadd.f32 %v1226_v48, %v3084_v10  ;;  %v2129_v28 = vadd.f32 %v3224_v29, %v2049_v55  ;;  %v1584_v10 = vpop.permute.xlu0 %1583 }
 0x1d2   : > { %v1316_v62 = vadd.f32 %v1315_v52, %v1227_v56  ;;  %v2161_v33 = vmax.f32 %v2129_v28, 0.0  ;;  %v2661_v28 = vld [vmem:[%s3145_s17 + $0x70] sm:$0xff] }
 0x1d3   : > { %1970 = vmatmul.bf16.gmra.mxu0 %v2660_v16 }
 0x1d4   : > { %v1656_v14 = vmul.f32 %v1579_v11, %v1316_v62 }
 0x1d5   : > { %v2050_v0 = vpop.f32.mrf.mxu1 }
 0x1d6   : > { %v2051_v4 = vadd.f32 %v2050_v0, %v1913_v20  ;;  %v3262_v47 = vpop.f32.mrf.mxu0 }
 0x1d7   : > { %v1228_v6 = vpop.f32.mrf.mxu2 }
 0x1d8   : > { %v1317_v17 = vpop.f32.mrf.mxu3  ;;  %v2130_v58 = vadd.f32 %v3224_v29, %v2051_v4  ;;  %v1229_v37 = vadd.f32 %v1228_v6, %v3093_v31 }
 0x1da   : > { %v2162_v45 = vmax.f32 %v2130_v58, 0.0  ;;  %v1318_v9 = vadd.f32 %v1317_v17, %v1229_v37  ;;  %v1599_v37 = vpop.permute.xlu0 %1598 }
 0x1dc   : > { %v2687_v26 = vpack.c.bf16 %v2162_v45, %v2161_v33  ;;  %v1657_v53 = vmul.f32 %v1584_v10, %v1318_v9  ;;  %v1604_v33 = vpop.permute.xlu1 %1603 }
 0x1dd   : > { %v2053_v20 = vpop.f32.mrf.mxu1 }
 0x1de   : > { %2759 = vst [vmem:[%s3237_s28 + $0x8] sm:$0xff] %v2687_v26   ;;  %v1678_v8 = vpack.c.bf16 %v1657_v53, %v1656_v14  ;;  %v2054_v31 = vadd.f32 %v2053_v20, %v3214_v59 }
 0x1df   : > { %v1231_v22 = vpop.f32.mrf.mxu2 }
 0x1e0   : > { %v1320_v23 = vpop.f32.mrf.mxu3  ;;  %2092 = vmatmul.bf16.gmra.mxu1 %v1678_v8  ;;  %v1232_v25 = vadd.f32 %v1231_v22, %v3098_v44  ;;  %v2131_v7 = vadd.f32 %v3224_v29, %v2054_v31  ;;  %v3269_v0 = vpop.f32.mrf.mxu0  ;;  %v2662_v31 = vld [vmem:[%s3145_s17 + $0x78] sm:$0xff] }
 0x1e2   : > { %v1321_v54 = vadd.f32 %v1320_v23, %v1232_v25  ;;  %v2163_v59 = vmax.f32 %v2131_v7, 0.0 }
 0x1e3   : > { %1975 = vmatmul.bf16.gmra.mxu0 %v2661_v28 }
 0x1e4   : > { %v1658_v41 = vmul.f32 %v1589_v27, %v1321_v54 }
 0x1e5   : > { %v2055_v15 = vpop.f32.mrf.mxu1 }
 0x1e6   : > { %v2056_v19 = vadd.f32 %v2055_v15, %v3218_v60 }
 0x1e7   : > { %v1233_v36 = vpop.f32.mrf.mxu2 }
 0x1e8   : > { %v1322_v39 = vpop.f32.mrf.mxu3  ;;  %v2132_v18 = vadd.f32 %v3224_v29, %v2056_v19  ;;  %v1234_v40 = vadd.f32 %v1233_v36, %v3108_v2  ;;  %v1938_v53 = vpop.f32.mrf.mxu0 }
 0x1ea   : > { %v2164_v35 = vmax.f32 %v2132_v18, 0.0  ;;  %v1323_v44 = vadd.f32 %v1322_v39, %v1234_v40  ;;  %v1609_v18 = vpop.permute.xlu2 %1608 }
 0x1ec   : > { %v2692_v30 = vpack.c.bf16 %v2164_v35, %v2163_v59  ;;  %v1659_v38 = vmul.f32 %v1594_v46, %v1323_v44 }
 0x1ed   : > { %v2058_v60 = vpop.f32.mrf.mxu1 }
 0x1ee   : > { %2760 = vst [vmem:[%s3237_s28 + $0x10] sm:$0xff] %v2692_v30   ;;  %v1679_v61 = vpack.c.bf16 %v1659_v38, %v1658_v41  ;;  %v2059_v2 = vadd.f32 %v2058_v60, %v3227_v24 }
 0x1ef   : > { %v1236_v51 = vpop.f32.mrf.mxu2 }
 0x1f0   : > { %v1325_v63 = vpop.f32.mrf.mxu3  ;;  %2097 = vmatmul.bf16.gmra.mxu1 %v1679_v61  ;;  %v1237_v48 = vadd.f32 %v1236_v51, %v3110_v13  ;;  %v2133_v55 = vadd.f32 %v3224_v29, %v2059_v2  ;;  %v1941_v54 = vpop.f32.mrf.mxu0 }
 0x1f2   : > { %v1326_v6 = vadd.f32 %v1325_v63, %v1237_v48  ;;  %v2165_v24 = vmax.f32 %v2133_v55, 0.0 }
 0x1f3   : > { %1980 = vmatmul.bf16.gmra.mxu0 %v2662_v31 }
 0x1f4   : > { %v1660_v45 = vmul.f32 %v1599_v37, %v1326_v6 }
 0x1f5   : > { %v2060_v52 = vpop.f32.mrf.mxu1 }
 0x1f6   : > { %v2061_v56 = vadd.f32 %v2060_v52, %v3239_v12 }
 0x1f7   : > { %v1238_v4 = vpop.f32.mrf.mxu2 }
 0x1f8   : > { %v1327_v5 = vpop.f32.mrf.mxu3  ;;  %v2134_v17 = vadd.f32 %v3224_v29, %v2061_v56  ;;  %v1239_v62 = vadd.f32 %v1238_v4, %v3118_v34  ;;  %v1943_v30 = vpop.f32.mrf.mxu0 }
 0x1f9   : > { %v1624_v4 = vpop.permute.xlu2 %1623 }
 0x1fa   : > { %v2166_v58 = vmax.f32 %v2134_v17, 0.0  ;;  %v1328_v13 = vadd.f32 %v1327_v5, %v1239_v62 }
 0x1fc   : > { %v2697_v12 = vpack.c.bf16 %v2166_v58, %v2165_v24  ;;  %v1661_v9 = vmul.f32 %v1604_v33, %v1328_v13 }
 0x1fd   : > { %v2063_v10 = vpop.f32.mrf.mxu1 }
 0x1fe   : > { %2761 = vst [vmem:[%s3237_s28 + $0x18] sm:$0xff] %v2697_v12   ;;  %v1680_v11 = vpack.c.bf16 %v1661_v9, %v1660_v45  ;;  %v2064_v20 = vadd.f32 %v2063_v10, %v3244_v1 }
 0x1ff   : > { %v1241_v14 = vpop.f32.mrf.mxu2 }
 0x200   : > { %v1330_v26 = vpop.f32.mrf.mxu3  ;;  %2102 = vmatmul.bf16.gmra.mxu1 %v1680_v11  ;;  %v1242_v34 = vadd.f32 %v1241_v14, %v3122_v43  ;;  %v2135_v22 = vadd.f32 %v3224_v29, %v2064_v20  ;;  %v1614_v43 = vpop.permute.xlu0 %1613 }
 0x201   : > { %v1946_v24 = vpop.f32.mrf.mxu0 }
 0x202   : > { %v1331_v7 = vadd.f32 %v1330_v26, %v1242_v34  ;;  %v2167_v36 = vmax.f32 %v2135_v22, 0.0 }
 0x204   : > { %v1662_v40 = vmul.f32 %v1609_v18, %v1331_v7 }
 0x205   : > { %v2065_v8 = vpop.f32.mrf.mxu1 }
 0x206   : > { %v2066_v23 = vadd.f32 %v2065_v8, %v3250_v50 }
 0x207   : > { %v1243_v25 = vpop.f32.mrf.mxu2 }
 0x208   : > { %v1332_v15 = vpop.f32.mrf.mxu3  ;;  %v2136_v19 = vadd.f32 %v3224_v29, %v2066_v23  ;;  %v1244_v16 = vadd.f32 %v1243_v25, %v3132_v57  ;;  %v1629_v22 = vpop.permute.xlu0 %1628 }
 0x209   : > { %v1948_v26 = vpop.f32.mrf.mxu0 }
 0x20a   : > { %v2168_v39 = vmax.f32 %v2136_v19, 0.0  ;;  %v1333_v1 = vadd.f32 %v1332_v15, %v1244_v16 }
 0x20c   : > { %v2702_v59 = vpack.c.bf16 %v2168_v39, %v2167_v36  ;;  %v1663_v35 = vmul.f32 %v1614_v43, %v1333_v1 }
 0x20d   : > { %v2068_v50 = vpop.f32.mrf.mxu1 }
 0x20e   : > { %2762 = vst [vmem:[%s3237_s28 + $0x20] sm:$0xff] %v2702_v59   ;;  %v1681_v44 = vpack.c.bf16 %v1663_v35, %v1662_v40  ;;  %v2069_v41 = vadd.f32 %v2068_v50, %v3255_v42  ;;  %v1619_v42 = vpop.permute.xlu1 %1618 }
 0x20f   : > { %v1246_v27 = vpop.f32.mrf.mxu2 }
 0x210   : > { %v1335_v46 = vpop.f32.mrf.mxu3  ;;  %2107 = vmatmul.bf16.gmra.mxu1 %v1681_v44  ;;  %v1247_v57 = vadd.f32 %v1246_v27, %v3137_v3  ;;  %v2137_v60 = vadd.f32 %v3224_v29, %v2069_v41 }
 0x211   : > { %v1951_v7 = vpop.f32.mrf.mxu0 }
 0x212   : > { %v1336_v2 = vadd.f32 %v1335_v46, %v1247_v57  ;;  %v2169_v55 = vmax.f32 %v2137_v60, 0.0 }
 0x214   : > { %v1664_v3 = vmul.f32 %v1619_v42, %v1336_v2 }
 0x215   : > { %v2070_v38 = vpop.f32.mrf.mxu1 }
 0x216   : > { %v2071_v61 = vadd.f32 %v2070_v38, %v3262_v47 }
 0x217   : > { %v1248_v51 = vpop.f32.mrf.mxu2 }
 0x218   : > { %v1337_v63 = vpop.f32.mrf.mxu3  ;;  %v2138_v48 = vadd.f32 %v3224_v29, %v2071_v61  ;;  %v1249_v52 = vadd.f32 %v1248_v51, %v3153_v21 }
 0x219   : > { %v1953_v40 = vpop.f32.mrf.mxu0 }
 0x21a   : > { %v2170_v56 = vmax.f32 %v2138_v48, 0.0  ;;  %v1338_v28 = vadd.f32 %v1337_v63, %v1249_v52 }
 0x21c   : > { %v2707_v5 = vpack.c.bf16 %v2170_v56, %v2169_v55  ;;  %v1665_v6 = vmul.f32 %v1624_v4, %v1338_v28 }
 0x21d   : > { %v2073_v17 = vpop.f32.mrf.mxu1 }
 0x21e   : > { %2763 = vst [vmem:[%s3237_s28 + $0x28] sm:$0xff] %v2707_v5   ;;  %v1682_v62 = vpack.c.bf16 %v1665_v6, %v1664_v3  ;;  %v2074_v13 = vadd.f32 %v2073_v17, %v3269_v0  ;;  %v1634_v0 = vpop.permute.xlu1 %1633 }
 0x21f   : > { %v1251_v47 = vpop.f32.mrf.mxu2 }
 0x220   : > { %v1340_v58 = vpop.f32.mrf.mxu3  ;;  %2112 = vmatmul.bf16.gmra.mxu1 %v1682_v62  ;;  %v1252_v37 = vadd.f32 %v1251_v47, %v3159_v32  ;;  %v2139_v33 = vadd.f32 %v3224_v29, %v2074_v13 }
 0x222   : > { %v1341_v9 = vadd.f32 %v1340_v58, %v1252_v37  ;;  %v2171_v20 = vmax.f32 %v2139_v33, 0.0 }
 0x224   : > { %v1666_v23 = vmul.f32 %v1629_v22, %v1341_v9 }
 0x225   : > { %v2075_v21 = vpop.f32.mrf.mxu1 }
 0x226   : > { %v2076_v45 = vadd.f32 %v2075_v21, %v1938_v53 }
 0x227   : > { %v1253_v12 = vpop.f32.mrf.mxu2 }
 0x228   : > { %v2140_v10 = vadd.f32 %v3224_v29, %v2076_v45  ;;  %v1254_v11 = vadd.f32 %v1253_v12, %v3164_v49  ;;  %v1342_v14 = vpop.f32.mrf.mxu3 }
 0x22a   : > { %v2172_v34 = vmax.f32 %v2140_v10, 0.0  ;;  %v1343_v8 = vadd.f32 %v1342_v14, %v1254_v11 }
 0x22c   : > { %v2712_v32 = vpack.c.bf16 %v2172_v34, %v2171_v20  ;;  %v1667_v31 = vmul.f32 %v1634_v0, %v1343_v8 }
 0x22d   : > { %v2078_v25 = vpop.f32.mrf.mxu1 }
 0x22e   : > { %2764 = vst [vmem:[%s3237_s28 + $0x30] sm:$0xff] %v2712_v32   ;;  %v1683_v53 = vpack.c.bf16 %v1667_v31, %v1666_v23  ;;  %v2079_v15 = vadd.f32 %v2078_v25, %v1941_v54  ;;  %v1956_v54 = vpop.f32.mrf.mxu0 }
 0x230   : > { %2117 = vmatmul.bf16.gmra.mxu1 %v1683_v53  ;;  %v2141_v49 = vadd.f32 %v3224_v29, %v2079_v15 }
 0x232   : > { %v2173_v39 = vmax.f32 %v2141_v49, 0.0 }
 0x235   : > { %v2080_v19 = vpop.f32.mrf.mxu1 }
 0x236   : > { %v2081_v16 = vadd.f32 %v2080_v19, %v1943_v30  ;;  %v1958_v38 = vpop.f32.mrf.mxu0 }
 0x238   : > { %v2142_v36 = vadd.f32 %v3224_v29, %v2081_v16 }
 0x23a   : > { %v2174_v1 = vmax.f32 %v2142_v36, 0.0 }
 0x23c   : > { %v2717_v43 = vpack.c.bf16 %v2174_v1, %v2173_v39 }
 0x23d   : > { %v2083_v18 = vpop.f32.mrf.mxu1 }
 0x23e   : > { %2765 = vst [vmem:[%s3237_s28 + $0x38] sm:$0xff] %v2717_v43   ;;  %v2084_v59 = vadd.f32 %v2083_v18, %v1946_v24  ;;  %v1961_v55 = vpop.f32.mrf.mxu0 }
 0x240   : > { %v2143_v50 = vadd.f32 %v3224_v29, %v2084_v59 }
 0x242   : > { %v2175_v46 = vmax.f32 %v2143_v50, 0.0 }
 0x245   : > { %v2085_v35 = vpop.f32.mrf.mxu1 }
 0x246   : > { %v2086_v44 = vadd.f32 %v2085_v35, %v1948_v26  ;;  %v1963_v3 = vpop.f32.mrf.mxu0 }
 0x248   : > { %v2144_v27 = vadd.f32 %v3224_v29, %v2086_v44 }
 0x24a   : > { %v2176_v41 = vmax.f32 %v2144_v27, 0.0 }
 0x24c   : > { %v2722_v57 = vpack.c.bf16 %v2176_v41, %v2175_v46 }
 0x24d   : > { %v2088_v30 = vpop.f32.mrf.mxu1 }
 0x24e   : > { %2766 = vst [vmem:[%s3237_s28 + $0x40] sm:$0xff] %v2722_v57   ;;  %v2089_v60 = vadd.f32 %v2088_v30, %v1951_v7  ;;  %v1966_v13 = vpop.f32.mrf.mxu0 }
 0x250   : > { %v2145_v51 = vadd.f32 %v3224_v29, %v2089_v60 }
 0x252   : > { %v2177_v48 = vmax.f32 %v2145_v51, 0.0 }
 0x255   : > { %v2090_v61 = vpop.f32.mrf.mxu1 }
 0x256   : > { %v2091_v63 = vadd.f32 %v2090_v61, %v1953_v40  ;;  %v1968_v9 = vpop.f32.mrf.mxu0 }
 0x258   : > { %v2146_v2 = vadd.f32 %v3224_v29, %v2091_v63 }
 0x25a   : > { %v2178_v52 = vmax.f32 %v2146_v2, 0.0 }
 0x25c   : > { %v2727_v56 = vpack.c.bf16 %v2178_v52, %v2177_v48 }
 0x25d   : > { %v2093_v28 = vpop.f32.mrf.mxu1 }
 0x25e   : > { %2767 = vst [vmem:[%s3237_s28 + $0x48] sm:$0xff] %v2727_v56   ;;  %v2094_v42 = vadd.f32 %v2093_v28, %v1956_v54  ;;  %v1971_v34 = vpop.f32.mrf.mxu0 }
 0x260   : > { %v2147_v5 = vadd.f32 %v3224_v29, %v2094_v42 }
 0x262   : > { %v2179_v62 = vmax.f32 %v2147_v5, 0.0 }
 0x265   : > { %v2095_v4 = vpop.f32.mrf.mxu1 }
 0x266   : > { %v2096_v6 = vadd.f32 %v2095_v4, %v1958_v38  ;;  %v1973_v53 = vpop.f32.mrf.mxu0 }
 0x268   : > { %v2148_v17 = vadd.f32 %v3224_v29, %v2096_v6 }
 0x26a   : > { %v2180_v24 = vmax.f32 %v2148_v17, 0.0 }
 0x26c   : > { %v2732_v47 = vpack.c.bf16 %v2180_v24, %v2179_v62 }
 0x26d   : > { %v2098_v58 = vpop.f32.mrf.mxu1 }
 0x26e   : > { %2768 = vst [vmem:[%s3237_s28 + $0x50] sm:$0xff] %v2732_v47   ;;  %v2099_v37 = vadd.f32 %v2098_v58, %v1961_v55  ;;  %v1976_v36 = vpop.f32.mrf.mxu0 }
 0x270   : > { %v2149_v33 = vadd.f32 %v3224_v29, %v2099_v37 }
 0x272   : > { %v2181_v10 = vmax.f32 %v2149_v33, 0.0 }
 0x275   : > { %v2100_v21 = vpop.f32.mrf.mxu1 }
 0x276   : > { %v2101_v45 = vadd.f32 %v2100_v21, %v1963_v3  ;;  %v1978_v59 = vpop.f32.mrf.mxu0 }
 0x278   : > { %v2150_v12 = vadd.f32 %v3224_v29, %v2101_v45 }
 0x27a   : > { %v2182_v11 = vmax.f32 %v2150_v12, 0.0 }
 0x27c   : > { %v2737_v14 = vpack.c.bf16 %v2182_v11, %v2181_v10 }
 0x27d   : > { %v2103_v26 = vpop.f32.mrf.mxu1 }
 0x27e   : > { %2769 = vst [vmem:[%s3237_s28 + $0x58] sm:$0xff] %v2737_v14   ;;  %v2104_v20 = vadd.f32 %v2103_v26, %v1966_v13  ;;  %v1981_v57 = vpop.f32.mrf.mxu0 }
 0x280   : > { %v2151_v22 = vadd.f32 %v3224_v29, %v2104_v20 }
 0x282   : > { %v2183_v32 = vmax.f32 %v2151_v22, 0.0 }
 0x285   : > { %v2105_v8 = vpop.f32.mrf.mxu1 }
 0x286   : > { %v2106_v0 = vadd.f32 %v2105_v8, %v1968_v9  ;;  %v1983_v61 = vpop.f32.mrf.mxu0 }
 0x288   : > { %v2152_v23 = vadd.f32 %v3224_v29, %v2106_v0 }
 0x28a   : > { %v2184_v31 = vmax.f32 %v2152_v23, 0.0 }
 0x28c   : > { %v2742_v25 = vpack.c.bf16 %v2184_v31, %v2183_v32 }
 0x28d   : > { %v2108_v15 = vpop.f32.mrf.mxu1 }
 0x28e   : > { %2770 = vst [vmem:[%s3237_s28 + $0x60] sm:$0xff] %v2742_v25   ;;  %v2109_v7 = vadd.f32 %v2108_v15, %v1971_v34 }
 0x290   : > { %v2153_v49 = vadd.f32 %v3224_v29, %v2109_v7 }
 0x292   : > { %v2185_v1 = vmax.f32 %v2153_v49, 0.0 }
 0x295   : > { %v2110_v19 = vpop.f32.mrf.mxu1 }
 0x296   : > { %v2111_v16 = vadd.f32 %v2110_v19, %v1973_v53 }
 0x298   : > { %v2154_v39 = vadd.f32 %v3224_v29, %v2111_v16 }
 0x29a   : > { %v2186_v43 = vmax.f32 %v2154_v39, 0.0 }
 0x29c   : > { %v2747_v18 = vpack.c.bf16 %v2186_v43, %v2185_v1 }
 0x29d   : > { %v2113_v40 = vpop.f32.mrf.mxu1 }
 0x29e   : > { %2771 = vst [vmem:[%s3237_s28 + $0x68] sm:$0xff] %v2747_v18   ;;  %v2114_v35 = vadd.f32 %v2113_v40, %v1976_v36 }
 0x2a0   : > { %v2155_v44 = vadd.f32 %v3224_v29, %v2114_v35 }
 0x2a2   : > { %v2187_v46 = vmax.f32 %v2155_v44, 0.0 }
 0x2a5   : > { %v2115_v50 = vpop.f32.mrf.mxu1 }
 0x2a6   : > { %v2116_v54 = vadd.f32 %v2115_v50, %v1978_v59 }
 0x2a8   : > { %v2156_v27 = vadd.f32 %v3224_v29, %v2116_v54 }
 0x2aa   : > { %v2188_v41 = vmax.f32 %v2156_v27, 0.0 }
 0x2ac   : > { %v2752_v30 = vpack.c.bf16 %v2188_v41, %v2187_v46 }
 0x2ad   : > { %v2118_v38 = vpop.f32.mrf.mxu1 }
 0x2ae   : > { %2772 = vst [vmem:[%s3237_s28 + $0x70] sm:$0xff] %v2752_v30   ;;  %v2119_v60 = vadd.f32 %v2118_v38, %v1981_v57 }
 0x2b0   : > { %v2157_v63 = vadd.f32 %v3224_v29, %v2119_v60 }
 0x2b2   : > { %v2189_v52 = vmax.f32 %v2157_v63, 0.0 }
 0x2b5   : > { %v2120_v51 = vpop.f32.mrf.mxu1 }
 0x2b6   : > { %v2121_v2 = vadd.f32 %v2120_v51, %v1983_v61 }
 0x2b8   : > { %v2158_v48 = vadd.f32 %v3224_v29, %v2121_v2 }
 0x2ba   : > { %v2190_v55 = vmax.f32 %v2158_v48, 0.0 }
 0x2bc   : > { %v2757_v56 = vpack.c.bf16 %v2190_v55, %v2189_v52 }
 0x2be   : > { %2773 = vst [vmem:[%s3237_s28 + $0x78] sm:$0xff] %v2757_v56  }
 0x2bf PF: > { %s16_s23 = sadd.s32 1, %s2841_s23   ;;  %s3339_s21 = smov %s2837_s22 }
 0x2c0   : > { %p13_p6 = scmp.ge.s32.totalorder %s16_s23, 4   ;;  %s3340_s22 = smov %s3342_s24 }
 0x2c2   :  { %15 = sbr.rel (!%p13_p6) target bundleno = 2 (0x2), region = 87 }

</bundles_post_ra>
